<compile_context>
chip_gen: v6e
topology: v6e:2x2x1
jax: 0.10.0
libtpu: 0.0.40
codegen_flags: <defaults>
</compile_context>

<pallas_src>
import math
import functools

import jax
import jax.numpy as jnp
from jax.experimental import pallas as pl
from jax.experimental.pallas import tpu as pltpu

F32 = jnp.float32
BF16 = jnp.bfloat16
NEG_INF = -1e30          # finite sentinel avoids NaN on fully-masked rows
LN_EPS = 1e-6            # module spec uses nn.LayerNorm(..., eps=1e-06)


def _layer_norm(x, g, b, eps=LN_EPS):
    mu = jnp.mean(x, axis=-1, keepdims=True)
    xc = x - mu
    var = jnp.mean(xc * xc, axis=-1, keepdims=True)
    return xc * jax.lax.rsqrt(var + eps) * g + b


# ------------------------------------------------------------------- kernel
def _decoder_layer_kernel(H, hd,
                          x_ref, mem_ref, trg_ref, src_ref, pad_ref,
                          lnx_g, lnx_b,
                          s_wq, s_bq, s_wk, s_bk, s_wv, s_bv, s_wo, s_bo,
                          lnd_g, lnd_b,
                          c_wq, c_bq, c_wk, c_bk, c_wv, c_bv, c_wo, c_bo,
                          lnf_g, lnf_b,
                          ff_w1, ff_b1, ff_w2, ff_b2,
                          o_ref):
    Bt, T, D = x_ref.shape
    S = mem_ref.shape[1]
    N = Bt * T
    scale = 1.0 / math.sqrt(hd)

    # Flatten the batch block: projections / FFN run as one big (N, D) matmul.
    x = x_ref[...].reshape(N, D)                                  # f32
    mem16 = mem_ref[...].reshape(Bt * S, D).astype(BF16)          # cast once

    trg_keep = trg_ref[...] > 0.0     # (Bt, T, T) bool (masks arrive as bf16)
    src_keep = src_ref[...] > 0.0     # (Bt, 1, S)
    pad_keep = pad_ref[...] > 0.0     # (Bt, T, T)

    def bdot(a16, w_ref, b_ref):
        # bf16 MXU matmul, f32 accumulation, f32 bias. Caller pre-casts `a16`.
        return jnp.dot(a16, w_ref[...], preferred_element_type=F32) + b_ref[...]

    def to_heads(z16, L):
        # (Bt*L, H*hd) bf16 -> (H*Bt, L, hd): one lane-split + one einshape.
        zh = pltpu.einshape("mhd->hmd", z16.reshape(Bt * L, H, hd))
        return zh.reshape(H * Bt, L, hd)

    def from_heads(z, L):
        # (H*Bt, L, hd) f32 -> (Bt*L, H*hd)
        z = z.reshape(H, Bt * L, hd)
        return pltpu.einshape("hmd->mhd", z).reshape(Bt * L, H * hd)

    def attention(q16, k16, v16, Tq, Tk, pre_keep, post_keep):
        """q16: (Bt*Tq, D) bf16, already scaled; k16/v16: (Bt*Tk, D) bf16.

        Batch and heads are fused into one batched matmul pair; masks are
        broadcast over the head axis of a (H, Bt, Tq, Tk) view (no per-batch
        loop, no concatenate).
        """
        qh = to_heads(q16, Tq)                      # (H*Bt, Tq, hd)
        kh = to_heads(k16, Tk)                      # (H*Bt, Tk, hd)
        vh = to_heads(v16, Tk)                      # (H*Bt, Tk, hd)

        s = jnp.einsum('bqd,bkd->bqk', qh, kh,
                       preferred_element_type=F32)  # (H*Bt, Tq, Tk) f32
        s = s.reshape(H, Bt, Tq, Tk)                # leading-dim split (free)
        s = jnp.where(pre_keep[None], s, NEG_INF)
        m = jnp.max(s, axis=-1, keepdims=True)
        e = jnp.exp(s - m)
        p = e * pl.reciprocal(jnp.sum(e, axis=-1, keepdims=True), approx=True)
        if post_keep is not None:                   # post-softmax padding mask
            p = jnp.where(post_keep[None], p, 0.0)
        p16 = p.reshape(H * Bt, Tq, Tk).astype(BF16)
        ctx = jnp.einsum('bqk,bkd->bqd', p16, vh,
                         preferred_element_type=F32)  # (H*Bt, Tq, hd) f32
        return from_heads(ctx, Tq)                    # (Bt*Tq, D) f32

    # ---- self-attention (pre-LN, residual) --------------------------------
    h1n16 = _layer_norm(x, lnx_g[...], lnx_b[...]).astype(BF16)   # cast once
    q16 = (bdot(h1n16, s_wq, s_bq) * scale).astype(BF16)
    k16 = bdot(h1n16, s_wk, s_bk).astype(BF16)
    v16 = bdot(h1n16, s_wv, s_bv).astype(BF16)
    ctx = attention(q16, k16, v16, T, T, trg_keep, pad_keep)
    h1 = bdot(ctx.astype(BF16), s_wo, s_bo) + x                   # dropout==id

    # ---- cross-attention (q from decoder state, k/v from memory) ----------
    h1nn16 = _layer_norm(h1, lnd_g[...], lnd_b[...]).astype(BF16)
    q2 = (bdot(h1nn16, c_wq, c_bq) * scale).astype(BF16)
    k2 = bdot(mem16, c_wk, c_bk).astype(BF16)
    v2 = bdot(mem16, c_wv, c_bv).astype(BF16)
    ctx2 = attention(q2, k2, v2, T, S, src_keep, None)
    ff_in = bdot(ctx2.astype(BF16), c_wo, c_bo) + h1              # dropout==id

    # ---- position-wise feed forward (pre-LN, residual) --------------------
    xn16 = _layer_norm(ff_in, lnf_g[...], lnf_b[...]).astype(BF16)
    hid16 = jnp.maximum(bdot(xn16, ff_w1, ff_b1), 0.0).astype(BF16)
    out = bdot(hid16, ff_w2, ff_b2) + ff_in

    o_ref[...] = out.reshape(Bt, T, D)


# ------------------------------------------------------------------- wrapper
def _choose_block_batch(B, T, m_target=256):
    """Pick Bt | B. Prefer a grid of >= 2 steps (v7x: split the 'parallel'
    axis across both TensorCores); among those, the largest Bt with flattened
    rows Bt*T <= m_target (v6e/v7x MXU ~256; v5e fills at 128 anyway)."""
    divs = [d for d in range(1, B + 1) if B % d == 0]
    cands = [d for d in divs if B // d >= 2] or divs
    fitting = [d for d in cands if d * T <= m_target]
    return max(fitting) if fitting else min(cands)


def _vmem_limit_bytes():
    # ~80% of per-core VMEM: ~51 MiB on v7x (64 MiB/TC), ~102 MiB on v5e/v6e
    # (128 MiB). Leaves headroom for compiler scratch / double-buffered blocks.
    try:
        cap = pltpu.get_tpu_info().vmem_capacity_bytes
        return int(cap * 0.8)
    except Exception:
        return None   # fall back to the compiler's default scoped limit


def transformer_decoder_layer(x, memory, trg_mask, src_mask, padding_mask,
                              params, num_heads, *, block_batch=None):
    B, T, D = x.shape
    S = memory.shape[1]
    assert D % num_heads == 0
    hd = D // num_heads

    Bt = _choose_block_batch(B, T) if block_batch is None else block_batch
    assert B % Bt == 0

    # Weight matrices in bf16 (halves weight DMA + VMEM); biases / LN stay f32.
    kparams = [p.astype(BF16) if (p.ndim == 2 and p.shape[0] > 1) else p
               for p in params]
    # Masks as bf16: halves mask DMA / VMEM; values are exactly 0/1.
    trg16 = trg_mask.astype(BF16)
    src16 = src_mask.astype(BF16)
    pad16 = padding_mask.astype(BF16)

    FF = params[22].shape[1]
    flops = int(2 * B * D * D * (6 * T + 2 * S)      # QKV/out projections
                + 4 * B * T * D * (T + S)            # attn scores + context
                + 4 * B * T * D * FF)                # FFN
    transcendentals = int(B * num_heads * T * (T + S))
    bytes_accessed = int(4 * B * T * D * 2           # x in + out (f32)
                         + 4 * B * S * D             # memory (f32)
                         + 2 * B * (2 * T * T + S)   # masks (bf16)
                         + 2 * (8 * D * D + 2 * D * FF)   # bf16 weights
                         + 4 * (14 * D + FF))             # f32 biases / LN

    in_specs = [
        pl.BlockSpec((Bt, T, D), lambda b: (b, 0, 0)),    # x
        pl.BlockSpec((Bt, S, D), lambda b: (b, 0, 0)),    # memory
        pl.BlockSpec((Bt, T, T), lambda b: (b, 0, 0)),    # trg_mask (bf16)
        pl.BlockSpec((Bt, 1, S), lambda b: (b, 0, 0)),    # src_mask (bf16)
        pl.BlockSpec((Bt, T, T), lambda b: (b, 0, 0)),    # padding_mask (bf16)
    ] + [
        # Whole-weight residency, constant index map, single-buffered:
        # the weights are DMA'd once, so a second pipeline buffer is wasted
        # VMEM (matters at production D/FF, especially on v7x's 64 MiB).
        # TODO(synk): at production D/FF on v7x, K-tile ff_w1/ff_w2 instead of
        #             keeping them fully resident.
        pl.BlockSpec(p.shape, (lambda b, _n=p.ndim: (0,) * _n),
                     pipeline_mode=pl.Buffered(1))
        for p in kparams
    ]

    kernel = functools.partial(_decoder_layer_kernel, num_heads, hd)
    call = pl.pallas_call(
        kernel,
        out_shape=jax.ShapeDtypeStruct((B, T, D), jnp.float32),
        grid_spec=pltpu.PrefetchScalarGridSpec(
            num_scalar_prefetch=0,
            grid=(B // Bt,),
            in_specs=in_specs,
            out_specs=pl.BlockSpec((Bt, T, D), lambda b: (b, 0, 0)),
        ),
        compiler_params=pltpu.CompilerParams(
            dimension_semantics=("parallel",),
            vmem_limit_bytes=_vmem_limit_bytes()),
        cost_estimate=pl.CostEstimate(
            flops=flops, transcendentals=transcendentals,
            bytes_accessed=bytes_accessed),
    )
    return call(x, memory, trg16, src16, pad16, *kparams)


# ---------------------------------------------------------- pure-JAX reference
def _ref_mha(q_in, k_in, v_in, wq, bq, wk, bk, wv, bv, wo, bo,
             mask, pad_mask, H, hd, mdt):
    B = q_in.shape[0]

    def mm(a, w):
        return jnp.einsum('bti,io->bto', a.astype(mdt), w.astype(mdt),
                          preferred_element_type=jnp.float32)

    q = mm(q_in, wq) + bq
    k = mm(k_in, wk) + bk
    v = mm(v_in, wv) + bv
    split = lambda t: t.reshape(B, -1, H, hd).transpose(0, 2, 1, 3)
    q, k, v = split(q), split(k), split(v)
    q = q / math.sqrt(hd)
    scores = jnp.einsum('bhtd,bhsd->bhts', q.astype(mdt), k.astype(mdt),
                        preferred_element_type=jnp.float32)
    scores = jnp.where(mask[:, None] > 0, scores, NEG_INF)
    attn = jax.nn.softmax(scores, axis=-1)
    if pad_mask is not None:
        attn = jnp.where(pad_mask[:, None] > 0, attn, 0.0)
    ctx = jnp.einsum('bhts,bhsd->bhtd', attn.astype(mdt), v.astype(mdt),
                     preferred_element_type=jnp.float32)
    ctx = ctx.transpose(0, 2, 1, 3).reshape(B, -1, H * hd)
    return jnp.einsum('bti,io->bto', ctx.astype(mdt), wo.astype(mdt),
                      preferred_element_type=jnp.float32) + bo


def ref_decoder_layer(x, memory, trg_mask, src_mask, padding_mask, params, H,
                      matmul_dtype=jnp.float32):
    (lnx_g, lnx_b,
     s_wq, s_bq, s_wk, s_bk, s_wv, s_bv, s_wo, s_bo,
     lnd_g, lnd_b,
     c_wq, c_bq, c_wk, c_bk, c_wv, c_bv, c_wo, c_bo,
     lnf_g, lnf_b,
     ff_w1, ff_b1, ff_w2, ff_b2) = params
    D = x.shape[-1]
    hd = D // H
    mdt = matmul_dtype

    h1 = _layer_norm(x, lnx_g, lnx_b)
    h1 = _ref_mha(h1, h1, h1, s_wq, s_bq, s_wk, s_bk, s_wv, s_bv, s_wo, s_bo,
                  trg_mask, padding_mask, H, hd, mdt)
    h1 = h1 + x
    h1n = _layer_norm(h1, lnd_g, lnd_b)
    h2 = _ref_mha(h1n, memory, memory,
                  c_wq, c_bq, c_wk, c_bk, c_wv, c_bv, c_wo, c_bo,
                  src_mask, None, H, hd, mdt)
    ff_in = h2 + h1
    xn = _layer_norm(ff_in, lnf_g, lnf_b)
    hid = jnp.maximum(
        jnp.einsum('bti,io->bto', xn.astype(mdt), ff_w1.astype(mdt),
                   preferred_element_type=jnp.float32) + ff_b1, 0.0)
    ff = jnp.einsum('bti,io->bto', hid.astype(mdt), ff_w2.astype(mdt),
                    preferred_element_type=jnp.float32) + ff_b2
    return ff + ff_in


# ------------------------------------------------------------------ param init
def init_params(key, D, FF):
    keys = iter(jax.random.split(key, 32))

    def lin(din, dout):
        w = jax.random.normal(next(keys), (din, dout), jnp.float32) * 0.02
        b = jax.random.normal(next(keys), (1, dout), jnp.float32) * 0.02
        return w, b

    def ln():
        g = 1.0 + 0.1 * jax.random.normal(next(keys), (1, D), jnp.float32)
        b = 0.1 * jax.random.normal(next(keys), (1, D), jnp.float32)
        return g, b

    lnx_g, lnx_b = ln()
    s_wq, s_bq = lin(D, D); s_wk, s_bk = lin(D, D)
    s_wv, s_bv = lin(D, D); s_wo, s_bo = lin(D, D)
    lnd_g, lnd_b = ln()
    c_wq, c_bq = lin(D, D); c_wk, c_bk = lin(D, D)
    c_wv, c_bv = lin(D, D); c_wo, c_bo = lin(D, D)
    lnf_g, lnf_b = ln()
    ff_w1, ff_b1 = lin(D, FF)
    ff_w2, ff_b2 = lin(FF, D)

    return [lnx_g, lnx_b,
            s_wq, s_bq, s_wk, s_bk, s_wv, s_bv, s_wo, s_bo,
            lnd_g, lnd_b,
            c_wq, c_bq, c_wk, c_bk, c_wv, c_bv, c_wo, c_bo,
            lnf_g, lnf_b,
            ff_w1, ff_b1, ff_w2, ff_b2]


# ---------------------------------------------------------------------- main
if __name__ == "__main__":
    B, T, S, D, H, FF = 2, 8, 8, 128, 4, 256

    key = jax.random.PRNGKey(0)
    kx, km, kp = jax.random.split(key, 3)
    x = jax.random.normal(kx, (B, T, D), jnp.float32)
    memory = jax.random.normal(km, (B, S, D), jnp.float32)
    params = init_params(kp, D, FF)

    # causal target mask; source mask with one padded memory position in
    # batch 1; target padding mask zeroing the last two query rows of batch 1.
    trg_mask = jnp.tile(jnp.tril(jnp.ones((T, T), jnp.float32))[None], (B, 1, 1))
    src_mask = jnp.ones((B, 1, S), jnp.float32).at[1, 0, S - 1].set(0.0)
    padding_mask = jnp.ones((B, T, T), jnp.float32).at[1, T - 2:, :].set(0.0)

    out = transformer_decoder_layer(x, memory, trg_mask, src_mask,
                                    padding_mask, params, H)
    out = jax.block_until_ready(out)

    # Reference 1: mirrors the kernel's bf16-matmul numerics (tight check).
    ref_bf16 = jax.block_until_ready(
        ref_decoder_layer(x, memory, trg_mask, src_mask, padding_mask,
                          params, H, matmul_dtype=jnp.bfloat16))
    # Reference 2: full-f32 module semantics (loose check: bf16 rounding).
    with jax.default_matmul_precision("highest"):
        ref_f32 = jax.block_until_ready(
            ref_decoder_layer(x, memory, trg_mask, src_mask, padding_mask,
                              params, H, matmul_dtype=jnp.float32))

    assert out.shape == (B, T, D)
    assert bool(jnp.all(jnp.isfinite(out)))
    err_bf16 = float(jnp.max(jnp.abs(out - ref_bf16)))
    err_f32 = float(jnp.max(jnp.abs(out - ref_f32)))
    assert jnp.allclose(out, ref_bf16, atol=1e-2, rtol=1e-2), err_bf16
    assert jnp.allclose(out, ref_f32, atol=3e-2, rtol=3e-2), err_f32
    print("KERNEL_OK")
</pallas_src>

<mosaic_0001>
module attributes {stable_mosaic.version = 11 : i64} {
  func.func @_decoder_layer_kernel(%arg0: i32, %arg1: memref<1x8x128xf32, #tpu.memory_space<vmem>>, %arg2: memref<1x8x128xf32, #tpu.memory_space<vmem>>, %arg3: memref<1x8x8xbf16, #tpu.memory_space<vmem>>, %arg4: memref<1x1x8xbf16, #tpu.memory_space<vmem>>, %arg5: memref<1x8x8xbf16, #tpu.memory_space<vmem>>, %arg6: memref<1x128xf32, #tpu.memory_space<vmem>>, %arg7: memref<1x128xf32, #tpu.memory_space<vmem>>, %arg8: memref<128x128xbf16, #tpu.memory_space<vmem>>, %arg9: memref<1x128xf32, #tpu.memory_space<vmem>>, %arg10: memref<128x128xbf16, #tpu.memory_space<vmem>>, %arg11: memref<1x128xf32, #tpu.memory_space<vmem>>, %arg12: memref<128x128xbf16, #tpu.memory_space<vmem>>, %arg13: memref<1x128xf32, #tpu.memory_space<vmem>>, %arg14: memref<128x128xbf16, #tpu.memory_space<vmem>>, %arg15: memref<1x128xf32, #tpu.memory_space<vmem>>, %arg16: memref<1x128xf32, #tpu.memory_space<vmem>>, %arg17: memref<1x128xf32, #tpu.memory_space<vmem>>, %arg18: memref<128x128xbf16, #tpu.memory_space<vmem>>, %arg19: memref<1x128xf32, #tpu.memory_space<vmem>>, %arg20: memref<128x128xbf16, #tpu.memory_space<vmem>>, %arg21: memref<1x128xf32, #tpu.memory_space<vmem>>, %arg22: memref<128x128xbf16, #tpu.memory_space<vmem>>, %arg23: memref<1x128xf32, #tpu.memory_space<vmem>>, %arg24: memref<128x128xbf16, #tpu.memory_space<vmem>>, %arg25: memref<1x128xf32, #tpu.memory_space<vmem>>, %arg26: memref<1x128xf32, #tpu.memory_space<vmem>>, %arg27: memref<1x128xf32, #tpu.memory_space<vmem>>, %arg28: memref<128x256xbf16, #tpu.memory_space<vmem>>, %arg29: memref<1x256xf32, #tpu.memory_space<vmem>>, %arg30: memref<256x128xbf16, #tpu.memory_space<vmem>>, %arg31: memref<1x128xf32, #tpu.memory_space<vmem>>, %arg32: memref<1x8x128xf32, #tpu.memory_space<vmem>>) attributes {dimension_semantics = [#tpu.dimension_semantics<parallel>], iteration_bounds = array<i64: 2>, scalar_prefetch = 0 : i64, scratch_operands = 0 : i64, tpu.core_type = #tpu.core_type<tc>, window_params = [{transform_indices = @transform_0, window_bounds = array<i64: 1, 8, 128>}, {transform_indices = @transform_1, window_bounds = array<i64: 1, 8, 128>}, {transform_indices = @transform_2, window_bounds = array<i64: 1, 8, 8>}, {transform_indices = @transform_3, window_bounds = array<i64: 1, 1, 8>}, {transform_indices = @transform_4, window_bounds = array<i64: 1, 8, 8>}, {pipeline_mode = #tpu.pipeline_mode<synchronous>, transform_indices = @transform_5, window_bounds = array<i64: 1, 128>}, {pipeline_mode = #tpu.pipeline_mode<synchronous>, transform_indices = @transform_6, window_bounds = array<i64: 1, 128>}, {pipeline_mode = #tpu.pipeline_mode<synchronous>, transform_indices = @transform_7, window_bounds = array<i64: 128, 128>}, {pipeline_mode = #tpu.pipeline_mode<synchronous>, transform_indices = @transform_8, window_bounds = array<i64: 1, 128>}, {pipeline_mode = #tpu.pipeline_mode<synchronous>, transform_indices = @transform_9, window_bounds = array<i64: 128, 128>}, {pipeline_mode = #tpu.pipeline_mode<synchronous>, transform_indices = @transform_10, window_bounds = array<i64: 1, 128>}, {pipeline_mode = #tpu.pipeline_mode<synchronous>, transform_indices = @transform_11, window_bounds = array<i64: 128, 128>}, {pipeline_mode = #tpu.pipeline_mode<synchronous>, transform_indices = @transform_12, window_bounds = array<i64: 1, 128>}, {pipeline_mode = #tpu.pipeline_mode<synchronous>, transform_indices = @transform_13, window_bounds = array<i64: 128, 128>}, {pipeline_mode = #tpu.pipeline_mode<synchronous>, transform_indices = @transform_14, window_bounds = array<i64: 1, 128>}, {pipeline_mode = #tpu.pipeline_mode<synchronous>, transform_indices = @transform_15, window_bounds = array<i64: 1, 128>}, {pipeline_mode = #tpu.pipeline_mode<synchronous>, transform_indices = @transform_16, window_bounds = array<i64: 1, 128>}, {pipeline_mode = #tpu.pipeline_mode<synchronous>, transform_indices = @transform_17, window_bounds = array<i64: 128, 128>}, {pipeline_mode = #tpu.pipeline_mode<synchronous>, transform_indices = @transform_18, window_bounds = array<i64: 1, 128>}, {pipeline_mode = #tpu.pipeline_mode<synchronous>, transform_indices = @transform_19, window_bounds = array<i64: 128, 128>}, {pipeline_mode = #tpu.pipeline_mode<synchronous>, transform_indices = @transform_20, window_bounds = array<i64: 1, 128>}, {pipeline_mode = #tpu.pipeline_mode<synchronous>, transform_indices = @transform_21, window_bounds = array<i64: 128, 128>}, {pipeline_mode = #tpu.pipeline_mode<synchronous>, transform_indices = @transform_22, window_bounds = array<i64: 1, 128>}, {pipeline_mode = #tpu.pipeline_mode<synchronous>, transform_indices = @transform_23, window_bounds = array<i64: 128, 128>}, {pipeline_mode = #tpu.pipeline_mode<synchronous>, transform_indices = @transform_24, window_bounds = array<i64: 1, 128>}, {pipeline_mode = #tpu.pipeline_mode<synchronous>, transform_indices = @transform_25, window_bounds = array<i64: 1, 128>}, {pipeline_mode = #tpu.pipeline_mode<synchronous>, transform_indices = @transform_26, window_bounds = array<i64: 1, 128>}, {pipeline_mode = #tpu.pipeline_mode<synchronous>, transform_indices = @transform_27, window_bounds = array<i64: 128, 256>}, {pipeline_mode = #tpu.pipeline_mode<synchronous>, transform_indices = @transform_28, window_bounds = array<i64: 1, 256>}, {pipeline_mode = #tpu.pipeline_mode<synchronous>, transform_indices = @transform_29, window_bounds = array<i64: 256, 128>}, {pipeline_mode = #tpu.pipeline_mode<synchronous>, transform_indices = @transform_30, window_bounds = array<i64: 1, 128>}, {transform_indices = @transform_31, window_bounds = array<i64: 1, 8, 128>}]} {
    %c0 = arith.constant 0 : index
    %c0_0 = arith.constant 0 : index
    %c0_1 = arith.constant 0 : index
    %0 = vector.load %arg1[%c0, %c0_0, %c0_1] : memref<1x8x128xf32, #tpu.memory_space<vmem>>, vector<1x8x128xf32>
    %1 = vector.shape_cast %0 : vector<1x8x128xf32> to vector<8x128xf32>
    %c0_2 = arith.constant 0 : index
    %c0_3 = arith.constant 0 : index
    %c0_4 = arith.constant 0 : index
    %2 = vector.load %arg2[%c0_2, %c0_3, %c0_4] : memref<1x8x128xf32, #tpu.memory_space<vmem>>, vector<1x8x128xf32>
    %3 = vector.shape_cast %2 : vector<1x8x128xf32> to vector<8x128xf32>
    %4 = arith.truncf %3 : vector<8x128xf32> to vector<8x128xbf16>
    %c0_5 = arith.constant 0 : index
    %c0_6 = arith.constant 0 : index
    %c0_7 = arith.constant 0 : index
    %5 = vector.load %arg3[%c0_5, %c0_6, %c0_7] : memref<1x8x8xbf16, #tpu.memory_space<vmem>>, vector<1x8x8xbf16>
    %cst = arith.constant 0.000000e+00 : bf16
    %6 = vector.broadcast %cst : bf16 to vector<1x8x8xbf16>
    %7 = arith.cmpf ogt, %5, %6 : vector<1x8x8xbf16>
    %c0_8 = arith.constant 0 : index
    %c0_9 = arith.constant 0 : index
    %c0_10 = arith.constant 0 : index
    %8 = vector.load %arg4[%c0_8, %c0_9, %c0_10] : memref<1x1x8xbf16, #tpu.memory_space<vmem>>, vector<1x1x8xbf16>
    %cst_11 = arith.constant 0.000000e+00 : bf16
    %9 = vector.broadcast %cst_11 : bf16 to vector<1x1x8xbf16>
    %10 = arith.cmpf ogt, %8, %9 : vector<1x1x8xbf16>
    %c0_12 = arith.constant 0 : index
    %c0_13 = arith.constant 0 : index
    %c0_14 = arith.constant 0 : index
    %11 = vector.load %arg5[%c0_12, %c0_13, %c0_14] : memref<1x8x8xbf16, #tpu.memory_space<vmem>>, vector<1x8x8xbf16>
    %cst_15 = arith.constant 0.000000e+00 : bf16
    %12 = vector.broadcast %cst_15 : bf16 to vector<1x8x8xbf16>
    %13 = arith.cmpf ogt, %11, %12 : vector<1x8x8xbf16>
    %c0_16 = arith.constant 0 : index
    %c0_17 = arith.constant 0 : index
    %14 = vector.load %arg6[%c0_16, %c0_17] : memref<1x128xf32, #tpu.memory_space<vmem>>, vector<1x128xf32>
    %c0_18 = arith.constant 0 : index
    %c0_19 = arith.constant 0 : index
    %15 = vector.load %arg7[%c0_18, %c0_19] : memref<1x128xf32, #tpu.memory_space<vmem>>, vector<1x128xf32>
    %cst_20 = arith.constant dense<0.000000e+00> : vector<8xf32>
    %16 = vector.multi_reduction <add>, %1, %cst_20 [1] : vector<8x128xf32> to vector<8xf32>
    %17 = vector.shape_cast %16 : vector<8xf32> to vector<8x1xf32>
    %cst_21 = arith.constant 1.280000e+02 : f32
    %18 = vector.broadcast %cst_21 : f32 to vector<8x1xf32>
    %19 = arith.divf %17, %18 : vector<8x1xf32>
    %20 = vector.broadcast %19 : vector<8x1xf32> to vector<8x128xf32>
    %21 = arith.subf %1, %20 : vector<8x128xf32>
    %22 = arith.mulf %21, %21 : vector<8x128xf32>
    %cst_22 = arith.constant dense<0.000000e+00> : vector<8xf32>
    %23 = vector.multi_reduction <add>, %22, %cst_22 [1] : vector<8x128xf32> to vector<8xf32>
    %24 = vector.shape_cast %23 : vector<8xf32> to vector<8x1xf32>
    %cst_23 = arith.constant 1.280000e+02 : f32
    %25 = vector.broadcast %cst_23 : f32 to vector<8x1xf32>
    %26 = arith.divf %24, %25 : vector<8x1xf32>
    %cst_24 = arith.constant 9.99999997E-7 : f32
    %27 = vector.broadcast %cst_24 : f32 to vector<8x1xf32>
    %28 = arith.addf %26, %27 : vector<8x1xf32>
    %29 = math.rsqrt %28 : vector<8x1xf32>
    %30 = vector.broadcast %29 : vector<8x1xf32> to vector<8x128xf32>
    %31 = arith.mulf %21, %30 : vector<8x128xf32>
    %32 = vector.broadcast %14 : vector<1x128xf32> to vector<8x128xf32>
    %33 = arith.mulf %31, %32 : vector<8x128xf32>
    %34 = vector.broadcast %15 : vector<1x128xf32> to vector<8x128xf32>
    %35 = arith.addf %33, %34 : vector<8x128xf32>
    %36 = arith.truncf %35 : vector<8x128xf32> to vector<8x128xbf16>
    %c0_25 = arith.constant 0 : index
    %c0_26 = arith.constant 0 : index
    %37 = vector.load %arg8[%c0_25, %c0_26] : memref<128x128xbf16, #tpu.memory_space<vmem>>, vector<128x128xbf16>
    %cst_27 = arith.constant dense<0.000000e+00> : vector<8x128xf32>
    %38 = tpu.matmul %36, %37, %cst_27 {dimension_numbers = #tpu.dot_dimension_numbers<[1], [0], [0], [1], [0, 0, 1, 1], [], []>} : vector<8x128xbf16>, vector<128x128xbf16>, vector<8x128xf32> -> vector<8x128xf32>
    %c0_28 = arith.constant 0 : index
    %c0_29 = arith.constant 0 : index
    %39 = vector.load %arg9[%c0_28, %c0_29] : memref<1x128xf32, #tpu.memory_space<vmem>>, vector<1x128xf32>
    %40 = vector.broadcast %39 : vector<1x128xf32> to vector<8x128xf32>
    %41 = arith.addf %38, %40 : vector<8x128xf32>
    %cst_30 = arith.constant 0.176776692 : f32
    %42 = vector.broadcast %cst_30 : f32 to vector<8x128xf32>
    %43 = arith.mulf %41, %42 : vector<8x128xf32>
    %44 = arith.truncf %43 : vector<8x128xf32> to vector<8x128xbf16>
    %c0_31 = arith.constant 0 : index
    %c0_32 = arith.constant 0 : index
    %45 = vector.load %arg10[%c0_31, %c0_32] : memref<128x128xbf16, #tpu.memory_space<vmem>>, vector<128x128xbf16>
    %cst_33 = arith.constant dense<0.000000e+00> : vector<8x128xf32>
    %46 = tpu.matmul %36, %45, %cst_33 {dimension_numbers = #tpu.dot_dimension_numbers<[1], [0], [0], [1], [0, 0, 1, 1], [], []>} : vector<8x128xbf16>, vector<128x128xbf16>, vector<8x128xf32> -> vector<8x128xf32>
    %c0_34 = arith.constant 0 : index
    %c0_35 = arith.constant 0 : index
    %47 = vector.load %arg11[%c0_34, %c0_35] : memref<1x128xf32, #tpu.memory_space<vmem>>, vector<1x128xf32>
    %48 = vector.broadcast %47 : vector<1x128xf32> to vector<8x128xf32>
    %49 = arith.addf %46, %48 : vector<8x128xf32>
    %50 = arith.truncf %49 : vector<8x128xf32> to vector<8x128xbf16>
    %c0_36 = arith.constant 0 : index
    %c0_37 = arith.constant 0 : index
    %51 = vector.load %arg12[%c0_36, %c0_37] : memref<128x128xbf16, #tpu.memory_space<vmem>>, vector<128x128xbf16>
    %cst_38 = arith.constant dense<0.000000e+00> : vector<8x128xf32>
    %52 = tpu.matmul %36, %51, %cst_38 {dimension_numbers = #tpu.dot_dimension_numbers<[1], [0], [0], [1], [0, 0, 1, 1], [], []>} : vector<8x128xbf16>, vector<128x128xbf16>, vector<8x128xf32> -> vector<8x128xf32>
    %c0_39 = arith.constant 0 : index
    %c0_40 = arith.constant 0 : index
    %53 = vector.load %arg13[%c0_39, %c0_40] : memref<1x128xf32, #tpu.memory_space<vmem>>, vector<1x128xf32>
    %54 = vector.broadcast %53 : vector<1x128xf32> to vector<8x128xf32>
    %55 = arith.addf %52, %54 : vector<8x128xf32>
    %56 = arith.truncf %55 : vector<8x128xf32> to vector<8x128xbf16>
    %57 = vector.shape_cast %44 : vector<8x128xbf16> to vector<8x4x32xbf16>
    %58 = tpu.transpose %57, [1, 0, 2] : vector<8x4x32xbf16> -> vector<4x8x32xbf16>
    %59 = vector.shape_cast %50 : vector<8x128xbf16> to vector<8x4x32xbf16>
    %60 = tpu.transpose %59, [1, 0, 2] : vector<8x4x32xbf16> -> vector<4x8x32xbf16>
    %61 = vector.shape_cast %56 : vector<8x128xbf16> to vector<8x4x32xbf16>
    %62 = tpu.transpose %61, [1, 0, 2] : vector<8x4x32xbf16> -> vector<4x8x32xbf16>
    "tpu.trace_start"() <{level = 10 : i32, message = "bqd,bkd->bqk"}> : () -> ()
    %cst_41 = arith.constant dense<0.000000e+00> : vector<4x8x8xf32>
    %63 = tpu.matmul %58, %60, %cst_41 {dimension_numbers = #tpu.dot_dimension_numbers<[2], [2], [1], [1], [0, 0, 0, 1, 1, 1], [0], [0]>} : vector<4x8x32xbf16>, vector<4x8x32xbf16>, vector<4x8x8xf32> -> vector<4x8x8xf32>
    "tpu.trace_stop"() : () -> ()
    %64 = vector.shape_cast %63 : vector<4x8x8xf32> to vector<4x1x8x8xf32>
    %65 = vector.shape_cast %7 : vector<1x8x8xi1> to vector<1x1x8x8xi1>
    %cst_42 = arith.constant -1.000000e+30 : f32
    %66 = vector.shape_cast %65 : vector<1x1x8x8xi1> to vector<1x1x8x8xi1>
    %67 = vector.broadcast %66 : vector<1x1x8x8xi1> to vector<4x1x8x8xi1>
    %68 = vector.broadcast %cst_42 : f32 to vector<4x1x8x8xf32>
    %69 = arith.select %67, %64, %68 : vector<4x1x8x8xi1>, vector<4x1x8x8xf32>
    %cst_43 = arith.constant dense<0xFF800000> : vector<4x1x8xf32>
    %70 = vector.multi_reduction <maximumf>, %69, %cst_43 [3] : vector<4x1x8x8xf32> to vector<4x1x8xf32>
    %71 = vector.shape_cast %70 : vector<4x1x8xf32> to vector<4x1x8x1xf32>
    %72 = vector.broadcast %71 : vector<4x1x8x1xf32> to vector<4x1x8x8xf32>
    %73 = arith.subf %69, %72 : vector<4x1x8x8xf32>
    %74 = math.exp %73 : vector<4x1x8x8xf32>
    %cst_44 = arith.constant dense<0.000000e+00> : vector<4x1x8xf32>
    %75 = vector.multi_reduction <add>, %74, %cst_44 [3] : vector<4x1x8x8xf32> to vector<4x1x8xf32>
    %76 = vector.shape_cast %75 : vector<4x1x8xf32> to vector<4x1x8x1xf32>
    %77 = tpu.reciprocal %76 {approx = true} : vector<4x1x8x1xf32> -> vector<4x1x8x1xf32>
    %78 = vector.broadcast %77 : vector<4x1x8x1xf32> to vector<4x1x8x8xf32>
    %79 = arith.mulf %74, %78 : vector<4x1x8x8xf32>
    %80 = vector.shape_cast %13 : vector<1x8x8xi1> to vector<1x1x8x8xi1>
    %cst_45 = arith.constant 0.000000e+00 : f32
    %81 = vector.shape_cast %80 : vector<1x1x8x8xi1> to vector<1x1x8x8xi1>
    %82 = vector.broadcast %81 : vector<1x1x8x8xi1> to vector<4x1x8x8xi1>
    %83 = vector.broadcast %cst_45 : f32 to vector<4x1x8x8xf32>
    %84 = arith.select %82, %79, %83 : vector<4x1x8x8xi1>, vector<4x1x8x8xf32>
    %85 = vector.shape_cast %84 : vector<4x1x8x8xf32> to vector<4x8x8xf32>
    %86 = arith.truncf %85 : vector<4x8x8xf32> to vector<4x8x8xbf16>
    "tpu.trace_start"() <{level = 10 : i32, message = "bqk,bkd->bqd"}> : () -> ()
    %cst_46 = arith.constant dense<0.000000e+00> : vector<4x8x32xf32>
    %87 = tpu.matmul %86, %62, %cst_46 {dimension_numbers = #tpu.dot_dimension_numbers<[2], [1], [1], [2], [0, 0, 0, 1, 1, 2], [0], [0]>} : vector<4x8x8xbf16>, vector<4x8x32xbf16>, vector<4x8x32xf32> -> vector<4x8x32xf32>
    "tpu.trace_stop"() : () -> ()
    %88 = tpu.transpose %87, [1, 0, 2] : vector<4x8x32xf32> -> vector<8x4x32xf32>
    %89 = vector.shape_cast %88 : vector<8x4x32xf32> to vector<8x128xf32>
    %90 = arith.truncf %89 : vector<8x128xf32> to vector<8x128xbf16>
    %c0_47 = arith.constant 0 : index
    %c0_48 = arith.constant 0 : index
    %91 = vector.load %arg14[%c0_47, %c0_48] : memref<128x128xbf16, #tpu.memory_space<vmem>>, vector<128x128xbf16>
    %cst_49 = arith.constant dense<0.000000e+00> : vector<8x128xf32>
    %92 = tpu.matmul %90, %91, %cst_49 {dimension_numbers = #tpu.dot_dimension_numbers<[1], [0], [0], [1], [0, 0, 1, 1], [], []>} : vector<8x128xbf16>, vector<128x128xbf16>, vector<8x128xf32> -> vector<8x128xf32>
    %c0_50 = arith.constant 0 : index
    %c0_51 = arith.constant 0 : index
    %93 = vector.load %arg15[%c0_50, %c0_51] : memref<1x128xf32, #tpu.memory_space<vmem>>, vector<1x128xf32>
    %94 = vector.broadcast %93 : vector<1x128xf32> to vector<8x128xf32>
    %95 = arith.addf %92, %94 : vector<8x128xf32>
    %96 = arith.addf %95, %1 : vector<8x128xf32>
    %c0_52 = arith.constant 0 : index
    %c0_53 = arith.constant 0 : index
    %97 = vector.load %arg16[%c0_52, %c0_53] : memref<1x128xf32, #tpu.memory_space<vmem>>, vector<1x128xf32>
    %c0_54 = arith.constant 0 : index
    %c0_55 = arith.constant 0 : index
    %98 = vector.load %arg17[%c0_54, %c0_55] : memref<1x128xf32, #tpu.memory_space<vmem>>, vector<1x128xf32>
    %cst_56 = arith.constant dense<0.000000e+00> : vector<8xf32>
    %99 = vector.multi_reduction <add>, %96, %cst_56 [1] : vector<8x128xf32> to vector<8xf32>
    %100 = vector.shape_cast %99 : vector<8xf32> to vector<8x1xf32>
    %cst_57 = arith.constant 1.280000e+02 : f32
    %101 = vector.broadcast %cst_57 : f32 to vector<8x1xf32>
    %102 = arith.divf %100, %101 : vector<8x1xf32>
    %103 = vector.broadcast %102 : vector<8x1xf32> to vector<8x128xf32>
    %104 = arith.subf %96, %103 : vector<8x128xf32>
    %105 = arith.mulf %104, %104 : vector<8x128xf32>
    %cst_58 = arith.constant dense<0.000000e+00> : vector<8xf32>
    %106 = vector.multi_reduction <add>, %105, %cst_58 [1] : vector<8x128xf32> to vector<8xf32>
    %107 = vector.shape_cast %106 : vector<8xf32> to vector<8x1xf32>
    %cst_59 = arith.constant 1.280000e+02 : f32
    %108 = vector.broadcast %cst_59 : f32 to vector<8x1xf32>
    %109 = arith.divf %107, %108 : vector<8x1xf32>
    %cst_60 = arith.constant 9.99999997E-7 : f32
    %110 = vector.broadcast %cst_60 : f32 to vector<8x1xf32>
    %111 = arith.addf %109, %110 : vector<8x1xf32>
    %112 = math.rsqrt %111 : vector<8x1xf32>
    %113 = vector.broadcast %112 : vector<8x1xf32> to vector<8x128xf32>
    %114 = arith.mulf %104, %113 : vector<8x128xf32>
    %115 = vector.broadcast %97 : vector<1x128xf32> to vector<8x128xf32>
    %116 = arith.mulf %114, %115 : vector<8x128xf32>
    %117 = vector.broadcast %98 : vector<1x128xf32> to vector<8x128xf32>
    %118 = arith.addf %116, %117 : vector<8x128xf32>
    %119 = arith.truncf %118 : vector<8x128xf32> to vector<8x128xbf16>
    %c0_61 = arith.constant 0 : index
    %c0_62 = arith.constant 0 : index
    %120 = vector.load %arg18[%c0_61, %c0_62] : memref<128x128xbf16, #tpu.memory_space<vmem>>, vector<128x128xbf16>
    %cst_63 = arith.constant dense<0.000000e+00> : vector<8x128xf32>
    %121 = tpu.matmul %119, %120, %cst_63 {dimension_numbers = #tpu.dot_dimension_numbers<[1], [0], [0], [1], [0, 0, 1, 1], [], []>} : vector<8x128xbf16>, vector<128x128xbf16>, vector<8x128xf32> -> vector<8x128xf32>
    %c0_64 = arith.constant 0 : index
    %c0_65 = arith.constant 0 : index
    %122 = vector.load %arg19[%c0_64, %c0_65] : memref<1x128xf32, #tpu.memory_space<vmem>>, vector<1x128xf32>
    %123 = vector.broadcast %122 : vector<1x128xf32> to vector<8x128xf32>
    %124 = arith.addf %121, %123 : vector<8x128xf32>
    %cst_66 = arith.constant 0.176776692 : f32
    %125 = vector.broadcast %cst_66 : f32 to vector<8x128xf32>
    %126 = arith.mulf %124, %125 : vector<8x128xf32>
    %127 = arith.truncf %126 : vector<8x128xf32> to vector<8x128xbf16>
    %c0_67 = arith.constant 0 : index
    %c0_68 = arith.constant 0 : index
    %128 = vector.load %arg20[%c0_67, %c0_68] : memref<128x128xbf16, #tpu.memory_space<vmem>>, vector<128x128xbf16>
    %cst_69 = arith.constant dense<0.000000e+00> : vector<8x128xf32>
    %129 = tpu.matmul %4, %128, %cst_69 {dimension_numbers = #tpu.dot_dimension_numbers<[1], [0], [0], [1], [0, 0, 1, 1], [], []>} : vector<8x128xbf16>, vector<128x128xbf16>, vector<8x128xf32> -> vector<8x128xf32>
    %c0_70 = arith.constant 0 : index
    %c0_71 = arith.constant 0 : index
    %130 = vector.load %arg21[%c0_70, %c0_71] : memref<1x128xf32, #tpu.memory_space<vmem>>, vector<1x128xf32>
    %131 = vector.broadcast %130 : vector<1x128xf32> to vector<8x128xf32>
    %132 = arith.addf %129, %131 : vector<8x128xf32>
    %133 = arith.truncf %132 : vector<8x128xf32> to vector<8x128xbf16>
    %c0_72 = arith.constant 0 : index
    %c0_73 = arith.constant 0 : index
    %134 = vector.load %arg22[%c0_72, %c0_73] : memref<128x128xbf16, #tpu.memory_space<vmem>>, vector<128x128xbf16>
    %cst_74 = arith.constant dense<0.000000e+00> : vector<8x128xf32>
    %135 = tpu.matmul %4, %134, %cst_74 {dimension_numbers = #tpu.dot_dimension_numbers<[1], [0], [0], [1], [0, 0, 1, 1], [], []>} : vector<8x128xbf16>, vector<128x128xbf16>, vector<8x128xf32> -> vector<8x128xf32>
    %c0_75 = arith.constant 0 : index
    %c0_76 = arith.constant 0 : index
    %136 = vector.load %arg23[%c0_75, %c0_76] : memref<1x128xf32, #tpu.memory_space<vmem>>, vector<1x128xf32>
    %137 = vector.broadcast %136 : vector<1x128xf32> to vector<8x128xf32>
    %138 = arith.addf %135, %137 : vector<8x128xf32>
    %139 = arith.truncf %138 : vector<8x128xf32> to vector<8x128xbf16>
    %140 = vector.shape_cast %127 : vector<8x128xbf16> to vector<8x4x32xbf16>
    %141 = tpu.transpose %140, [1, 0, 2] : vector<8x4x32xbf16> -> vector<4x8x32xbf16>
    %142 = vector.shape_cast %133 : vector<8x128xbf16> to vector<8x4x32xbf16>
    %143 = tpu.transpose %142, [1, 0, 2] : vector<8x4x32xbf16> -> vector<4x8x32xbf16>
    %144 = vector.shape_cast %139 : vector<8x128xbf16> to vector<8x4x32xbf16>
    %145 = tpu.transpose %144, [1, 0, 2] : vector<8x4x32xbf16> -> vector<4x8x32xbf16>
    "tpu.trace_start"() <{level = 10 : i32, message = "bqd,bkd->bqk"}> : () -> ()
    %cst_77 = arith.constant dense<0.000000e+00> : vector<4x8x8xf32>
    %146 = tpu.matmul %141, %143, %cst_77 {dimension_numbers = #tpu.dot_dimension_numbers<[2], [2], [1], [1], [0, 0, 0, 1, 1, 1], [0], [0]>} : vector<4x8x32xbf16>, vector<4x8x32xbf16>, vector<4x8x8xf32> -> vector<4x8x8xf32>
    "tpu.trace_stop"() : () -> ()
    %147 = vector.shape_cast %146 : vector<4x8x8xf32> to vector<4x1x8x8xf32>
    %148 = vector.shape_cast %10 : vector<1x1x8xi1> to vector<1x1x1x8xi1>
    %cst_78 = arith.constant -1.000000e+30 : f32
    %149 = vector.shape_cast %148 : vector<1x1x1x8xi1> to vector<1x1x1x8xi1>
    %150 = vector.broadcast %149 : vector<1x1x1x8xi1> to vector<4x1x8x8xi1>
    %151 = vector.broadcast %cst_78 : f32 to vector<4x1x8x8xf32>
    %152 = arith.select %150, %147, %151 : vector<4x1x8x8xi1>, vector<4x1x8x8xf32>
    %cst_79 = arith.constant dense<0xFF800000> : vector<4x1x8xf32>
    %153 = vector.multi_reduction <maximumf>, %152, %cst_79 [3] : vector<4x1x8x8xf32> to vector<4x1x8xf32>
    %154 = vector.shape_cast %153 : vector<4x1x8xf32> to vector<4x1x8x1xf32>
    %155 = vector.broadcast %154 : vector<4x1x8x1xf32> to vector<4x1x8x8xf32>
    %156 = arith.subf %152, %155 : vector<4x1x8x8xf32>
    %157 = math.exp %156 : vector<4x1x8x8xf32>
    %cst_80 = arith.constant dense<0.000000e+00> : vector<4x1x8xf32>
    %158 = vector.multi_reduction <add>, %157, %cst_80 [3] : vector<4x1x8x8xf32> to vector<4x1x8xf32>
    %159 = vector.shape_cast %158 : vector<4x1x8xf32> to vector<4x1x8x1xf32>
    %160 = tpu.reciprocal %159 {approx = true} : vector<4x1x8x1xf32> -> vector<4x1x8x1xf32>
    %161 = vector.broadcast %160 : vector<4x1x8x1xf32> to vector<4x1x8x8xf32>
    %162 = arith.mulf %157, %161 : vector<4x1x8x8xf32>
    %163 = vector.shape_cast %162 : vector<4x1x8x8xf32> to vector<4x8x8xf32>
    %164 = arith.truncf %163 : vector<4x8x8xf32> to vector<4x8x8xbf16>
    "tpu.trace_start"() <{level = 10 : i32, message = "bqk,bkd->bqd"}> : () -> ()
    %cst_81 = arith.constant dense<0.000000e+00> : vector<4x8x32xf32>
    %165 = tpu.matmul %164, %145, %cst_81 {dimension_numbers = #tpu.dot_dimension_numbers<[2], [1], [1], [2], [0, 0, 0, 1, 1, 2], [0], [0]>} : vector<4x8x8xbf16>, vector<4x8x32xbf16>, vector<4x8x32xf32> -> vector<4x8x32xf32>
    "tpu.trace_stop"() : () -> ()
    %166 = tpu.transpose %165, [1, 0, 2] : vector<4x8x32xf32> -> vector<8x4x32xf32>
    %167 = vector.shape_cast %166 : vector<8x4x32xf32> to vector<8x128xf32>
    %168 = arith.truncf %167 : vector<8x128xf32> to vector<8x128xbf16>
    %c0_82 = arith.constant 0 : index
    %c0_83 = arith.constant 0 : index
    %169 = vector.load %arg24[%c0_82, %c0_83] : memref<128x128xbf16, #tpu.memory_space<vmem>>, vector<128x128xbf16>
    %cst_84 = arith.constant dense<0.000000e+00> : vector<8x128xf32>
    %170 = tpu.matmul %168, %169, %cst_84 {dimension_numbers = #tpu.dot_dimension_numbers<[1], [0], [0], [1], [0, 0, 1, 1], [], []>} : vector<8x128xbf16>, vector<128x128xbf16>, vector<8x128xf32> -> vector<8x128xf32>
    %c0_85 = arith.constant 0 : index
    %c0_86 = arith.constant 0 : index
    %171 = vector.load %arg25[%c0_85, %c0_86] : memref<1x128xf32, #tpu.memory_space<vmem>>, vector<1x128xf32>
    %172 = vector.broadcast %171 : vector<1x128xf32> to vector<8x128xf32>
    %173 = arith.addf %170, %172 : vector<8x128xf32>
    %174 = arith.addf %173, %96 : vector<8x128xf32>
    %c0_87 = arith.constant 0 : index
    %c0_88 = arith.constant 0 : index
    %175 = vector.load %arg26[%c0_87, %c0_88] : memref<1x128xf32, #tpu.memory_space<vmem>>, vector<1x128xf32>
    %c0_89 = arith.constant 0 : index
    %c0_90 = arith.constant 0 : index
    %176 = vector.load %arg27[%c0_89, %c0_90] : memref<1x128xf32, #tpu.memory_space<vmem>>, vector<1x128xf32>
    %cst_91 = arith.constant dense<0.000000e+00> : vector<8xf32>
    %177 = vector.multi_reduction <add>, %174, %cst_91 [1] : vector<8x128xf32> to vector<8xf32>
    %178 = vector.shape_cast %177 : vector<8xf32> to vector<8x1xf32>
    %cst_92 = arith.constant 1.280000e+02 : f32
    %179 = vector.broadcast %cst_92 : f32 to vector<8x1xf32>
    %180 = arith.divf %178, %179 : vector<8x1xf32>
    %181 = vector.broadcast %180 : vector<8x1xf32> to vector<8x128xf32>
    %182 = arith.subf %174, %181 : vector<8x128xf32>
    %183 = arith.mulf %182, %182 : vector<8x128xf32>
    %cst_93 = arith.constant dense<0.000000e+00> : vector<8xf32>
    %184 = vector.multi_reduction <add>, %183, %cst_93 [1] : vector<8x128xf32> to vector<8xf32>
    %185 = vector.shape_cast %184 : vector<8xf32> to vector<8x1xf32>
    %cst_94 = arith.constant 1.280000e+02 : f32
    %186 = vector.broadcast %cst_94 : f32 to vector<8x1xf32>
    %187 = arith.divf %185, %186 : vector<8x1xf32>
    %cst_95 = arith.constant 9.99999997E-7 : f32
    %188 = vector.broadcast %cst_95 : f32 to vector<8x1xf32>
    %189 = arith.addf %187, %188 : vector<8x1xf32>
    %190 = math.rsqrt %189 : vector<8x1xf32>
    %191 = vector.broadcast %190 : vector<8x1xf32> to vector<8x128xf32>
    %192 = arith.mulf %182, %191 : vector<8x128xf32>
    %193 = vector.broadcast %175 : vector<1x128xf32> to vector<8x128xf32>
    %194 = arith.mulf %192, %193 : vector<8x128xf32>
    %195 = vector.broadcast %176 : vector<1x128xf32> to vector<8x128xf32>
    %196 = arith.addf %194, %195 : vector<8x128xf32>
    %197 = arith.truncf %196 : vector<8x128xf32> to vector<8x128xbf16>
    %c0_96 = arith.constant 0 : index
    %c0_97 = arith.constant 0 : index
    %198 = vector.load %arg28[%c0_96, %c0_97] : memref<128x256xbf16, #tpu.memory_space<vmem>>, vector<128x256xbf16>
    %cst_98 = arith.constant dense<0.000000e+00> : vector<8x256xf32>
    %199 = tpu.matmul %197, %198, %cst_98 {dimension_numbers = #tpu.dot_dimension_numbers<[1], [0], [0], [1], [0, 0, 1, 1], [], []>} : vector<8x128xbf16>, vector<128x256xbf16>, vector<8x256xf32> -> vector<8x256xf32>
    %c0_99 = arith.constant 0 : index
    %c0_100 = arith.constant 0 : index
    %200 = vector.load %arg29[%c0_99, %c0_100] : memref<1x256xf32, #tpu.memory_space<vmem>>, vector<1x256xf32>
    %201 = vector.broadcast %200 : vector<1x256xf32> to vector<8x256xf32>
    %202 = arith.addf %199, %201 : vector<8x256xf32>
    %cst_101 = arith.constant 0.000000e+00 : f32
    %203 = vector.broadcast %cst_101 : f32 to vector<8x256xf32>
    %204 = arith.maximumf %202, %203 : vector<8x256xf32>
    %205 = arith.truncf %204 : vector<8x256xf32> to vector<8x256xbf16>
    %c0_102 = arith.constant 0 : index
    %c0_103 = arith.constant 0 : index
    %206 = vector.load %arg30[%c0_102, %c0_103] : memref<256x128xbf16, #tpu.memory_space<vmem>>, vector<256x128xbf16>
    %cst_104 = arith.constant dense<0.000000e+00> : vector<8x128xf32>
    %207 = tpu.matmul %205, %206, %cst_104 {dimension_numbers = #tpu.dot_dimension_numbers<[1], [0], [0], [1], [0, 0, 1, 1], [], []>} : vector<8x256xbf16>, vector<256x128xbf16>, vector<8x128xf32> -> vector<8x128xf32>
    %c0_105 = arith.constant 0 : index
    %c0_106 = arith.constant 0 : index
    %208 = vector.load %arg31[%c0_105, %c0_106] : memref<1x128xf32, #tpu.memory_space<vmem>>, vector<1x128xf32>
    %209 = vector.broadcast %208 : vector<1x128xf32> to vector<8x128xf32>
    %210 = arith.addf %207, %209 : vector<8x128xf32>
    %211 = arith.addf %210, %174 : vector<8x128xf32>
    %212 = vector.shape_cast %211 : vector<8x128xf32> to vector<1x8x128xf32>
    %c0_107 = arith.constant 0 : index
    %c0_108 = arith.constant 0 : index
    %c0_109 = arith.constant 0 : index
    %213 = vector.load %arg32[%c0_107, %c0_108, %c0_109] : memref<1x8x128xf32, #tpu.memory_space<vmem>>, vector<1x8x128xf32>
    tpu.vector_store %arg32[%c0_107, %c0_108, %c0_109], %212 {strides = array<i32>} : memref<1x8x128xf32, #tpu.memory_space<vmem>>, vector<1x8x128xf32>,
    return
  }
  func.func @transform_0(%arg0: i32) -> (i32, i32, i32) {
    %c0_i32 = arith.constant 0 : i32
    %c0_i32_0 = arith.constant 0 : i32
    %c0_i32_1 = arith.constant 0 : i32
    return %arg0, %c0_i32, %c0_i32_0 : i32, i32, i32
  }
  func.func @transform_1(%arg0: i32) -> (i32, i32, i32) {
    %c0_i32 = arith.constant 0 : i32
    %c0_i32_0 = arith.constant 0 : i32
    %c0_i32_1 = arith.constant 0 : i32
    return %arg0, %c0_i32, %c0_i32_0 : i32, i32, i32
  }
  func.func @transform_2(%arg0: i32) -> (i32, i32, i32) {
    %c0_i32 = arith.constant 0 : i32
    %c0_i32_0 = arith.constant 0 : i32
    %c0_i32_1 = arith.constant 0 : i32
    return %arg0, %c0_i32, %c0_i32_0 : i32, i32, i32
  }
  func.func @transform_3(%arg0: i32) -> (i32, i32, i32) {
    %c0_i32 = arith.constant 0 : i32
    %c0_i32_0 = arith.constant 0 : i32
    %c0_i32_1 = arith.constant 0 : i32
    return %arg0, %c0_i32, %c0_i32_0 : i32, i32, i32
  }
  func.func @transform_4(%arg0: i32) -> (i32, i32, i32) {
    %c0_i32 = arith.constant 0 : i32
    %c0_i32_0 = arith.constant 0 : i32
    %c0_i32_1 = arith.constant 0 : i32
    return %arg0, %c0_i32, %c0_i32_0 : i32, i32, i32
  }
  func.func @transform_5(%arg0: i32) -> (i32, i32) {
    %c0_i32 = arith.constant 0 : i32
    %c0_i32_0 = arith.constant 0 : i32
    %c0_i32_1 = arith.constant 0 : i32
    return %c0_i32, %c0_i32_0 : i32, i32
  }
  func.func @transform_6(%arg0: i32) -> (i32, i32) {
    %c0_i32 = arith.constant 0 : i32
    %c0_i32_0 = arith.constant 0 : i32
    %c0_i32_1 = arith.constant 0 : i32
    return %c0_i32, %c0_i32_0 : i32, i32
  }
  func.func @transform_7(%arg0: i32) -> (i32, i32) {
    %c0_i32 = arith.constant 0 : i32
    %c0_i32_0 = arith.constant 0 : i32
    %c0_i32_1 = arith.constant 0 : i32
    return %c0_i32, %c0_i32_0 : i32, i32
  }
  func.func @transform_8(%arg0: i32) -> (i32, i32) {
    %c0_i32 = arith.constant 0 : i32
    %c0_i32_0 = arith.constant 0 : i32
    %c0_i32_1 = arith.constant 0 : i32
    return %c0_i32, %c0_i32_0 : i32, i32
  }
  func.func @transform_9(%arg0: i32) -> (i32, i32) {
    %c0_i32 = arith.constant 0 : i32
    %c0_i32_0 = arith.constant 0 : i32
    %c0_i32_1 = arith.constant 0 : i32
    return %c0_i32, %c0_i32_0 : i32, i32
  }
  func.func @transform_10(%arg0: i32) -> (i32, i32) {
    %c0_i32 = arith.constant 0 : i32
    %c0_i32_0 = arith.constant 0 : i32
    %c0_i32_1 = arith.constant 0 : i32
    return %c0_i32, %c0_i32_0 : i32, i32
  }
  func.func @transform_11(%arg0: i32) -> (i32, i32) {
    %c0_i32 = arith.constant 0 : i32
    %c0_i32_0 = arith.constant 0 : i32
    %c0_i32_1 = arith.constant 0 : i32
    return %c0_i32, %c0_i32_0 : i32, i32
  }
  func.func @transform_12(%arg0: i32) -> (i32, i32) {
    %c0_i32 = arith.constant 0 : i32
    %c0_i32_0 = arith.constant 0 : i32
    %c0_i32_1 = arith.constant 0 : i32
    return %c0_i32, %c0_i32_0 : i32, i32
  }
  func.func @transform_13(%arg0: i32) -> (i32, i32) {
    %c0_i32 = arith.constant 0 : i32
    %c0_i32_0 = arith.constant 0 : i32
    %c0_i32_1 = arith.constant 0 : i32
    return %c0_i32, %c0_i32_0 : i32, i32
  }
  func.func @transform_14(%arg0: i32) -> (i32, i32) {
    %c0_i32 = arith.constant 0 : i32
    %c0_i32_0 = arith.constant 0 : i32
    %c0_i32_1 = arith.constant 0 : i32
    return %c0_i32, %c0_i32_0 : i32, i32
  }
  func.func @transform_15(%arg0: i32) -> (i32, i32) {
    %c0_i32 = arith.constant 0 : i32
    %c0_i32_0 = arith.constant 0 : i32
    %c0_i32_1 = arith.constant 0 : i32
    return %c0_i32, %c0_i32_0 : i32, i32
  }
  func.func @transform_16(%arg0: i32) -> (i32, i32) {
    %c0_i32 = arith.constant 0 : i32
    %c0_i32_0 = arith.constant 0 : i32
    %c0_i32_1 = arith.constant 0 : i32
    return %c0_i32, %c0_i32_0 : i32, i32
  }
  func.func @transform_17(%arg0: i32) -> (i32, i32) {
    %c0_i32 = arith.constant 0 : i32
    %c0_i32_0 = arith.constant 0 : i32
    %c0_i32_1 = arith.constant 0 : i32
    return %c0_i32, %c0_i32_0 : i32, i32
  }
  func.func @transform_18(%arg0: i32) -> (i32, i32) {
    %c0_i32 = arith.constant 0 : i32
    %c0_i32_0 = arith.constant 0 : i32
    %c0_i32_1 = arith.constant 0 : i32
    return %c0_i32, %c0_i32_0 : i32, i32
  }
  func.func @transform_19(%arg0: i32) -> (i32, i32) {
    %c0_i32 = arith.constant 0 : i32
    %c0_i32_0 = arith.constant 0 : i32
    %c0_i32_1 = arith.constant 0 : i32
    return %c0_i32, %c0_i32_0 : i32, i32
  }
  func.func @transform_20(%arg0: i32) -> (i32, i32) {
    %c0_i32 = arith.constant 0 : i32
    %c0_i32_0 = arith.constant 0 : i32
    %c0_i32_1 = arith.constant 0 : i32
    return %c0_i32, %c0_i32_0 : i32, i32
  }
  func.func @transform_21(%arg0: i32) -> (i32, i32) {
    %c0_i32 = arith.constant 0 : i32
    %c0_i32_0 = arith.constant 0 : i32
    %c0_i32_1 = arith.constant 0 : i32
    return %c0_i32, %c0_i32_0 : i32, i32
  }
  func.func @transform_22(%arg0: i32) -> (i32, i32) {
    %c0_i32 = arith.constant 0 : i32
    %c0_i32_0 = arith.constant 0 : i32
    %c0_i32_1 = arith.constant 0 : i32
    return %c0_i32, %c0_i32_0 : i32, i32
  }
  func.func @transform_23(%arg0: i32) -> (i32, i32) {
    %c0_i32 = arith.constant 0 : i32
    %c0_i32_0 = arith.constant 0 : i32
    %c0_i32_1 = arith.constant 0 : i32
    return %c0_i32, %c0_i32_0 : i32, i32
  }
  func.func @transform_24(%arg0: i32) -> (i32, i32) {
    %c0_i32 = arith.constant 0 : i32
    %c0_i32_0 = arith.constant 0 : i32
    %c0_i32_1 = arith.constant 0 : i32
    return %c0_i32, %c0_i32_0 : i32, i32
  }
  func.func @transform_25(%arg0: i32) -> (i32, i32) {
    %c0_i32 = arith.constant 0 : i32
    %c0_i32_0 = arith.constant 0 : i32
    %c0_i32_1 = arith.constant 0 : i32
    return %c0_i32, %c0_i32_0 : i32, i32
  }
  func.func @transform_26(%arg0: i32) -> (i32, i32) {
    %c0_i32 = arith.constant 0 : i32
    %c0_i32_0 = arith.constant 0 : i32
    %c0_i32_1 = arith.constant 0 : i32
    return %c0_i32, %c0_i32_0 : i32, i32
  }
  func.func @transform_27(%arg0: i32) -> (i32, i32) {
    %c0_i32 = arith.constant 0 : i32
    %c0_i32_0 = arith.constant 0 : i32
    %c0_i32_1 = arith.constant 0 : i32
    return %c0_i32, %c0_i32_0 : i32, i32
  }
  func.func @transform_28(%arg0: i32) -> (i32, i32) {
    %c0_i32 = arith.constant 0 : i32
    %c0_i32_0 = arith.constant 0 : i32
    %c0_i32_1 = arith.constant 0 : i32
    return %c0_i32, %c0_i32_0 : i32, i32
  }
  func.func @transform_29(%arg0: i32) -> (i32, i32) {
    %c0_i32 = arith.constant 0 : i32
    %c0_i32_0 = arith.constant 0 : i32
    %c0_i32_1 = arith.constant 0 : i32
    return %c0_i32, %c0_i32_0 : i32, i32
  }
  func.func @transform_30(%arg0: i32) -> (i32, i32) {
    %c0_i32 = arith.constant 0 : i32
    %c0_i32_0 = arith.constant 0 : i32
    %c0_i32_1 = arith.constant 0 : i32
    return %c0_i32, %c0_i32_0 : i32, i32
  }
  func.func @transform_31(%arg0: i32) -> (i32, i32, i32) {
    %c0_i32 = arith.constant 0 : i32
    %c0_i32_0 = arith.constant 0 : i32
    %c0_i32_1 = arith.constant 0 : i32
    return %arg0, %c0_i32, %c0_i32_0 : i32, i32, i32
  }
}

</mosaic_0001>

<bundles_post_ra>
// kernel: tpu_custom_call.1
= control target key start
LH: loop header
LB: loop body
LE: loop exit
PB: predicated region body
PF: predicated region fallthrough
CT: control target
= control target key end

     0   :  { %s6329_s6 = smov 1   ;;  %s6330_s10 = smov 2   ;;  %s7363_s0 = inlined_call_operand.smem [shape: u32[32], index: -1, kind: input, shape index: {}] }
   0x1   :  { %s6394_s5 = sld [smem:[%s7363_s0]]   ;;  %s6331_s14 = smov 3  }
   0x2   :  { %s6399_s9 = sld [smem:[%s7363_s0 + %s6329_s6]]   ;;  %s6332_s18 = smov 4  }
   0x3   :  { %s6404_s13 = sld [smem:[%s7363_s0 + %s6330_s10]]   ;;  %s6333_s22 = smov 5  }
   0x4   :  { %s6409_s17 = sld [smem:[%s7363_s0 + %s6331_s14]]   ;;  %s6334_s26 = smov 6  }
   0x5   :  { %s6414_s21 = sld [smem:[%s7363_s0 + %s6332_s18]]   ;;  %s6335_s30 = smov 7  }
   0x6   :  { %s6419_s25 = sld [smem:[%s7363_s0 + %s6333_s22]]   ;;  %s6336_s4 = smov 8  }
   0x7   :  { %s6424_s29 = sld [smem:[%s7363_s0 + %s6334_s26]]   ;;  %s6337_s10 = smov 9  }
   0x8   :  { %7389 = sst [smem:[#allocation32_spill]] %s6399_s9  ;;  %s6338_s15 = smov 10  }
   0x9   :  { %s6429_s3 = sld [smem:[%s7363_s0 + %s6335_s30]]   ;;  %s6339_s20 = smov 11  }
   0xa   :  { %7390 = sst [smem:[#allocation33_spill]] %s6409_s17  ;;  %s6340_s26 = smov 12  }
   0xb   :  { %7391 = sst [smem:[#allocation34_spill]] %s6414_s21  ;;  %s6341_s1 = smov 13  }
   0xc   :  { %s6434_s8 = sld [smem:[%s7363_s0 + %s6336_s4]]   ;;  %s6342_s7 = smov 14  }
   0xd   :  { %s6439_s14 = sld [smem:[%s7363_s0 + %s6337_s10]]   ;;  %s6344_s22 = smov 16  }
   0xe   :  { %s6444_s19 = sld [smem:[%s7363_s0 + %s6338_s15]]   ;;  %s6343_s15 = smov 15  }
   0xf   :  { %7392 = sst [smem:[#allocation35_spill]] %s6429_s3  ;;  %s6345_s28 = smov 17  }
  0x10   :  { %s6449_s24 = sld [smem:[%s7363_s0 + %s6339_s20]]  }
  0x11   :  { %s6454_s30 = sld [smem:[%s7363_s0 + %s6340_s26]]  }
  0x12   :  { %7393 = sst [smem:[#allocation36_spill]] %s6434_s8 }
  0x13   :  { %s6459_s6 = sld [smem:[%s7363_s0 + %s6341_s1]]  }
  0x14   :  { %7394 = sst [smem:[#allocation37_spill]] %s6444_s19 }
  0x15   :  { %s6464_s12 = sld [smem:[%s7363_s0 + %s6342_s7]]   ;;  %s6346_s7 = smov 18  }
  0x16   :  { %7395 = sst [smem:[#allocation38_spill]] %s6449_s24 }
  0x17   :  { %7396 = sst [smem:[#allocation39_spill]] %s6454_s30 }
  0x18   :  { %s6469_s20 = sld [smem:[%s7363_s0 + %s6343_s15]]   ;;  %s6347_s15 = smov 19  }
  0x19   :  { %s6474_s27 = sld [smem:[%s7363_s0 + %s6344_s22]]   ;;  %s6348_s22 = smov 20  }
  0x1a   :  { %s6479_s4 = sld [smem:[%s7363_s0 + %s6345_s28]]   ;;  %s6349_s28 = smov 21  }
  0x1b   :  { %7397 = sst [smem:[#allocation40_spill]] %s6464_s12 }
  0x1c   :  { %s6484_s17 = sld [smem:[%s7363_s0 + %s6346_s7]]   ;;  %s6350_s7 = smov 22  }
  0x1d   :  { %s6499_s12 = sld [smem:[%s7363_s0 + %s6349_s28]]   ;;  %s6353_s28 = smov 25  }
  0x1e   :  { %7398 = sst [smem:[#allocation41_spill]] %s6469_s20 }
  0x1f   :  { %7399 = sst [smem:[#allocation42_spill]] %s6474_s27 }
  0x20   :  { %7400 = sst [smem:[#allocation43_spill]] %s6479_s4 }
  0x21   :  { %s6489_s20 = sld [smem:[%s7363_s0 + %s6347_s15]]   ;;  %s6351_s15 = smov 23  }
  0x22   :  { %7401 = sst [smem:[#allocation44_spill]] %s6484_s17 }
  0x23   :  { %s6494_s27 = sld [smem:[%s7363_s0 + %s6348_s22]]   ;;  %s6352_s22 = smov 24  }
  0x24   :  { %7403 = sst [smem:[#allocation46_spill]] %s6499_s12 }
  0x25   :  { %s6504_s17 = sld [smem:[%s7363_s0 + %s6350_s7]]   ;;  %s6354_s7 = smov 26  }
  0x26   :  { %s6509_s21 = sld [smem:[%s7363_s0 + %s6351_s15]]   ;;  %s6355_s15 = smov 27  }
  0x27   :  { %s6519_s30 = sld [smem:[%s7363_s0 + %s6353_s28]]   ;;  %s6357_s28 = smov 29  }
  0x28   :  { %s6529_s8 = sld [smem:[%s7363_s0 + %s6355_s15]]   ;;  %s6359_s15 = smov 31  }
  0x29   :  { %7402 = sst [smem:[#allocation45_spill]] %s6494_s27 }
  0x2a   :  { %s6514_s27 = sld [smem:[%s7363_s0 + %s6352_s22]]   ;;  %s6356_s22 = smov 28  }
  0x2b   :  { %7404 = sst [smem:[#allocation47_spill]] %s6504_s17 }
  0x2c   :  { %s6524_s17 = sld [smem:[%s7363_s0 + %s6354_s7]]   ;;  %s6358_s7 = smov 30  }
  0x2d   :  { %7406 = sst [smem:[#allocation49_spill]] %s6519_s30 }
  0x2e   :  { %7408 = sst [smem:[#allocation51_spill]] %s6529_s8 }
  0x2f   :  { %s6539_s30 = sld [smem:[%s7363_s0 + %s6357_s28]]  }
  0x30   :  { %7405 = sst [smem:[#allocation48_spill]] %s6514_s27 }
  0x31   :  { %s6534_s27 = sld [smem:[%s7363_s0 + %s6356_s22]]  }
  0x32   :  { %7407 = sst [smem:[#allocation50_spill]] %s6524_s17 }
  0x33   :  { %s6544_s17 = sld [smem:[%s7363_s0 + %s6358_s7]]  }
  0x34   :  { %s6549_s19 = sld [smem:[%s7363_s0 + %s6359_s15]]  }
  0x37   :  { %7409 = sst [smem:[#allocation52_spill]] %s6534_s27 }
  0x39   :  { %7410 = sst [smem:[#allocation53_spill]] %s6544_s17 }
  0x3a   :  { %7411 = sst [smem:[#allocation54_spill]] %s6549_s19 }
  0x3b   :  { %68 = vsyncpa [#allocation3], 0 }
  0x3c   :  { %70 = vsyncpa [#allocation3 + $0x1], 0 }
  0x3d   :  { %71 = vsyncpa [#allocation6], 0 }
  0x3e   :  { %73 = vsyncpa [#allocation6 + $0x1], 0 }
  0x3f   :  { %74 = vsyncpa [#allocation9], 0 }
  0x40   :  { %75 = vsyncpa [#allocation12], 0 }
  0x41   :  { %76 = vsyncpa [#allocation15], 0 }
  0x42   :  { %77 = vsyncpa [#allocation18], 0 }
  0x43   :  { %78 = vsyncpa [#allocation21], 0 }
  0x44   :  { %79 = vsyncpa [#allocation4], 0 }
  0x45   :  { %81 = vsyncpa [#allocation4 + $0x1], 0  ;;  %s6551_s22 = smov 0   ;;  %s6553_s23 = smov 0  }
  0x46   :  { %s6555_s26 = smov 0   ;;  %s6557_s28 = smov 0  }
  0x47 LB: > { %s7412_s9 = sld [smem:[#allocation32_spill]]  ;;  %s6360_s0 = smov [#allocation8]   ;;  %s6315_s22 = sphi %s6551_s22, %s7483_s22   ;;  %s6327_s28 = sphi %s6557_s28, %s7480_s28   ;;  %s6323_s26 = sphi %s6555_s26, %s7482_s26   ;;  %s6319_s23 = sphi %s6553_s23, %s7484_s23  }
  0x48   : > { %7413 = sst [smem:[#allocation55_spill]] %s6315_s22  ;;  %s812_s1 = sshll.u32 %s6360_s0, 4  ;;  %s813_s1 = int_to_ptr.vmem [resolvable:$true] %s812_s1 }
  0x49   : > { %7414 = sst [smem:[#allocation56_spill]] %s6323_s26  ;;  %s6572_s2 = sadd.s32 4294967295, %s6327_s28  }
  0x4a   : > { %p5001_p0 = scmp.ge.s32.totalorder %s6327_s28, 1  ;;  %p7365_p1 = scmp.eq.s32.totalorder %s6572_s2, 0 }
  0x4b   : > { %p794_p2 = scmp.lt.s32.totalorder %s6327_s28, 3  ;;  %s6361_s10 = smov [#allocation11]  }
  0x4c   : > { %s844_s11 = sshll.u32 %s6361_s10, 4  ;;  %s6362_s16 = smov [#allocation14]   ;;  %s6590_s11 = int_to_ptr.vmem [resolvable:$true] %s844_s11 }
  0x4d   : > { %p6577_p3 = pnand %p5001_p0, %p794_p2  ;;  %s882_s18 = sshll.u32 %s6362_s16, 4  ;;  %s6592_s18 = int_to_ptr.vmem [resolvable:$true] %s882_s18 }
  0x4e   : > { %s5906_s19 = scalar_lea.vmem %s813_s1, 1024  ;;  %p5914_p11 = scmp.lt.s32.totalorder %s813_s1, %s813_s1 }
  0x4f   : > { %s7415_s7 = scalar_select %p6577_p3, 1, 0 }
  0x50   : > { %p5600_p5 = pneg %p6577_p3  ;;  %p5907_p8 = scmp.ne.s32.totalorder %s813_s1, %s5906_s19 }
  0x51   : > { %p5915_p12 = scmp.lt.s32.totalorder %s5906_s19, %s5906_s19 }
  0x52   : > { %p6586_p6 = pnand %p5600_p5, %p7365_p1 }
  0x53   : > { %p5916_p13 = por %p5915_p12, %p5914_p11 }
  0x54   : > { %s7416_s15 = scalar_select %p6586_p6, 1, 0 }
  0x55   : > { %p6596_p7 = pneg %p6586_p6 }
  0x57   : > { %s7417_s0 = scalar_select %p6596_p7, 1, 0 }
  0x58   : > { %p5909_p9 = pnand %p5907_p8, %p6596_p7 }
  0x5a   : > { %p5910_p10 = pneg %p5909_p9 }
  0x5c   : > { %p5917_p0 = pnand %p5916_p13, %p5910_p10 }
  0x5e   : > { %5920 = shalt.err (!%p5917_p0)
}
  0x5f   : > { %s7366_s10 = smov 64   ;;  %s7418_s3 = sld [smem:[#allocation35_spill]] }
  0x60   : > { %s7369_s16 = smov 4   ;;  %s5932_s17 = scalar_lea.vmem %s6590_s11, 1024 }
  0x61   : > { %p5933_p2 = scmp.ne.s32.totalorder %s6590_s11, %s5932_s17  ;;  %p5940_p9 = scmp.lt.s32.totalorder %s6590_s11, %s6590_s11 }
  0x62   : > { %p5941_p10 = scmp.lt.s32.totalorder %s5932_s17, %s5932_s17 }
  0x63   : > { %p5935_p5 = pnand %p5933_p2, %p6596_p7 }
  0x64   : > { %p5942_p11 = por %p5941_p10, %p5940_p9 }
  0x65   : > { %5603 = dma.hbm_to_vmem [thread:$0]  (!%p6586_p6), %s7418_s3, 1024, %s813_s1, [#allocation9], %s7366_s10, %s7366_s10, %s7369_s16  }
  0x66   : > { %p5936_p8 = pneg %p5935_p5 }
  0x68   : > { %p5943_p12 = pnand %p5942_p11, %p5936_p8 }
  0x6a   : > { %5946 = shalt.err (!%p5943_p12)
}
  0x6b   : > { %s7419_s24 = sld [smem:[#allocation38_spill]]  ;;  %s5958_s19 = scalar_lea.vmem %s6592_s18, 1024 }
  0x6c   : > { %p5959_p13 = scmp.ne.s32.totalorder %s6592_s18, %s5958_s19  ;;  %p5966_p5 = scmp.lt.s32.totalorder %s6592_s18, %s6592_s18 }
  0x6d   : > { %p5967_p8 = scmp.lt.s32.totalorder %s5958_s19, %s5958_s19 }
  0x6e   : > { %p5961_p0 = pnand %p5959_p13, %p6596_p7 }
  0x6f   : > { %p5968_p9 = por %p5967_p8, %p5966_p5 }
  0x70   : > { %p5962_p2 = pneg %p5961_p0 }
  0x71   : > { %5609 = dma.hbm_to_vmem [thread:$0]  (!%p6586_p6), %s7419_s24, 1024, %s6590_s11, [#allocation12], %s7366_s10, %s7366_s10, %s7369_s16  }
  0x72   : > { %p5969_p10 = pnand %p5968_p9, %p5962_p2 }
  0x74   : > { %5972 = shalt.err (!%p5969_p10)
}
  0x75   : > { %s7420_s4 = sld [smem:[#allocation43_spill]]  ;;  %s6365_s17 = smov [#allocation17]  }
  0x76   : > { %s914_s1 = sshll.u32 %s6365_s17, 4  ;;  %s6366_s11 = smov [#allocation20]   ;;  %s915_s1 = int_to_ptr.vmem [resolvable:$true] %s914_s1 }
  0x77   : > { %s952_s3 = sshll.u32 %s6366_s11, 4  ;;  %s5984_s24 = scalar_lea.vmem %s915_s1, 1024  ;;  %s953_s3 = int_to_ptr.vmem [resolvable:$true] %s952_s3 }
  0x78   : > { %p5985_p11 = scmp.ne.s32.totalorder %s915_s1, %s5984_s24  ;;  %p5992_p0 = scmp.lt.s32.totalorder %s915_s1, %s915_s1 }
  0x79   : > { %p5993_p2 = scmp.lt.s32.totalorder %s5984_s24, %s5984_s24 }
  0x7a   : > { %p5987_p12 = pnand %p5985_p11, %p6596_p7 }
  0x7b   : > { %5615 = dma.hbm_to_vmem [thread:$0]  (!%p6586_p6), %s7420_s4, 1024, %s6592_s18, [#allocation15], %s7366_s10, %s7366_s10, %s7369_s16  }
  0x7c   : > { %p5988_p13 = pneg %p5987_p12  ;;  %p5994_p5 = por %p5993_p2, %p5992_p0 }
  0x7e   : > { %p5995_p8 = pnand %p5994_p5, %p5988_p13 }
  0x80   : > { %5998 = shalt.err (!%p5995_p8)
}
  0x81   : > { %s7421_s12 = sld [smem:[#allocation46_spill]]  ;;  %s6010_s18 = scalar_lea.vmem %s953_s3, 2048 }
  0x82   : > { %p6011_p9 = scmp.ne.s32.totalorder %s953_s3, %s6010_s18  ;;  %p6018_p12 = scmp.lt.s32.totalorder %s953_s3, %s953_s3 }
  0x83   : > { %p6019_p4 = scmp.lt.s32.totalorder %s6010_s18, %s6010_s18 }
  0x84   : > { %p6013_p10 = pnand %p6011_p9, %p6596_p7 }
  0x85   : > { %p6020_p1 = por %p6019_p4, %p6018_p12 }
  0x86   : > { %p6014_p11 = pneg %p6013_p10 }
  0x87   : > { %5621 = dma.hbm_to_vmem [thread:$0]  (!%p6586_p6), %s7421_s12, 1024, %s915_s1, [#allocation18], %s7366_s10, %s7366_s10, %s7369_s16  }
  0x88   : > { %p6021_p0 = pnand %p6020_p1, %p6014_p11 }
  0x8a   : > { %6024 = shalt.err (!%p6021_p0)
}
  0x8b   : > { %s6367_s24 = smov 128   ;;  %s7422_s8 = sld [smem:[#allocation51_spill]] }
  0x8c   : > { %s6368_s19 = smov 8   ;;  %s5000_s17 = sadd.s32 4294967294, %s6327_s28  }
  0x8d   : > { %s6649_s1 = sadd.s32 1, %s6327_s28   ;;  %s94_s11 = sadd.s32 1, %s6323_s26 }
  0x8e   : > { %7423 = sst [smem:[#allocation57_spill]] %s6649_s1  ;;  %s91_s18 = ssub.s32 %s6327_s28, %s6649_s1 }
  0x8f   : > { %p101_p1 = scmp.ne.s32.totalorder %s6323_s26, %s6319_s23  ;;  %p92_p4 = scmp.eq.s32.totalorder %s91_s18, 0 }
  0x90   : > { %p102_p13 = scmp.eq.s32.totalorder %s6327_s28, 0  ;;  %p107_p2 = scmp.ne.s32.totalorder %s6319_s23, %s6315_s22 }
  0x91   : > { %5627 = dma.hbm_to_vmem [thread:$0]  (!%p6586_p6), %s7422_s8, 2048, %s953_s3, [#allocation21], %s6367_s24, %s6367_s24, %s6368_s19  }
  0x92   : > { %p781_p5 = scmp.eq.s32.totalorder %s6572_s2, 1  ;;  %p103_p8 = por %p102_p13, %p101_p1 }
  0x93   : > { %s6661_s10 = scalar_select %p92_p4, %s6323_s26, %s94_s11  }
  0x94   : > { %p7425_p9 = scmp.eq.s32.totalorder %s6572_s2, 0  ;;  %p6669_p11 = por %p781_p5, %p101_p1 }
  0x95   : > { %7424 = sst [smem:[#allocation58_spill]] %s6661_s10  ;;  %p787_p12 = scmp.eq.s32.totalorder %s5000_s17, 1 }
  0x96   : > { %p6665_p10 = por %p7425_p9, %p107_p2  ;;  %p5655_p0 = scmp.lt.s32.totalorder %s6327_s28, 2 }
  0x97   : > { %s7427_s24 = scalar_select %p6669_p11, 1, 0 }
  0x98   : > { %s7426_s3 = scalar_select %p6665_p10, 1, 0 }
  0x99   : > { %7428 = sst [smem:[#allocation59_spill]] %s7427_s24  ;;  %s6675_s19 = sand.u32 1, %s6323_s26  }
  0x9a   : > { %p6677_p3 = por %p787_p12, %p107_p2  ;;  %s7378_s18 = sshll.u32 %s6675_s19, 3 }
  0x9b   : > { %s7375_s16 = sshll.u32 %s6327_s28, 7  ;;  %p6683_p4 = pnand %p5655_p0, %p103_p8 }
  0x9c   : > { %s7429_s11 = scalar_select %p6677_p3, 1, 0 }
  0x9d   : > { %s7431_s4 = scalar_select %p6683_p4, 1, 0 }
  0x9e   : > { %7430 = sst [smem:[#allocation60_spill]] %s7429_s11  ;;  %s1003_s8 = sand.u32 1, %s6327_s28  }
  0x9f   : > { %s6691_s17 = scalar_lea.hbm %s7412_s9, %s7375_s16  ;;  %s1007_s12 = scalar_lea.vmem [#allocation5], %s7378_s18 }
  0xa0   : > { %s1014_s10 = sshll.u32 %s1007_s12, 4  ;;  %s6695_s26 = scalar_lea.sflag [#allocation6], %s1003_s8  ;;  %s1015_s10 = int_to_ptr.vmem [resolvable:$true] %s1014_s10 }
  0xa1   : > { %s6025_s1 = scalar_lea.hbm %s6691_s17, 128  ;;  %p6701_p13 = pneg %p6683_p4 }
  0xa2   : > { %p6026_p1 = scmp.ne.s32.totalorder %s6691_s17, %s6025_s1  ;;  %s6030_s16 = scalar_lea.hbm %s7412_s9, 256 }
  0xa3   : > { %p6031_p8 = scmp.lt.s32.totalorder %s6691_s17, %s7412_s9  ;;  %p6032_p9 = scmp.lt.s32.totalorder %s6030_s16, %s6025_s1 }
  0xa4   : > { %p6028_p2 = pnand %p6701_p13, %p6026_p1 }
  0xa5   : > { %p6033_p12 = por %p6032_p9, %p6031_p8 }
  0xa6   : > { %p6029_p5 = pneg %p6028_p2 }
  0xa8   : > { %p6034_p0 = pnand %p6033_p12, %p6029_p5 }
  0xaa   : > { %6037 = shalt.err (!%p6034_p0)
}
  0xab   : > { %s6038_s12 = scalar_lea.vmem %s1015_s10, 128  ;;  %s6369_s8 = smov [#allocation5]  }
  0xac   : > { %p6039_p3 = scmp.ne.s32.totalorder %s1015_s10, %s6038_s12  ;;  %s6043_s18 = sshll.u32 %s6369_s8, 4  ;;  %s6044_s18 = int_to_ptr.vmem [resolvable:$false] %s6043_s18 }
  0xad   : > { %s6045_s22 = scalar_lea.vmem %s6044_s18, 256  ;;  %p6046_p6 = scmp.lt.s32.totalorder %s1015_s10, %s6044_s18 }
  0xae   : > { %p6041_p11 = pnand %p6039_p3, %p6701_p13  ;;  %p6047_p7 = scmp.lt.s32.totalorder %s6045_s22, %s6038_s12 }
  0xb0   : > { %p6042_p10 = pneg %p6041_p11  ;;  %p6048_p1 = por %p6047_p7, %p6046_p6 }
  0xb2   : > { %p6049_p2 = pnand %p6048_p1, %p6042_p10 }
  0xb4   : > { %6052 = shalt.err (!%p6049_p2)
}
  0xb5   : > { %5637 = dma.hbm_to_vmem [thread:$0]  (!%p6683_p4), %s6691_s17, 128, %s1015_s10, %s6695_s26  }
  0xb6   : > { %s6370_s16 = smov [#allocation10]   ;;  %s6371_s9 = smov [#allocation13]  }
  0xb7   : > { %s828_s1 = sshll.u32 %s6370_s16, 4  ;;  %s860_s24 = sshll.u32 %s6371_s9, 4  ;;  %s829_s1 = int_to_ptr.vmem [resolvable:$true] %s828_s1  ;;  %s861_s24 = int_to_ptr.vmem [resolvable:$true] %s860_s24 }
  0xb8   : > { %s6064_s27 = scalar_lea.vmem %s829_s1, 1024  ;;  %p7433_p11 = scmp.ne.s32.totalorder %s7417_s0, 0 }
  0xb9   : > { %p6065_p3 = scmp.ne.s32.totalorder %s829_s1, %s6064_s27  ;;  %p6072_p9 = scmp.lt.s32.totalorder %s829_s1, %s829_s1 }
  0xba   : > { %p6073_p6 = scmp.lt.s32.totalorder %s6064_s27, %s6064_s27 }
  0xbb   : > { %p6067_p5 = pnand %p6065_p3, %p7433_p11 }
  0xbc   : > { %p6074_p7 = por %p6073_p6, %p6072_p9 }
  0xbd   : > { %p6068_p8 = pneg %p6067_p5 }
  0xbf   : > { %p6075_p10 = pnand %p6074_p7, %p6068_p8 }
  0xc1   : > { %6078 = shalt.err (!%p6075_p10)
}
  0xc2   : > { %p7434_p12 = scmp.ne.s32.totalorder %s7416_s15, 0  ;;  %s7435_s22 = smov 4  }
  0xc3   : > { %s7436_s18 = smov 64   ;;  %s6090_s9 = scalar_lea.vmem %s861_s24, 1024 }
  0xc4   : > { %5606 = dma.hbm_to_vmem [thread:$0]  (!%p7434_p12), %s6439_s14, 1024, %s829_s1, [#allocation9], %s7436_s18, %s7436_s18, %s7435_s22  }
  0xc5   : > { %p6091_p0 = scmp.ne.s32.totalorder %s861_s24, %s6090_s9  ;;  %p6098_p3 = scmp.lt.s32.totalorder %s861_s24, %s861_s24 }
  0xc6   : > { %p6099_p5 = scmp.lt.s32.totalorder %s6090_s9, %s6090_s9 }
  0xc7   : > { %p6093_p1 = pnand %p6091_p0, %p7433_p11 }
  0xc8   : > { %p6100_p4 = por %p6099_p5, %p6098_p3 }
  0xc9   : > { %p6094_p2 = pneg %p6093_p1 }
  0xcb   : > { %p6101_p9 = pnand %p6100_p4, %p6094_p2 }
  0xcd   : > { %6104 = shalt.err (!%p6101_p9)
}
  0xce   : > { %5612 = dma.hbm_to_vmem [thread:$0]  (!%p7434_p12), %s6459_s6, 1024, %s861_s24, [#allocation12], %s7436_s18, %s7436_s18, %s7435_s22  }
  0xcf   : > { %s6372_s27 = smov [#allocation16]   ;;  %s6373_s17 = smov [#allocation19]  }
  0xd0   : > { %s898_s10 = sshll.u32 %s6372_s27, 4  ;;  %s930_s12 = sshll.u32 %s6373_s17, 4  ;;  %s899_s10 = int_to_ptr.vmem [resolvable:$true] %s898_s10  ;;  %s931_s12 = int_to_ptr.vmem [resolvable:$true] %s930_s12 }
  0xd1   : > { %s6116_s8 = scalar_lea.vmem %s899_s10, 1024  ;;  %p6124_p4 = scmp.lt.s32.totalorder %s899_s10, %s899_s10 }
  0xd2   : > { %p6117_p8 = scmp.ne.s32.totalorder %s899_s10, %s6116_s8  ;;  %p6125_p10 = scmp.lt.s32.totalorder %s6116_s8, %s6116_s8 }
  0xd4   : > { %p6119_p6 = pnand %p6117_p8, %p7433_p11  ;;  %p6126_p0 = por %p6125_p10, %p6124_p4 }
  0xd6   : > { %p6120_p7 = pneg %p6119_p6 }
  0xd8   : > { %p6127_p1 = pnand %p6126_p0, %p6120_p7 }
  0xda   : > { %6130 = shalt.err (!%p6127_p1)
}
  0xdb   : > { %5618 = dma.hbm_to_vmem [thread:$0]  (!%p7434_p12), %s6489_s20, 1024, %s899_s10, [#allocation15], %s7436_s18, %s7436_s18, %s7435_s22  }
  0xdc   : > { %s6142_s24 = scalar_lea.vmem %s931_s12, 1024  ;;  %p6150_p9 = scmp.lt.s32.totalorder %s931_s12, %s931_s12 }
  0xdd   : > { %p6143_p2 = scmp.ne.s32.totalorder %s931_s12, %s6142_s24  ;;  %p6151_p8 = scmp.lt.s32.totalorder %s6142_s24, %s6142_s24 }
  0xdf   : > { %p6145_p3 = pnand %p6143_p2, %p7433_p11  ;;  %p6152_p6 = por %p6151_p8, %p6150_p9 }
  0xe1   : > { %p6146_p5 = pneg %p6145_p3 }
  0xe3   : > { %p6153_p4 = pnand %p6152_p6, %p6146_p5 }
  0xe5   : > { %6156 = shalt.err (!%p6153_p4)
}
  0xe6   : > { %5624 = dma.hbm_to_vmem [thread:$0]  (!%p7434_p12), %s6509_s21, 1024, %s931_s12, [#allocation18], %s7436_s18, %s7436_s18, %s7435_s22  }
  0xe7   : > { %s6374_s16 = smov [#allocation22]  }
  0xe8   : > { %s968_s1 = sshll.u32 %s6374_s16, 4  ;;  %s969_s1 = int_to_ptr.vmem [resolvable:$true] %s968_s1 }
  0xe9   : > { %s6168_s9 = scalar_lea.vmem %s969_s1, 2048  ;;  %p6176_p1 = scmp.lt.s32.totalorder %s969_s1, %s969_s1 }
  0xea   : > { %p6169_p7 = scmp.ne.s32.totalorder %s969_s1, %s6168_s9  ;;  %p6177_p2 = scmp.lt.s32.totalorder %s6168_s9, %s6168_s9 }
  0xec   : > { %p6171_p10 = pnand %p6169_p7, %p7433_p11  ;;  %p6178_p3 = por %p6177_p2, %p6176_p1 }
  0xee   : > { %p6172_p0 = pneg %p6171_p10 }
  0xf0   : > { %p6179_p5 = pnand %p6178_p3, %p6172_p0 }
  0xf2   : > { %6182 = shalt.err (!%p6179_p5)
}
  0xf3   : > { %5630 = dma.hbm_to_vmem [thread:$0]  (!%p7434_p12), %s6539_s30, 2048, %s969_s1, [#allocation21], %s7436_s18, %s7436_s18, %s7435_s22  }
  0xf4   : > { %s7437_s0 = sshll.u32 %s6327_s28, 7  ;;  %s7438_s10 = sshll.u32 %s6675_s19, 3 }
  0xf5   : > { %s6759_s27 = scalar_lea.hbm %s6394_s5, %s7437_s0  ;;  %s989_s15 = scalar_lea.vmem [#allocation2], %s7438_s10 }
  0xf6   : > { %s996_s17 = sshll.u32 %s989_s15, 4  ;;  %s5017_s12 = sshll.u32 %s6675_s19, 2  ;;  %s997_s17 = int_to_ptr.vmem [resolvable:$true] %s996_s17 }
  0xf7   : > { %s986_s8 = scalar_lea.sflag [#allocation3], %s6675_s19  ;;  %s6183_s24 = scalar_lea.hbm %s6759_s27, 128 }
  0xf8   : > { %p6184_p11 = scmp.ne.s32.totalorder %s6759_s27, %s6183_s24  ;;  %s6188_s16 = scalar_lea.hbm %s6394_s5, 256 }
  0xf9   : > { %p6189_p6 = scmp.lt.s32.totalorder %s6759_s27, %s6394_s5  ;;  %p6190_p12 = scmp.lt.s32.totalorder %s6188_s16, %s6183_s24 }
  0xfa   : > { %p6186_p9 = pnand %p6184_p11, %p6701_p13 }
  0xfb   : > { %p6191_p4 = por %p6190_p12, %p6189_p6 }
  0xfc   : > { %p6187_p8 = pneg %p6186_p9 }
  0xfe   : > { %p6192_p7 = pnand %p6191_p4, %p6187_p8 }
 0x100   : > { %6195 = shalt.err (!%p6192_p7)
}
 0x101   : > { %s6196_s22 = scalar_lea.vmem %s997_s17, 128  ;;  %s6375_s18 = smov [#allocation2]  }
 0x102   : > { %p6197_p10 = scmp.ne.s32.totalorder %s997_s17, %s6196_s22  ;;  %s6201_s1 = sshll.u32 %s6375_s18, 4  ;;  %s6202_s1 = int_to_ptr.vmem [resolvable:$false] %s6201_s1 }
 0x103   : > { %s6203_s19 = scalar_lea.vmem %s6202_s1, 256  ;;  %p6204_p2 = scmp.lt.s32.totalorder %s997_s17, %s6202_s1 }
 0x104   : > { %p6199_p0 = pnand %p6197_p10, %p6701_p13  ;;  %p6205_p3 = scmp.lt.s32.totalorder %s6203_s19, %s6196_s22 }
 0x106   : > { %p6200_p1 = pneg %p6199_p0  ;;  %p6206_p5 = por %p6205_p3, %p6204_p2 }
 0x108   : > { %p6207_p11 = pnand %p6206_p5, %p6200_p1 }
 0x10a   : > { %6210 = shalt.err (!%p6207_p11)
}
 0x10b   : > { %p7439_p9 = scmp.ne.s32.totalorder %s7431_s4, 0  ;;  %s5018_s9 = sshll.u32 %s6327_s28, 6 }
 0x10c   : > { %s1030_s0 = scalar_lea.hbm %s6404_s13, %s5018_s9  ;;  %s1025_s10 = scalar_lea.vmem [#allocation7], %s5017_s12 }
 0x10d   : > { %5634 = dma.hbm_to_vmem [thread:$0]  (!%p7439_p9), %s6759_s27, 128, %s997_s17, %s986_s8  }
 0x10e   : > { %s1032_s15 = sshll.u32 %s1025_s10, 4  ;;  %s6211_s24 = scalar_lea.hbm %s1030_s0, 64  ;;  %s1033_s15 = int_to_ptr.vmem [resolvable:$true] %s1032_s15 }
 0x10f   : > { %p6212_p8 = scmp.ne.s32.totalorder %s1030_s0, %s6211_s24  ;;  %s6216_s16 = scalar_lea.hbm %s6404_s13, 128 }
 0x110   : > { %p6217_p4 = scmp.lt.s32.totalorder %s1030_s0, %s6404_s13  ;;  %p6218_p7 = scmp.lt.s32.totalorder %s6216_s16, %s6211_s24 }
 0x111   : > { %p6214_p6 = pnand %p6212_p8, %p6701_p13 }
 0x112   : > { %p6219_p10 = por %p6218_p7, %p6217_p4 }
 0x113   : > { %p6215_p12 = pneg %p6214_p6 }
 0x115   : > { %p6220_p0 = pnand %p6219_p10, %p6215_p12 }
 0x117   : > { %6223 = shalt.err (!%p6220_p0)
}
 0x118   : > { %s6224_s22 = scalar_lea.vmem %s1033_s15, 64  ;;  %s6376_s27 = smov [#allocation7]  }
 0x119   : > { %p6225_p1 = scmp.ne.s32.totalorder %s1033_s15, %s6224_s22  ;;  %s6229_s17 = sshll.u32 %s6376_s27, 4  ;;  %s6230_s17 = int_to_ptr.vmem [resolvable:$false] %s6229_s17 }
 0x11a   : > { %s6231_s12 = scalar_lea.vmem %s6230_s17, 128  ;;  %p6232_p5 = scmp.lt.s32.totalorder %s1033_s15, %s6230_s17 }
 0x11b   : > { %p6227_p2 = pnand %p6225_p1, %p6701_p13  ;;  %p6233_p11 = scmp.lt.s32.totalorder %s6231_s12, %s6224_s22 }
 0x11d   : > { %p6228_p3 = pneg %p6227_p2  ;;  %p6234_p8 = por %p6233_p11, %p6232_p5 }
 0x11f   : > { %p6235_p6 = pnand %p6234_p8, %p6228_p3 }
 0x121   : > { %6238 = shalt.err (!%p6235_p6)
}
 0x122   : > { %5640 = dma.hbm_to_vmem [thread:$0]  (!%p7439_p9), %s1030_s0, 64, %s1033_s15, %s6695_s26  }
 0x123   : > { %p7440_p12 = scmp.ne.s32.totalorder %s7415_s7, 0 }
 0x124   : > { %s6791_s11 = sand.u32 (!%p7440_p12), 1, %s6319_s23   ;;  %p7441_p13 = scmp.ne.s32.totalorder (!%p7440_p12), %s7426_s3, 0 }
 0x125   : > { %1054 = sbr.rel (%p7440_p12) target bundleno = 4544 (0x11c0), region = 144  ;;  %s6794_s8 = sshll.u32 (!%p7440_p12), %s6791_s11, 3 }
 0x126   : > { %s1057_s18 = scalar_lea.sflag (!%p7440_p12), [#allocation3], %s6791_s11  ;;  %s1060_s1 = scalar_lea.vmem (!%p7440_p12), [#allocation2], %s6794_s8 }
 0x12a   : > { %6282 = dma.done.wait (%p7441_p13), %s1057_s18, 128  }
 0x12b   : > { %6284 = vsyncadd (%p7441_p13), %s1057_s18, 4294967168  ;;  %s1065_s4 = sand.u32 1, %s6572_s2   ;;  %s1069_s7 = scalar_lea.vmem [#allocation5], %s6794_s8 }
 0x12c   : > { %s1066_s26 = scalar_lea.sflag [#allocation6], %s1065_s4 }
 0x12d   : > { %6286 = dma.done.wait (%p7441_p13), %s1066_s26, 192  }
 0x12e   : > { %6288 = vsyncadd (%p7441_p13), %s1066_s26, 4294967104  ;;  %s5022_s19 = sshll.u32 %s6791_s11, 2  ;;  %p7442_p9 = scmp.eq.s32.totalorder %s6572_s2, 0 }
 0x12f   : > { %s6809_s9 = scalar_lea.vmem [#allocation7], %s5022_s19 }
 0x130   : > { %6290 = dma.done.wait (%p7442_p9), [#allocation9], 2048   ;;  %p7443_p4 = pmov %p7442_p9 }
 0x132   : > { %6292 = vsyncadd (%p7443_p4), [#allocation9], 4294965248  ;;  %p7444_p7 = pmov %p7443_p4 }
 0x133   : > { %p7445_p10 = pmov %p7443_p4 }
 0x134   : > { %6294 = dma.done.wait (%p7444_p7), [#allocation12], 2048  }
 0x135   : > { %6296 = vsyncadd (%p7445_p10), [#allocation12], 4294965248  ;;  %p7446_p0 = pmov %p7443_p4 }
 0x137   : > { %6298 = dma.done.wait (%p7446_p0), [#allocation15], 2048   ;;  %p7447_p1 = pmov %p7446_p0 }
 0x138   : > { %p7448_p2 = pmov %p7446_p0 }
 0x139   : > { %6300 = vsyncadd (%p7447_p1), [#allocation15], 4294965248 }
 0x13a   : > { %6302 = dma.done.wait (%p7448_p2), [#allocation18], 2048   ;;  %p7449_p3 = pmov %p7446_p0 }
 0x13b   : > { %p7450_p5 = pmov %p7446_p0 }
 0x13c   : > { %6304 = vsyncadd (%p7449_p3), [#allocation18], 4294965248 }
 0x13d   : > { %6306 = dma.done.wait (%p7450_p5), [#allocation21], 4096   ;;  %p7451_p11 = pmov %p7446_p0 }
 0x13e   : > { %v1224_v0 = vld [vmem:[%s1060_s1] sm:$0xff]  ;;  %v5754_v3 = vld [vmem:[#allocation8 + $0x30] sm:$0xff]   ;;  %v6377_v4 = vmov 0.0   ;;  %v5756_v10 = vld [vmem:[#allocation8 + $0x28] sm:$0xff]   ;;  %vm6378_vm0 = vmmov 0   ;;  %s7452_s3 = sld [smem:[#allocation37_spill]]  ;;  %v1609_v61 = vlaneseq }
 0x13f   : > { %6308 = vsyncadd (%p7451_p11), [#allocation21], 4294963200  ;;  %1235 = vadd.xlane.f32.xlu0 %v1224_v0  ;;  %v5752_v1 = vld [vmem:[#allocation8 + $0x38] sm:$0xff]   ;;  %5296 = vmatprep.subr.bf16.mxu0 %v6377_v4  ;;  %v5755_v5 = vld [vmem:[#allocation10 + $0x30] sm:$0xff]   ;;  %s7453_s0 = sld [smem:[#allocation36_spill]]  ;;  %s6379_s10 = smov 32  }
 0x140   : > { %v5753_v2 = vld [vmem:[#allocation10 + $0x38] sm:$0xff]   ;;  %5316 = vmatprep.subr.bf16.mxu1 %v6377_v4  ;;  %5297 = vmatpush3.bf16.msra.mxu0 %v5752_v1  ;;  %v5757_v11 = vld [vmem:[#allocation10 + $0x28] sm:$0xff]   ;;  %v5758_v12 = vld [vmem:[#allocation8 + $0x20] sm:$0xff]   ;;  %s6380_s15 = smov 96   ;;  %s6381_s24 = smov 64   ;;  %v6881_v1 = vshrl.u32 %v1609_v61, 7 }
 0x141   : > { %5317 = vmatpush3.bf16.msra.mxu1 %v5753_v2  ;;  %5298 = vmatprep.subr.bf16.mxu0 %v6377_v4  ;;  %v5759_v13 = vld [vmem:[#allocation10 + $0x20] sm:$0xff]   ;;  %v5760_v14 = vld [vmem:[#allocation8 + $0x18] sm:$0xff]   ;;  %v5762_v16 = vld [vmem:[#allocation8 + $0x10] sm:$0xff]   ;;  %v6382_v59 = vmov 1983009808   ;;  %vm2103_vm1 = vcmask 261120  }
 0x142   : > { %5318 = vmatprep.subr.bf16.mxu1 %v6377_v4  ;;  %5312 = vmatprep.mubr.msk.bf16.mxu0 %vm6378_vm0, %v6377_v4  ;;  %v5761_v15 = vld [vmem:[#allocation10 + $0x18] sm:$0xff]   ;;  %v5763_v17 = vld [vmem:[#allocation10 + $0x10] sm:$0xff]   ;;  %v5764_v18 = vld [vmem:[#allocation8 + $0x8] sm:$0xff]   ;;  %v1607_v60 = vunpack.c.l.s4 %v6382_v59  ;;  %v6383_v62 = vmov 1934713408   ;;  %vm2297_vm4 = vcmask 64512  }
 0x143   : > { %5332 = vmatprep.mubr.msk.bf16.mxu1 %vm6378_vm0, %v6377_v4  ;;  %v5765_v19 = vld [vmem:[#allocation10 + $0x8] sm:$0xff]   ;;  %v5766_v20 = vld [vmem:[#allocation8] sm:$0xff]   ;;  %v5035_v26 = vld [vmem:[%s6419_s25] ss:$0 sm:$0xff]  ;;  %v1624_v63 = vunpack.c.l.s4 %v6383_v62  ;;  %s7456_s16 = sld [smem:[#allocation39_spill]]  ;;  %p1214_p8 = scmp.lt.s32.totalorder %s6572_s2, 1 }
 0x144   : > { %5299 = vmatpush3.bf16.msra.mxu0 %v5754_v3  ;;  %v5767_v21 = vld [vmem:[#allocation10] sm:$0xff]   ;;  %v5036_v28 = vld [vmem:[%s6424_s29] ss:$0 sm:$0xff]  ;;  %v5769_v33 = vld [vmem:[#allocation11 + $0x30] sm:$0xff]   ;;  %s7457_s22 = sld [smem:[#allocation34_spill]]  ;;  %vm2358_vm7 = vcmask 1043456  }
 0x145   : > { %5319 = vmatpush3.bf16.msra.mxu1 %v5755_v5  ;;  %5300 = vmatprep.subr.bf16.mxu0 %v6377_v4  ;;  %v5768_v31 = vld [vmem:[#allocation11 + $0x38] sm:$0xff]   ;;  %v5770_v34 = vld [vmem:[#allocation11 + $0x28] sm:$0xff]   ;;  %v5771_v35 = vld [vmem:[#allocation11 + $0x20] sm:$0xff]   ;;  %v1625_v2 = vunpack.c.0.s8 %v1624_v63  ;;  %s6992_s27 = scalar_select %p1214_p8, %s6572_s2, 1  ;;  %vm2689_vm8 = vcmask 523264   ;;  %vm2691_vm9 = vcmask 785408  }
 0x146   : > { %5320 = vmatprep.subr.bf16.mxu1 %v6377_v4  ;;  %v5772_v36 = vld [vmem:[#allocation11 + $0x18] sm:$0xff]   ;;  %v5773_v37 = vld [vmem:[#allocation11 + $0x10] sm:$0xff]   ;;  %v5774_v38 = vld [vmem:[#allocation11 + $0x8] sm:$0xff]   ;;  %s7460_s18 = sld [smem:[#allocation40_spill]] }
 0x147   : > { %v5775_v39 = vld [vmem:[#allocation11] sm:$0xff]   ;;  %v5046_v40 = vld [vmem:[%s7452_s3] ss:$0 sm:$0xff]  ;;  %s5034_s17 = sshll.u32 %s6992_s27, 2  ;;  %s7462_s4 = sld [smem:[#allocation41_spill]] }
 0x148   : > { %5301 = vmatpush3.bf16.msra.mxu0 %v5756_v10  ;;  %v5037_v41 = vld [vmem:[%s7453_s0] ss:$0 sm:$0xff]  ;;  %s7463_s26 = sld [smem:[#allocation42_spill]] }
 0x149   : > { %5321 = vmatpush3.bf16.msra.mxu1 %v5757_v11  ;;  %5302 = vmatprep.subr.bf16.mxu0 %v6377_v4  ;;  %s7465_s19 = sld [smem:[#allocation33_spill]] }
 0x14a   : > { %5322 = vmatprep.subr.bf16.mxu1 %v6377_v4  ;;  %s1220_s12 = scalar_lea.vmem %s7457_s22, %s5034_s17  ;;  %s7466_s3 = sld [smem:[#allocation47_spill]] }
 0x14b   : > { %s7467_s0 = sld [smem:[#allocation48_spill]] }
 0x14c   : > { %5303 = vmatpush3.bf16.msra.mxu0 %v5758_v12  ;;  %s7472_s22 = sld [smem:[#allocation54_spill]] }
 0x14d   : > { %5323 = vmatpush3.bf16.msra.mxu1 %v5759_v13  ;;  %5304 = vmatprep.subr.bf16.mxu0 %v6377_v4  ;;  %s7474_s17 = sld [smem:[#allocation59_spill]] }
 0x14e   : > { %5324 = vmatprep.subr.bf16.mxu1 %v6377_v4 }
 0x150   : > { %5305 = vmatpush3.bf16.msra.mxu0 %v5760_v14 }
 0x151   : > { %5325 = vmatpush3.bf16.msra.mxu1 %v5761_v15  ;;  %5306 = vmatprep.subr.bf16.mxu0 %v6377_v4 }
 0x152   : > { %5326 = vmatprep.subr.bf16.mxu1 %v6377_v4 }
 0x153   : > { %p7475_p12 = scmp.ne.s32.totalorder %s7474_s17, 0 }
 0x154   : > { %5307 = vmatpush3.bf16.msra.mxu0 %v5762_v16 }
 0x155   : > { %5327 = vmatpush3.bf16.msra.mxu1 %v5763_v17  ;;  %5308 = vmatprep.subr.bf16.mxu0 %v6377_v4  ;;  %v6384_v17 = vmov 0  }
 0x156   : > { %5328 = vmatprep.subr.bf16.mxu1 %v6377_v4 }
 0x158   : > { %5309 = vmatpush3.bf16.msra.mxu0 %v5764_v18 }
 0x159   : > { %5329 = vmatpush3.bf16.msra.mxu1 %v5765_v19  ;;  %5310 = vmatprep.subr.bf16.mxu0 %v6377_v4 }
 0x15a   : > { %5330 = vmatprep.subr.bf16.mxu1 %v6377_v4 }
 0x15c   : > { %5311 = vmatpush3.bf16.msra.mxu0 %v5766_v20 }
 0x15d   : > { %5331 = vmatpush3.bf16.msra.mxu1 %v5767_v21  ;;  %5336 = vmatprep.subr.bf16.mxu0 %v6377_v4 }
 0x15e   : > { %5356 = vmatprep.subr.bf16.mxu1 %v6377_v4 }
 0x1c8   : > { %v1236_v6 = vpop.xlane.xlu0 %1235 }
 0x1c9   : > { %v1238_v7 = vmul.f32 0.0078125, %v1236_v6 }
 0x1cb   : > { %v1239_v8 = vsub.f32 %v1224_v0, %v1238_v7  ;;  %v1608_v0 = vunpack.c.0.s8 %v1607_v60 }
 0x1cd   : > { %v1240_v9 = vmul.f32 %v1239_v8, %v1239_v8  ;;  %v6884_v3 = vsub.s32 %v1608_v0, %v6881_v1 }
 0x1cf   : > { %1241 = vadd.xlane.f32.xlu0 %v1240_v9 }
 0x258   : > { %v1242_v22 = vpop.xlane.xlu0 %1241 }
 0x259   : > { %v1243_v23 = vmul.f32 0.0078125, %v1242_v22 }
 0x25b   : > { %v1244_v24 = vadd.f32 1e-06, %v1243_v23 }
 0x25d   : > { %5856 = vrsqrt.f32 %v1244_v24 }
 0x26a   : > { %v5857_v25 = vpop.eup %5856 }
 0x26b   : > { %v1246_v27 = vmul.f32 %v5857_v25, %v1239_v8  ;;  %v6888_v8 = vsub.s32 %v1625_v2, %v6881_v1 }
 0x26d   : > { %v1253_v29 = vmul.f32 %v5035_v26, %v1246_v27 }
 0x26f   : > { %v1260_v30 = vadd.f32 %v5036_v28, %v1253_v29 }
 0x271   : > { %v1261_v32 = vpack.c.bf16 %v1260_v30, %v1260_v30 }
 0x273   : > { %5313 = vmatmul.mubr.bf16.vlgmr.msra.gmra.mxu0 %v1261_v32  ;;  %5333 = vmatmul.mubr.bf16.vlgmr.msra.gmra.mxu1 %v1261_v32 }
 0x274   : > { %5337 = vmatpush3.bf16.msra.mxu0 %v5768_v31  ;;  %5352 = vmatprep.mubr.msk.bf16.mxu0 %vm6378_vm0, %v6377_v4 }
 0x275   : > { %5338 = vmatprep.subr.bf16.mxu0 %v6377_v4  ;;  %5358 = vmatprep.mubr.msk.bf16.mxu1 %vm6378_vm0, %v6377_v4 }
 0x278   : > { %5339 = vmatpush3.bf16.msra.mxu0 %v5769_v33 }
 0x279   : > { %5340 = vmatprep.subr.bf16.mxu0 %v6377_v4 }
 0x27c   : > { %5341 = vmatpush3.bf16.msra.mxu0 %v5770_v34 }
 0x27d   : > { %5342 = vmatprep.subr.bf16.mxu0 %v6377_v4 }
 0x280   : > { %5343 = vmatpush3.bf16.msra.mxu0 %v5771_v35 }
 0x281   : > { %5344 = vmatprep.subr.bf16.mxu0 %v6377_v4 }
 0x284   : > { %5345 = vmatpush3.bf16.msra.mxu0 %v5772_v36 }
 0x285   : > { %5346 = vmatprep.subr.bf16.mxu0 %v6377_v4 }
 0x288   : > { %5347 = vmatpush3.bf16.msra.mxu0 %v5773_v37 }
 0x289   : > { %5348 = vmatprep.subr.bf16.mxu0 %v6377_v4 }
 0x28c   : > { %5349 = vmatpush3.bf16.msra.mxu0 %v5774_v38 }
 0x28d   : > { %5350 = vmatprep.subr.bf16.mxu0 %v6377_v4 }
 0x290   : > { %5351 = vmatpush3.bf16.msra.mxu0 %v5775_v39 }
 0x291   : > { %5404 = vmatprep.subr.bf16.mxu0 %v6377_v4 }
 0x293   : > { %5353 = vmatmul.mubr.bf16.vlgmr.msra.gmra.mxu0 %v1261_v32 }
 0x294   : > { %5420 = vmatprep.mubr.msk.bf16.mxu0 %vm6378_vm0, %v6377_v4 }
 0x333   : > { %v1367_v42 = vpop.f32.mrf.mxu0  ;;  %v1480_v43 = vpop.f32.mrf.mxu1 }
 0x334   : > { %v1481_v44 = vadd.f32 %v5046_v40, %v1480_v43  ;;  %v1368_v47 = vadd.f32 %v5037_v41, %v1367_v42 }
 0x335   : > { %v5314_v45 = vpop.f32.mrf.mxu0  ;;  %v5334_v46 = vpop.f32.mrf.mxu1 }
 0x336   : > { %v1486_v48 = vpack.c.bf16 %v1481_v44, %v1481_v44  ;;  %v1373_v53 = vmul.f32 0.17677669, %v1368_v47 }
 0x337   : > { %v1370_v49 = vpop.f32.mrf.mxu0  ;;  %v1483_v50 = vpop.f32.mrf.mxu1 }
 0x338   : > { %1772 = vrot.lane.b32.xlu0 %v1486_v48, %s6379_s10  ;;  %1768 = vrot.lane.b32.xlu1 %v1486_v48, %s6380_s15  ;;  %v1374_v54 = vpack.c.bf16 %v1373_v53, %v1373_v53  ;;  %v1780_v16 = vrot.slane %v1486_v48, %v6884_v3 }
 0x339   : > { %v5315_v51 = vpop.f32.mrf.mxu0  ;;  %v5335_v52 = vpop.f32.mrf.mxu1 }
 0x33a   : > { %v1612_v28 = vrot.slane %v1374_v54, %v6884_v3 }
 0x33c   : > { %1770 = vrot.lane.b32.xlu1 %v1486_v48, %s6381_s24 }
 0x340   : > { %1600 = vrot.lane.b32.xlu1 %v1374_v54, %s6380_s15 }
 0x344   : > { %1602 = vrot.lane.b32.xlu1 %v1374_v54, %s6381_s24 }
 0x348   : > { %1604 = vrot.lane.b32.xlu1 %v1374_v54, %s6379_s10 }
 0x353   : > { %v6879_v55 = vpop.f32.mrf.mxu0 }
 0x355   : > { %v5354_v56 = vpop.f32.mrf.mxu0 }
 0x357   : > { %v1595_v57 = vpop.f32.mrf.mxu0 }
 0x359   : > { %v5355_v58 = vpop.f32.mrf.mxu0 }
 0x3aa   : > { %v1773_v5 = vpop.permute.xlu0 %1772  ;;  %v1769_v6 = vpop.permute.xlu1 %1768 }
 0x3ab   : > { %v1822_v7 = vrot.slane %v1773_v5, %v6884_v3  ;;  %v1814_v9 = vrot.slane %v1769_v6, %v6884_v3 }
 0x3ad   : > { %v1823_v10 = vcombine.low %v1814_v9, %v1822_v7  ;;  %v1824_v11 = vcombine.high %v1814_v9, %v1822_v7 }
 0x3ae   : > { %v1771_v12 = vpop.permute.xlu1 %1770 }
 0x3af   : > { %v1831_v13 = vrot.slane %v1823_v10, %v6888_v8  ;;  %v1838_v14 = vrot.slane %v1824_v11, %v6888_v8  ;;  %v1788_v15 = vrot.slane %v1771_v12, %v6884_v3 }
 0x3b1   : > { %v1839_v18 = vcombine.high %v1831_v13, %v6384_v17  ;;  %v1789_v19 = vcombine.low %v1780_v16, %v1788_v15  ;;  %v1790_v20 = vcombine.high %v1780_v16, %v1788_v15  ;;  %v1840_v22 = vcombine.high %v1838_v14, %v6384_v17 }
 0x3b2   : > { %v1601_v21 = vpop.permute.xlu1 %1600  ;;  %v1846_v25 = vshrl.u32 %v1831_v13, 16  ;;  %v1862_v27 = vshrl.u32 %v1838_v14, 16 }
 0x3b3   : > { %v1797_v23 = vrot.slane %v1789_v19, %v6888_v8  ;;  %v1804_v24 = vrot.slane %v1790_v20, %v6888_v8  ;;  %v1854_v26 = vshrl.u32 %v1839_v18, 16  ;;  %v1870_v34 = vshrl.u32 %v1840_v22, 16 }
 0x3b4   : > { %v1646_v53 = vrot.slane %v1601_v21, %v6884_v3 }
 0x3b5   : > { %v1805_v29 = vcombine.high %v1797_v23, %v6384_v17  ;;  %v1806_v30 = vcombine.high %v1804_v24, %v6384_v17  ;;  %v1843_v31 = vpack.i.b16 %v1831_v13, %v1797_v23  ;;  %v1845_v32 = vshrl.u32 %v1797_v23, 16 }
 0x3b6   : > { %v1603_v33 = vpop.permute.xlu1 %1602  ;;  %v1859_v35 = vpack.i.b16 %v1838_v14, %v1804_v24  ;;  %v1861_v36 = vshrl.u32 %v1804_v24, 16 }
 0x3b7   : > { %v1620_v37 = vrot.slane %v1603_v33, %v6884_v3  ;;  %v1847_v38 = vpack.i.b16 %v1846_v25, %v1845_v32  ;;  %v1851_v39 = vpack.i.b16 %v1839_v18, %v1805_v29  ;;  %v1853_v40 = vshrl.u32 %v1805_v29, 16 }
 0x3b8   : > { %v1867_v41 = vpack.i.b16 %v1840_v22, %v1806_v30  ;;  %v1863_v42 = vpack.i.b16 %v1862_v27, %v1861_v36  ;;  %v1869_v43 = vshrl.u32 %v1806_v30, 16  ;;  %v1873_v44 = vcombine.low %v1843_v31, %v1859_v35 }
 0x3b9   : > { %v1621_v45 = vcombine.low %v1612_v28, %v1620_v37  ;;  %v1855_v46 = vpack.i.b16 %v1854_v26, %v1853_v40  ;;  %v1622_v48 = vcombine.high %v1612_v28, %v1620_v37 }
 0x3ba   : > { %v1881_v47 = vcombine.low %v1851_v39, %v1867_v41  ;;  %v1605_v49 = vpop.permute.xlu1 %1604  ;;  %v1871_v50 = vpack.i.b16 %v1870_v34, %v1869_v43  ;;  %v1898_v51 = vcombine.low %v1847_v38, %v1863_v42  ;;  %v1880_v58 = vrot.slane %v1873_v44, %v6884_v3 }
 0x3bb   : > { %v1629_v52 = vrot.slane %v1621_v45, %v6888_v8  ;;  %v1636_v54 = vrot.slane %v1622_v48, %v6888_v8  ;;  %v1654_v56 = vrot.slane %v1605_v49, %v6884_v3 }
 0x3bc   : > { %v1888_v57 = vrot.slane %v1881_v47, %v6884_v3  ;;  %v1906_v59 = vcombine.low %v1855_v46, %v1871_v50  ;;  %v1905_v2 = vrot.slane %v1898_v51, %v6884_v3 }
 0x3bd   : > { %v1637_v60 = vcombine.high %v1629_v52, %v6384_v17  ;;  %v1638_v61 = vcombine.high %v1636_v54, %v6384_v17  ;;  %v1655_v62 = vcombine.low %v1646_v53, %v1654_v56  ;;  %v1656_v63 = vcombine.high %v1646_v53, %v1654_v56 }
 0x3be   : > { %v1889_v0 = vcombine.low %v1880_v58, %v1888_v57  ;;  %v1913_v5 = vrot.slane %v1906_v59, %v6884_v3  ;;  %v1677_v6 = vshrl.u32 %v1629_v52, 16  ;;  %v1693_v11 = vshrl.u32 %v1636_v54, 16 }
 0x3bf   : > { %v1663_v7 = vrot.slane %v1655_v62, %v6888_v8  ;;  %v1670_v9 = vrot.slane %v1656_v63, %v6888_v8  ;;  %v1685_v10 = vshrl.u32 %v1637_v60, 16  ;;  %v1701_v12 = vshrl.u32 %v1638_v61, 16 }
 0x3c0   : > { %v1914_v13 = vcombine.low %v1905_v2, %v1913_v5  ;;  %v1896_v21 = vrot.slane %v1889_v0, %v6888_v8 }
 0x3c1   : > { %v1671_v14 = vcombine.high %v1663_v7, %v6384_v17  ;;  %v1672_v15 = vcombine.high %v1670_v9, %v6384_v17  ;;  %v1675_v16 = vpack.i.b16 %v1663_v7, %v1629_v52  ;;  %v1678_v18 = vshrl.u32 %v1663_v7, 16  ;;  %v1227_v7 = vld [vmem:[%s6809_s9] sm:$0xf]  ;;  %s1216_s9 = scalar_lea.vmem %s7465_s19, %s6992_s27  ;;  %s7473_s27 = smov %s7472_s22 }
 0x3c2   : > { %v1691_v19 = vpack.i.b16 %v1670_v9, %v1636_v54  ;;  %v1694_v20 = vshrl.u32 %v1670_v9, 16  ;;  %v1921_v22 = vrot.slane %v1914_v13, %v6888_v8  ;;  %v1926_v44 = vshrl.u32 %v1896_v21, 16  ;;  %s6385_s19 = smov [#allocation23]  }
 0x3c3   : > { %v1679_v23 = vpack.i.b16 %v1678_v18, %v1677_v6  ;;  %v1683_v24 = vpack.i.b16 %v1671_v14, %v1637_v60  ;;  %v1686_v25 = vshrl.u32 %v1671_v14, 16  ;;  %v1699_v26 = vpack.i.b16 %v1672_v15, %v1638_v61 }
 0x3c4   : > { %v1695_v27 = vpack.i.b16 %v1694_v20, %v1693_v11  ;;  %v1702_v28 = vshrl.u32 %v1672_v15, 16  ;;  %v1705_v29 = vcombine.low %v1675_v16, %v1691_v19  ;;  %v1925_v30 = vpack.i.b16 %v1921_v22, %v1896_v21 }
 0x3c5   : > { %v1687_v31 = vpack.i.b16 %v1686_v25, %v1685_v10  ;;  %v1713_v32 = vcombine.low %v1683_v24, %v1699_v26  ;;  %v1927_v42 = vshrl.u32 %v1921_v22, 16  ;;  %v1922_v50 = vcombine.high %v1921_v22, %v6384_v17 }
 0x3c6   : > { %v1703_v33 = vpack.i.b16 %v1702_v28, %v1701_v12  ;;  %v1730_v34 = vcombine.low %v1679_v23, %v1695_v27  ;;  %v2108_v35 = vsel %vm2103_vm1, %v1925_v30, 0  ;;  %v1712_v37 = vrot.slane %v1705_v29, %v6884_v3 }
 0x3c7   : > { %v1720_v36 = vrot.slane %v1713_v32, %v6884_v3  ;;  %5357 = vmatpush3.bf16.xpose.msra.mxu1 %v2108_v35  ;;  %v1928_v47 = vpack.i.b16 %v1927_v42, %v1926_v44  ;;  %v1897_v52 = vcombine.high %v1896_v21, %v6384_v17  ;;  %v1933_v58 = vshrl.u32 %v1922_v50, 16 }
 0x3c8   : > { %v1738_v38 = vcombine.low %v1687_v31, %v1703_v33  ;;  %5362 = vmatprep.subr.bf16.mxu1 %v6377_v4  ;;  %v1737_v40 = vrot.slane %v1730_v34, %v6884_v3  ;;  %vm1228_vm2 = vcmp.gt.bf16.partialorder %v1227_v7, 0 }
 0x3c9   : > { %v1721_v39 = vcombine.low %v1712_v37, %v1720_v36  ;;  %v2154_v49 = vsel %vm2103_vm1, %v1928_v47, 0  ;;  %v1931_v54 = vpack.i.b16 %v1922_v50, %v1897_v52  ;;  %v1932_v60 = vshrl.u32 %v1897_v52, 16  ;;  %v5055_v37 = vld [vmem:[%s7456_s16] ss:$0 sm:$0xff]  ;;  %s7471_s16 = sld [smem:[#allocation53_spill]] }
 0x3ca   : > { %v1745_v41 = vrot.slane %v1738_v38, %v6884_v3  ;;  %v2288_v9 = vsel %vm1228_vm2, 65537, %v6384_v17  ;;  %v1593_v38 = vadd.f32 %v5055_v37, %v6879_v55 }
 0x3cb   : > { %v1728_v45 = vrot.slane %v1721_v39, %v6888_v8  ;;  %v2200_v57 = vsel %vm2103_vm1, %v1931_v54, 0  ;;  %v1934_v62 = vpack.i.b16 %v1933_v58, %v1932_v60  ;;  %v2289_v10 = vunpack.c.l.b16 %v2288_v9 }
 0x3cc   : > { %v1746_v43 = vcombine.low %v1737_v40, %v1745_v41  ;;  %v1598_v39 = vpack.c.bf16 %v1593_v38, %v1593_v38 }
 0x3cd   : > { %v1758_v53 = vshrl.u32 %v1728_v45, 16  ;;  %v1729_v61 = vcombine.high %v1728_v45, %v6384_v17  ;;  %v2246_v0 = vsel %vm2103_vm1, %v1934_v62, 0  ;;  %vm6951_vm3 = vcmp.ne.s32.totalorder %v2289_v10, 0 }
 0x3ce   : > { %v1753_v46 = vrot.slane %v1746_v43, %v6888_v8  ;;  %v1948_v10 = vrot.slane %v1598_v39, %v6884_v3 }
 0x3cf   : > { %v1764_v5 = vshrl.u32 %v1729_v61, 16 }
 0x3d0   : > { %v1757_v48 = vpack.i.b16 %v1753_v46, %v1728_v45  ;;  %v1759_v51 = vshrl.u32 %v1753_v46, 16  ;;  %v1754_v59 = vcombine.high %v1753_v46, %v6384_v17 }
 0x3d2   : > { %5359 = vmatmul.mubr.msk.bf16.vlgmr.msra.gmra.mxu1 %vm2103_vm1, %v1757_v48  ;;  %v1760_v56 = vpack.i.b16 %v1759_v51, %v1758_v53  ;;  %v1763_v63 = vpack.i.b16 %v1754_v59, %v1729_v61  ;;  %v1765_v2 = vshrl.u32 %v1754_v59, 16 }
 0x3d3   : > { %5363 = vmatpush3.bf16.xpose.msra.mxu1 %v2154_v49  ;;  %5364 = vmatprep.mubr.msk.bf16.mxu1 %vm6378_vm0, %v6377_v4 }
 0x3d4   : > { %5368 = vmatprep.subr.bf16.mxu1 %v6377_v4  ;;  %v1766_v6 = vpack.i.b16 %v1765_v2, %v1764_v5 }
 0x3da   : > { %5365 = vmatmul.mubr.msk.bf16.vlgmr.msra.gmra.mxu1 %vm2103_vm1, %v1760_v56 }
 0x3db   : > { %5369 = vmatpush3.bf16.xpose.msra.mxu1 %v2200_v57  ;;  %5370 = vmatprep.mubr.msk.bf16.mxu1 %vm6378_vm0, %v6377_v4 }
 0x3dc   : > { %5374 = vmatprep.subr.bf16.mxu1 %v6377_v4 }
 0x3e2   : > { %5371 = vmatmul.mubr.msk.bf16.vlgmr.msra.gmra.mxu1 %vm2103_vm1, %v1763_v63 }
 0x3e3   : > { %5375 = vmatpush3.bf16.xpose.msra.mxu1 %v2246_v0  ;;  %5376 = vmatprep.mubr.msk.bf16.mxu1 %vm6378_vm0, %v6377_v4 }
 0x3e4   : > { %5380 = vmatprep.subr.bf16.mxu1 %v6377_v4 }
 0x3ea   : > { %5377 = vmatmul.mubr.msk.bf16.vlgmr.msra.gmra.mxu1 %vm2103_vm1, %v1766_v6 }
 0x3eb   : > { %5382 = vmatprep.mubr.msk.bf16.mxu1 %vm6378_vm0, %v6377_v4 }
 0x492   : > { %v2144_v12 = vpop.f32.mrf.mxu1 }
 0x493   : > { %v2293_v13 = vsel %vm6951_vm3, %v2144_v12, -1e+30 }
 0x494   : > { %v5360_v14 = vpop.f32.mrf.mxu1  ;;  %v2298_v15 = vsel %vm2297_vm4, %v2293_v13, -inf }
 0x495   : > { %2299 = vmax.xlane.f32.xlu1 %v2298_v15 }
 0x496   : > { %v2147_v16 = vpop.f32.mrf.mxu1 }
 0x498   : > { %v5361_v18 = vpop.f32.mrf.mxu1 }
 0x49a   : > { %v2190_v19 = vpop.f32.mrf.mxu1 }
 0x49b   : > { %v2294_v20 = vsel %vm6951_vm3, %v2190_v19, -1e+30 }
 0x49c   : > { %v5366_v21 = vpop.f32.mrf.mxu1  ;;  %v2301_v22 = vsel %vm2297_vm4, %v2294_v20, -inf }
 0x49d   : > { %2302 = vmax.xlane.f32.xlu0 %v2301_v22 }
 0x49e   : > { %v2193_v23 = vpop.f32.mrf.mxu1 }
 0x4a0   : > { %v5367_v24 = vpop.f32.mrf.mxu1 }
 0x4a2   : > { %v2236_v25 = vpop.f32.mrf.mxu1 }
 0x4a3   : > { %v2295_v26 = vsel %vm6951_vm3, %v2236_v25, -1e+30  ;;  %v1231_v25 = vld [vmem:[%s1220_s12] sm:$0xf]  ;;  %s5167_s12 = sshll.u32 %s6572_s2, 7 }
 0x4a4   : > { %v5372_v27 = vpop.f32.mrf.mxu1  ;;  %v2304_v28 = vsel %vm2297_vm4, %v2295_v26, -inf  ;;  %vm1232_vm5 = vcmp.gt.bf16.partialorder %v1231_v25, 0 }
 0x4a5   : > { %2305 = vmax.xlane.f32.xlu1 %v2304_v28 }
 0x4a6   : > { %v2239_v29 = vpop.f32.mrf.mxu1 }
 0x4a8   : > { %v5373_v30 = vpop.f32.mrf.mxu1 }
 0x4aa   : > { %v2282_v31 = vpop.f32.mrf.mxu1 }
 0x4ab   : > { %v2296_v32 = vsel %vm6951_vm3, %v2282_v31, -1e+30 }
 0x4ac   : > { %v5378_v33 = vpop.f32.mrf.mxu1  ;;  %v2307_v34 = vsel %vm2297_vm4, %v2296_v32, -inf }
 0x4ad   : > { %2308 = vmax.xlane.f32.xlu1 %v2307_v34 }
 0x4ae   : > { %v2285_v35 = vpop.f32.mrf.mxu1 }
 0x4b0   : > { %v5379_v36 = vpop.f32.mrf.mxu1 }
 0x4be   : > { %1936 = vrot.lane.b32.xlu1 %v1598_v39, %s6380_s15 }
 0x4c2   : > { %1940 = vrot.lane.b32.xlu1 %v1598_v39, %s6379_s10 }
 0x51e   : > { %v2300_v40 = vpop.xlane.xlu1 %2299 }
 0x51f   : > { %v2310_v41 = vsub.f32 %v2293_v13, %v2300_v40 }
 0x521   : > { %v2314_v42 = vmul.f32 1.442695, %v2310_v41 }
 0x523   : > { %5858 = vpow2.f32 %v2314_v42 }
 0x526   : > { %v2303_v43 = vpop.xlane.xlu0 %2302 }
 0x527   : > { %v2311_v44 = vsub.f32 %v2294_v20, %v2303_v43 }
 0x529   : > { %v2316_v45 = vmul.f32 1.442695, %v2311_v44  ;;  %v2342_v44 = vsel %vm1232_vm5, 65537, %v6384_v17 }
 0x52b   : > { %5860 = vpow2.f32 %v2316_v45 }
 0x52e   : > { %v2306_v49 = vpop.xlane.xlu1 %2305 }
 0x52f   : > { %v2312_v50 = vsub.f32 %v2295_v26, %v2306_v49 }
 0x530   : > { %v6971_v46 = vpop.eup %5858 }
 0x531   : > { %v2322_v47 = vsel %vm2297_vm4, %v6971_v46, 0.0  ;;  %v2318_v52 = vmul.f32 1.442695, %v2312_v50 }
 0x532   : > { %2323 = vadd.xlane.f32.xlu0 %v2322_v47 }
 0x533   : > { %5862 = vpow2.f32 %v2318_v52 }
 0x536   : > { %v2309_v51 = vpop.xlane.xlu1 %2308 }
 0x537   : > { %v2313_v53 = vsub.f32 %v2296_v32, %v2309_v51  ;;  %v2343_v51 = vunpack.c.l.b16 %v2342_v44 }
 0x538   : > { %v6975_v55 = vpop.eup %5860 }
 0x539   : > { %v2325_v48 = vsel %vm2297_vm4, %v6975_v55, 0.0  ;;  %v2320_v54 = vmul.f32 1.442695, %v2313_v53  ;;  %vm7014_vm6 = vcmp.ne.s32.totalorder %v2343_v51, 0 }
 0x53a   : > { %2326 = vadd.xlane.f32.xlu1 %v2325_v48  ;;  %v1937_v60 = vpop.permute.xlu1 %1936 }
 0x53b   : > { %5864 = vpow2.f32 %v2320_v54  ;;  %v1982_v63 = vrot.slane %v1937_v60, %v6884_v3 }
 0x53e   : > { %v1941_v61 = vpop.permute.xlu1 %1940 }
 0x53f   : > { %v1990_v62 = vrot.slane %v1941_v61, %v6884_v3 }
 0x540   : > { %v6980_v56 = vpop.eup %5862 }
 0x541   : > { %v2328_v57 = vsel %vm2297_vm4, %v6980_v56, 0.0  ;;  %v1991_v0 = vcombine.low %v1982_v63, %v1990_v62  ;;  %v1992_v2 = vcombine.high %v1982_v63, %v1990_v62 }
 0x543   : > { %v1999_v6 = vrot.slane %v1991_v0, %v6888_v8  ;;  %v2006_v7 = vrot.slane %v1992_v2, %v6888_v8 }
 0x545   : > { %v2007_v14 = vcombine.high %v1999_v6, %v6384_v17  ;;  %v2008_v15 = vcombine.high %v2006_v7, %v6384_v17  ;;  %v2014_v19 = vshrl.u32 %v1999_v6, 16  ;;  %v2030_v20 = vshrl.u32 %v2006_v7, 16 }
 0x547   : > { %v2022_v26 = vshrl.u32 %v2007_v14, 16  ;;  %v2038_v27 = vshrl.u32 %v2008_v15, 16 }
 0x548   : > { %1938 = vrot.lane.b32.xlu0 %v1598_v39, %s6381_s24  ;;  %v6984_v58 = vpop.eup %5864 }
 0x549   : > { %v2331_v59 = vsel %vm2297_vm4, %v6984_v58, 0.0 }
 0x567   : > { %2329 = vadd.xlane.f32.xlu0 %v2328_v57 }
 0x56b   : > { %2332 = vadd.xlane.f32.xlu0 %v2331_v59 }
 0x5bb   : > { %v2324_v5 = vpop.xlane.xlu0 %2323 }
 0x5bc   : > { %5866 = vrcp.f32 %v2324_v5 }
 0x5bf   : > { %v1939_v9 = vpop.permute.xlu0 %1938 }
 0x5c0   : > { %v1956_v11 = vrot.slane %v1939_v9, %v6884_v3 }
 0x5c2   : > { %v1957_v12 = vcombine.low %v1948_v10, %v1956_v11  ;;  %v1958_v13 = vcombine.high %v1948_v10, %v1956_v11 }
 0x5c3   : > { %v2327_v30 = vpop.xlane.xlu1 %2326 }
 0x5c4   : > { %v1965_v16 = vrot.slane %v1957_v12, %v6888_v8  ;;  %v1972_v18 = vrot.slane %v1958_v13, %v6888_v8  ;;  %5868 = vrcp.f32 %v2327_v30  ;;  %v5779_v30 = vld [vmem:[#allocation13 + $0x20] sm:$0xff]  }
 0x5c6   : > { %v1973_v21 = vcombine.high %v1965_v16, %v6384_v17  ;;  %v1974_v22 = vcombine.high %v1972_v18, %v6384_v17  ;;  %v2011_v23 = vpack.i.b16 %v1999_v6, %v1965_v16  ;;  %v2013_v24 = vshrl.u32 %v1965_v16, 16 }
 0x5c7   : > { %v2027_v28 = vpack.i.b16 %v2006_v7, %v1972_v18  ;;  %v2029_v29 = vshrl.u32 %v1972_v18, 16 }
 0x5c8   : > { %v2015_v31 = vpack.i.b16 %v2014_v19, %v2013_v24  ;;  %v2019_v32 = vpack.i.b16 %v2007_v14, %v1973_v21  ;;  %v2021_v33 = vshrl.u32 %v1973_v21, 16  ;;  %v2035_v34 = vpack.i.b16 %v2008_v15, %v1974_v22 }
 0x5c9   : > { %v2031_v35 = vpack.i.b16 %v2030_v20, %v2029_v29  ;;  %v2037_v36 = vshrl.u32 %v1974_v22, 16  ;;  %v2041_v37 = vcombine.low %v2011_v23, %v2027_v28  ;;  %v5867_v48 = vpop.eup %5866  ;;  %v5777_v28 = vld [vmem:[#allocation13 + $0x30] sm:$0xff]   ;;  %v5778_v29 = vld [vmem:[#allocation13 + $0x28] sm:$0xff]  }
 0x5ca   : > { %v2023_v38 = vpack.i.b16 %v2022_v26, %v2021_v33  ;;  %v2049_v39 = vcombine.low %v2019_v32, %v2035_v34  ;;  %v2338_v54 = vmul.f32 %v5867_v48, %v6971_v46  ;;  %v5781_v32 = vld [vmem:[#allocation13 + $0x10] sm:$0xff]  }
 0x5cb   : > { %v2039_v40 = vpack.i.b16 %v2038_v27, %v2037_v36  ;;  %v2066_v41 = vcombine.low %v2015_v31, %v2031_v35  ;;  %v2048_v42 = vrot.slane %v2041_v37, %v6884_v3  ;;  %v5780_v31 = vld [vmem:[#allocation13 + $0x18] sm:$0xff]  }
 0x5cc   : > { %v2056_v43 = vrot.slane %v2049_v39, %v6884_v3  ;;  %v2347_v63 = vsel %vm7014_vm6, %v2338_v54, 0.0 }
 0x5cd   : > { %v2074_v45 = vcombine.low %v2023_v38, %v2039_v40  ;;  %v2073_v49 = vrot.slane %v2066_v41, %v6884_v3  ;;  %v2351_v6 = vpack.c.bf16 %v2347_v63, %v2347_v63 }
 0x5ce   : > { %v2057_v47 = vcombine.low %v2048_v42, %v2056_v43 }
 0x5cf   : > { %v2081_v50 = vrot.slane %v2074_v45, %v6884_v3 }
 0x5d0   : > { %v2064_v52 = vrot.slane %v2057_v47, %v6888_v8 }
 0x5d1   : > { %v2082_v53 = vcombine.low %v2073_v49, %v2081_v50  ;;  %v5869_v0 = vpop.eup %5868 }
 0x5d2   : > { %v2094_v61 = vshrl.u32 %v2064_v52, 16  ;;  %v2339_v46 = vmul.f32 %v5869_v0, %v6975_v55  ;;  %v2065_v10 = vcombine.high %v2064_v52, %v6384_v17 }
 0x5d3   : > { %v2089_v57 = vrot.slane %v2082_v53, %v6888_v8 }
 0x5d4   : > { %v2348_v11 = vsel %vm7014_vm6, %v2339_v46, 0.0  ;;  %v2100_v19 = vshrl.u32 %v2065_v10, 16 }
 0x5d5   : > { %v2093_v60 = vpack.i.b16 %v2089_v57, %v2064_v52  ;;  %v2095_v62 = vshrl.u32 %v2089_v57, 16  ;;  %v2090_v9 = vcombine.high %v2089_v57, %v6384_v17  ;;  %v2352_v13 = vpack.c.bf16 %v2348_v11, %v2348_v11 }
 0x5d7   : > { %v2360_v2 = vsel %vm2358_vm7, %v2093_v60, 0  ;;  %v2096_v5 = vpack.i.b16 %v2095_v62, %v2094_v61  ;;  %v2099_v12 = vpack.i.b16 %v2090_v9, %v2065_v10  ;;  %v2101_v16 = vshrl.u32 %v2090_v9, 16 }
 0x5d8   : > { %5381 = vmatpush3.bf16.msra.mxu1 %v2360_v2  ;;  %v5782_v2 = vld [vmem:[#allocation13 + $0x8] sm:$0xff]  }
 0x5d9   : > { %5386 = vmatprep.subr.bf16.mxu1 %v6377_v4  ;;  %v2406_v7 = vsel %vm2358_vm7, %v2096_v5, 0  ;;  %v2452_v55 = vsel %vm2358_vm7, %v2099_v12, 0  ;;  %v2102_v21 = vpack.i.b16 %v2101_v16, %v2100_v19  ;;  %v5783_v16 = vld [vmem:[#allocation13] sm:$0xff]  }
 0x5db   : > { %5383 = vmatmul.mubr.msk.bf16.vlgmr.msra.gmra.mxu1 %vm2297_vm4, %v2351_v6  ;;  %v2498_v26 = vsel %vm2358_vm7, %v2102_v21, 0 }
 0x5dc   : > { %5387 = vmatpush3.bf16.msra.mxu1 %v2406_v7  ;;  %5388 = vmatprep.mubr.msk.bf16.mxu1 %vm6378_vm0, %v6377_v4 }
 0x5dd   : > { %5392 = vmatprep.subr.bf16.mxu1 %v6377_v4 }
 0x5e3   : > { %5389 = vmatmul.mubr.msk.bf16.vlgmr.msra.gmra.mxu1 %vm2297_vm4, %v2352_v13 }
 0x5e4   : > { %5393 = vmatpush3.bf16.msra.mxu1 %v2452_v55  ;;  %5394 = vmatprep.mubr.msk.bf16.mxu1 %vm6378_vm0, %v6377_v4 }
 0x5e5   : > { %5398 = vmatprep.subr.bf16.mxu1 %v6377_v4 }
 0x5f0   : > { %v2330_v14 = vpop.xlane.xlu0 %2329 }
 0x5f1   : > { %5870 = vrcp.f32 %v2330_v14 }
 0x5f4   : > { %v2333_v15 = vpop.xlane.xlu0 %2332 }
 0x5f5   : > { %5872 = vrcp.f32 %v2333_v15 }
 0x5fe   : > { %v5871_v18 = vpop.eup %5870 }
 0x5ff   : > { %v2340_v20 = vmul.f32 %v5871_v18, %v6980_v56 }
 0x601   : > { %v2349_v22 = vsel %vm7014_vm6, %v2340_v20, 0.0 }
 0x602   : > { %v5873_v23 = vpop.eup %5872  ;;  %v2353_v24 = vpack.c.bf16 %v2349_v22, %v2349_v22 }
 0x603   : > { %v2341_v25 = vmul.f32 %v5873_v23, %v6984_v58  ;;  %v5776_v58 = vld [vmem:[#allocation13 + $0x38] sm:$0xff]  }
 0x604   : > { %5395 = vmatmul.mubr.msk.bf16.vlgmr.msra.gmra.mxu1 %vm2297_vm4, %v2353_v24  ;;  %5405 = vmatpush3.bf16.msra.mxu0 %v5776_v58 }
 0x605   : > { %5399 = vmatpush3.bf16.msra.mxu1 %v2498_v26  ;;  %5400 = vmatprep.mubr.msk.bf16.mxu1 %vm6378_vm0, %v6377_v4  ;;  %v2350_v56 = vsel %vm7014_vm6, %v2341_v25, 0.0 }
 0x606   : > { %5424 = vmatprep.subr.bf16.mxu1 %v6377_v4  ;;  %v2354_v27 = vpack.c.bf16 %v2350_v56, %v2350_v56  ;;  %5406 = vmatprep.subr.bf16.mxu0 %v6377_v4 }
 0x608   : > { %5407 = vmatpush3.bf16.msra.mxu0 %v5777_v28 }
 0x609   : > { %5408 = vmatprep.subr.bf16.mxu0 %v6377_v4 }
 0x60c   : > { %5401 = vmatmul.mubr.msk.bf16.vlgmr.msra.gmra.mxu1 %vm2297_vm4, %v2354_v27  ;;  %5409 = vmatpush3.bf16.msra.mxu0 %v5778_v29 }
 0x60d   : > { %5440 = vmatprep.mubr.msk.bf16.mxu1 %vm6378_vm0, %v6377_v4  ;;  %5410 = vmatprep.subr.bf16.mxu0 %v6377_v4 }
 0x610   : > { %5411 = vmatpush3.bf16.msra.mxu0 %v5779_v30 }
 0x611   : > { %5412 = vmatprep.subr.bf16.mxu0 %v6377_v4 }
 0x614   : > { %5413 = vmatpush3.bf16.msra.mxu0 %v5780_v31 }
 0x615   : > { %5414 = vmatprep.subr.bf16.mxu0 %v6377_v4 }
 0x618   : > { %5415 = vmatpush3.bf16.msra.mxu0 %v5781_v32 }
 0x619   : > { %5416 = vmatprep.subr.bf16.mxu0 %v6377_v4 }
 0x61c   : > { %5417 = vmatpush3.bf16.msra.mxu0 %v5782_v2  ;;  %v5796_v2 = vld [vmem:[#allocation14 + $0x18] sm:$0xff]  }
 0x61d   : > { %5418 = vmatprep.subr.bf16.mxu0 %v6377_v4 }
 0x620   : > { %5419 = vmatpush3.bf16.msra.mxu0 %v5783_v16 }
 0x621   : > { %5444 = vmatprep.subr.bf16.mxu0 %v6377_v4 }
 0x69b   : > { %v2396_v33 = vpop.f32.mrf.mxu1 }
 0x69d   : > { %v5384_v34 = vpop.f32.mrf.mxu1 }
 0x69f   : > { %v2399_v35 = vpop.f32.mrf.mxu1 }
 0x6a0   : > { %v5074_v35 = vld [vmem:[%s7460_s18] ss:$0 sm:$0xff]  ;;  %s1213_s18 = scalar_lea.vmem [#allocation23], %s6794_s8 }
 0x6a1   : > { %v5385_v36 = vpop.f32.mrf.mxu1 }
 0x6a3   : > { %v2442_v37 = vpop.f32.mrf.mxu1 }
 0x6a5   : > { %v5390_v38 = vpop.f32.mrf.mxu1 }
 0x6a7   : > { %v2445_v39 = vpop.f32.mrf.mxu1 }
 0x6a8   : > { %v5894_v39 = vld [vmem:[%s1060_s1] sm:$0xff]  ;;  %s7461_s1 = sld [smem:[#allocation45_spill]] }
 0x6a9   : > { %v5391_v40 = vpop.f32.mrf.mxu1 }
 0x6c4   : > { %v2488_v41 = vpop.f32.mrf.mxu1 }
 0x6c5   : > { %v2540_v45 = vcombine.low %v2396_v33, %v2488_v41  ;;  %v2541_v47 = vcombine.high %v2396_v33, %v2488_v41 }
 0x6c6   : > { %v5396_v42 = vpop.f32.mrf.mxu1 }
 0x6c7   : > { %v2548_v52 = vrot.slane %v2540_v45, %v6884_v3  ;;  %v2555_v53 = vrot.slane %v2541_v47, %v6884_v3  ;;  %v5792_v45 = vld [vmem:[#allocation14 + $0x38] sm:$0xff]   ;;  %v5793_v47 = vld [vmem:[#allocation14 + $0x30] sm:$0xff]  }
 0x6c8   : > { %v2491_v43 = vpop.f32.mrf.mxu1  ;;  %5425 = vmatpush3.bf16.msra.mxu1 %v5792_v45 }
 0x6c9   : > { %v5784_v43 = vld [vmem:[#allocation16 + $0x38] sm:$0xff]   ;;  %5426 = vmatprep.subr.bf16.mxu1 %v6377_v4 }
 0x6ca   : > { %v5397_v44 = vpop.f32.mrf.mxu1 }
 0x6cb   : > { %v5785_v44 = vld [vmem:[#allocation16 + $0x30] sm:$0xff]  }
 0x6cc   : > { %v2534_v48 = vpop.f32.mrf.mxu1  ;;  %5427 = vmatpush3.bf16.msra.mxu1 %v5793_v47 }
 0x6cd   : > { %v2556_v49 = vcombine.low %v2442_v37, %v2534_v48  ;;  %v2557_v50 = vcombine.high %v2442_v37, %v2534_v48  ;;  %v5786_v48 = vld [vmem:[#allocation16 + $0x28] sm:$0xff]   ;;  %5428 = vmatprep.subr.bf16.mxu1 %v6377_v4 }
 0x6ce   : > { %v5402_v51 = vpop.f32.mrf.mxu1 }
 0x6cf   : > { %v2564_v54 = vrot.slane %v2556_v49, %v6884_v3  ;;  %v2571_v57 = vrot.slane %v2557_v50, %v6884_v3  ;;  %v5787_v49 = vld [vmem:[#allocation16 + $0x20] sm:$0xff]   ;;  %v5788_v50 = vld [vmem:[#allocation16 + $0x18] sm:$0xff]   ;;  %v5789_v51 = vld [vmem:[#allocation16 + $0x10] sm:$0xff]  }
 0x6d0   : > { %v2537_v59 = vpop.f32.mrf.mxu1 }
 0x6d1   : > { %v2572_v60 = vcombine.low %v2548_v52, %v2564_v54  ;;  %v2573_v61 = vcombine.high %v2548_v52, %v2564_v54  ;;  %v2588_v62 = vcombine.low %v2555_v53, %v2571_v57  ;;  %v2589_v63 = vcombine.high %v2555_v53, %v2571_v57  ;;  %v5790_v52 = vld [vmem:[#allocation16 + $0x8] sm:$0xff]   ;;  %v5791_v53 = vld [vmem:[#allocation16] sm:$0xff]  }
 0x6d2   : > { %v5403_v0 = vpop.f32.mrf.mxu1  ;;  %v1225_v54 = vld [vmem:[%s1069_s7] sm:$0xff]  ;;  %s7464_s7 = sld [smem:[#allocation44_spill]] }
 0x6d3   : > { %v2580_v5 = vrot.slane %v2572_v60, %v6888_v8  ;;  %v2587_v6 = vrot.slane %v2573_v61, %v6888_v8  ;;  %v2596_v46 = vrot.slane %v2588_v62, %v6888_v8  ;;  %v2603_v7 = vrot.slane %v2589_v63, %v6888_v8  ;;  %v5794_v63 = vld [vmem:[#allocation14 + $0x28] sm:$0xff]   ;;  %v5795_v0 = vld [vmem:[#allocation14 + $0x20] sm:$0xff]  }
 0x6d4   : > { %v7100_v57 = vpack.c.bf16 %v1225_v54, %v1225_v54  ;;  %5429 = vmatpush3.bf16.msra.mxu1 %v5794_v63 }
 0x6d5   : > { %v2608_v9 = vcombine.low %v2580_v5, %v2587_v6  ;;  %v5072_v10 = vcombine.high %v2580_v5, %v2587_v6  ;;  %v2624_v11 = vcombine.low %v2596_v46, %v2603_v7  ;;  %v5073_v12 = vcombine.high %v2596_v46, %v2603_v7  ;;  %5430 = vmatprep.subr.bf16.mxu1 %v6377_v4  ;;  %v5797_v5 = vld [vmem:[#allocation14 + $0x10] sm:$0xff]   ;;  %v5798_v6 = vld [vmem:[#allocation14 + $0x8] sm:$0xff]   ;;  %v5799_v46 = vld [vmem:[#allocation14] sm:$0xff]  }
 0x6d6   : > { %v5094_v7 = vld [vmem:[%s7461_s1] ss:$0 sm:$0xff]  ;;  %s4740_s1 = sshll.u32 %s1213_s18, 4  ;;  %s4741_s1 = int_to_ptr.vmem [resolvable:$true] %s4740_s1 }
 0x6d7   : > { %v2615_v13 = vrot.slane %v2608_v9, %v6884_v3  ;;  %v2623_v55 = vrot.slane %v5072_v10, %v6884_v3  ;;  %v2631_v14 = vrot.slane %v2624_v11, %v6884_v3  ;;  %v2639_v15 = vrot.slane %v5073_v12, %v6884_v3 }
 0x6d8   : > { %5431 = vmatpush3.bf16.msra.mxu1 %v5795_v0 }
 0x6d9   : > { %v2641_v18 = vcombine.high %v2615_v13, %v2623_v55  ;;  %v2657_v19 = vcombine.high %v2631_v14, %v2639_v15  ;;  %v2640_v20 = vcombine.low %v2615_v13, %v2623_v55  ;;  %v2656_v21 = vcombine.low %v2631_v14, %v2639_v15  ;;  %5432 = vmatprep.subr.bf16.mxu1 %v6377_v4 }
 0x6db   : > { %v2655_v22 = vrot.slane %v2641_v18, %v6888_v8  ;;  %v2671_v23 = vrot.slane %v2657_v19, %v6888_v8  ;;  %v2648_v24 = vrot.slane %v2640_v20, %v6888_v8  ;;  %v2664_v25 = vrot.slane %v2656_v21, %v6888_v8  ;;  %v5083_v19 = vld [vmem:[%s7462_s4] ss:$0 sm:$0xff]  ;;  %s4738_s4 = scalar_lea.hbm %s7472_s22, %s5167_s12 }
 0x6dc   : > { %5433 = vmatpush3.bf16.msra.mxu1 %v5796_v2  ;;  %v5084_v21 = vld [vmem:[%s7463_s26] ss:$0 sm:$0xff]  ;;  %s4727_s26 = scalar_lea.sflag [#allocation4], %s6791_s11 }
 0x6dd   : > { %v2674_v26 = vcombine.low %v2655_v22, %v2671_v23  ;;  %v2673_v56 = vcombine.high %v2648_v24, %v2664_v25  ;;  %v2672_v27 = vcombine.low %v2648_v24, %v2664_v25  ;;  %v2675_v58 = vcombine.high %v2655_v22, %v2671_v23  ;;  %5434 = vmatprep.subr.bf16.mxu1 %v6377_v4  ;;  %v5800_v24 = vld [vmem:[#allocation17 + $0x38] sm:$0xff]  }
 0x6df   : > { %2681 = vrot.lane.b32.xlu0 %v2674_v26, %s6381_s24  ;;  %2677 = vrot.lane.b32.xlu1 %v2673_v56, %s6379_s10  ;;  %v5801_v26 = vld [vmem:[#allocation17 + $0x30] sm:$0xff]   ;;  %v5802_v56 = vld [vmem:[#allocation17 + $0x28] sm:$0xff]  }
 0x6e0   : > { %5435 = vmatpush3.bf16.msra.mxu1 %v5797_v5 }
 0x6e1   : > { %5436 = vmatprep.subr.bf16.mxu1 %v6377_v4 }
 0x6e3   : > { %2685 = vrot.lane.b32.xlu1 %v2675_v58, %s6380_s15 }
 0x6e4   : > { %5437 = vmatpush3.bf16.msra.mxu1 %v5798_v6 }
 0x6e5   : > { %5438 = vmatprep.subr.bf16.mxu1 %v6377_v4 }
 0x6e8   : > { %5439 = vmatpush3.bf16.msra.mxu1 %v5799_v46 }
 0x6e9   : > { %5464 = vmatprep.subr.bf16.mxu1 %v6377_v4 }
 0x751   : > { %v2678_v28 = vpop.permute.xlu1 %2677  ;;  %v2682_v29 = vpop.permute.xlu0 %2681 }
 0x752   : > { %v2688_v30 = vsel %vm2103_vm1, %v2672_v27, %v2678_v28  ;;  %v5803_v27 = vld [vmem:[#allocation17 + $0x20] sm:$0xff]  }
 0x753   : > { %v2690_v32 = vsel %vm2689_vm8, %v2688_v30, %v2682_v29 }
 0x755   : > { %v2686_v31 = vpop.permute.xlu1 %2685 }
 0x756   : > { %v2692_v33 = vsel %vm2691_vm9, %v2690_v32, %v2686_v31 }
 0x757   : > { %v2693_v34 = vpack.c.bf16 %v2692_v33, %v2692_v33 }
 0x759   : > { %5421 = vmatmul.mubr.bf16.vlgmr.msra.gmra.mxu0 %v2693_v34 }
 0x75a   : > { %5460 = vmatprep.mubr.msk.bf16.mxu0 %vm6378_vm0, %v6377_v4  ;;  %5445 = vmatpush3.bf16.msra.mxu0 %v5784_v43 }
 0x75b   : > { %5446 = vmatprep.subr.bf16.mxu0 %v6377_v4 }
 0x75e   : > { %5447 = vmatpush3.bf16.msra.mxu0 %v5785_v44 }
 0x75f   : > { %5448 = vmatprep.subr.bf16.mxu0 %v6377_v4 }
 0x762   : > { %5449 = vmatpush3.bf16.msra.mxu0 %v5786_v48 }
 0x763   : > { %5450 = vmatprep.subr.bf16.mxu0 %v6377_v4 }
 0x766   : > { %5451 = vmatpush3.bf16.msra.mxu0 %v5787_v49 }
 0x767   : > { %5452 = vmatprep.subr.bf16.mxu0 %v6377_v4 }
 0x76a   : > { %5453 = vmatpush3.bf16.msra.mxu0 %v5788_v50 }
 0x76b   : > { %5454 = vmatprep.subr.bf16.mxu0 %v6377_v4 }
 0x76e   : > { %5455 = vmatpush3.bf16.msra.mxu0 %v5789_v51 }
 0x76f   : > { %5456 = vmatprep.subr.bf16.mxu0 %v6377_v4 }
 0x772   : > { %5457 = vmatpush3.bf16.msra.mxu0 %v5790_v52 }
 0x773   : > { %5458 = vmatprep.subr.bf16.mxu0 %v6377_v4 }
 0x776   : > { %5459 = vmatpush3.bf16.msra.mxu0 %v5791_v53 }
 0x777   : > { %5484 = vmatprep.subr.bf16.mxu0 %v6377_v4 }
 0x779   : > { %5461 = vmatmul.mubr.bf16.vlgmr.msra.gmra.mxu0 %v7100_v57 }
 0x77a   : > { %5486 = vmatprep.mubr.msk.bf16.mxu0 %vm6378_vm0, %v6377_v4 }
 0x819   : > { %v2799_v36 = vpop.f32.mrf.mxu0 }
 0x81a   : > { %v2800_v37 = vadd.f32 %v5074_v35, %v2799_v36 }
 0x81b   : > { %v5422_v38 = vpop.f32.mrf.mxu0 }
 0x81c   : > { %v7086_v40 = vadd.f32 %v5894_v39, %v2800_v37 }
 0x81d   : > { %v2802_v41 = vpop.f32.mrf.mxu0 }
 0x81e   : > { %2808 = vadd.xlane.f32.xlu1 %v7086_v40 }
 0x81f   : > { %v5423_v42 = vpop.f32.mrf.mxu0 }
 0x839   : > { %v3052_v9 = vpop.f32.mrf.mxu0 }
 0x83a   : > { %v3053_v10 = vadd.f32 %v5094_v7, %v3052_v9  ;;  %v5804_v7 = vld [vmem:[#allocation17 + $0x18] sm:$0xff]  }
 0x83b   : > { %v5462_v11 = vpop.f32.mrf.mxu0 }
 0x83c   : > { %v3058_v12 = vpack.c.bf16 %v3053_v10, %v3053_v10 }
 0x83d   : > { %v3055_v13 = vpop.f32.mrf.mxu0 }
 0x83e   : > { %3342 = vrot.lane.b32.xlu1 %v3058_v12, %s6381_s24  ;;  %v3352_v58 = vrot.slane %v3058_v12, %v6884_v3 }
 0x83f   : > { %v5463_v55 = vpop.f32.mrf.mxu0 }
 0x840   : > { %v5806_v55 = vld [vmem:[#allocation17 + $0x8] sm:$0xff]  }
 0x842   : > { %3344 = vrot.lane.b32.xlu1 %v3058_v12, %s6379_s10 }
 0x8a7   : > { %v2809_v59 = vpop.xlane.xlu1 %2808 }
 0x8a8   : > { %v2810_v60 = vmul.f32 0.0078125, %v2809_v59 }
 0x8aa   : > { %v2811_v61 = vsub.f32 %v7086_v40, %v2810_v60 }
 0x8ac   : > { %v2812_v62 = vmul.f32 %v2811_v61, %v2811_v61 }
 0x8ae   : > { %2813 = vadd.xlane.f32.xlu0 %v2812_v62 }
 0x8b0   : > { %v3343_v28 = vpop.permute.xlu1 %3342 }
 0x8b1   : > { %v3360_v29 = vrot.slane %v3343_v28, %v6884_v3 }
 0x8b3   : > { %v3361_v31 = vcombine.low %v3352_v58, %v3360_v29  ;;  %v3362_v32 = vcombine.high %v3352_v58, %v3360_v29 }
 0x8b4   : > { %v3345_v33 = vpop.permute.xlu1 %3344 }
 0x8b5   : > { %v3369_v35 = vrot.slane %v3361_v31, %v6888_v8  ;;  %v3376_v36 = vrot.slane %v3362_v32, %v6888_v8  ;;  %v3394_v37 = vrot.slane %v3345_v33, %v6884_v3  ;;  %v5085_v33 = vld [vmem:[%s7464_s7] ss:$0 sm:$0xff]  ;;  %s6239_s7 = scalar_lea.vmem %s4741_s1, 128 }
 0x8b6   : > { %p6240_p6 = scmp.ne.s32.totalorder %s4741_s1, %s6239_s7 }
 0x8b7   : > { %v3377_v38 = vcombine.high %v3369_v35, %v6384_v17  ;;  %v3378_v42 = vcombine.high %v3376_v36, %v6384_v17  ;;  %v3417_v43 = vshrl.u32 %v3369_v35, 16  ;;  %v3433_v47 = vshrl.u32 %v3376_v36, 16 }
 0x8b8   : > { %p6241_p13 = pnand %p6240_p6, %p7475_p12 }
 0x8b9   : > { %v3425_v48 = vshrl.u32 %v3377_v38, 16  ;;  %v3441_v52 = vshrl.u32 %v3378_v42, 16 }
 0x8ba   : > { %p6242_p9 = pneg %p6241_p13 }
 0x8c4   : > { %3340 = vrot.lane.b32.xlu0 %v3058_v12, %s6380_s15  ;;  %v5805_v12 = vld [vmem:[#allocation17 + $0x10] sm:$0xff]  }
 0x937   : > { %v2814_v14 = vpop.xlane.xlu0 %2813 }
 0x938   : > { %v2815_v15 = vmul.f32 0.0078125, %v2814_v14 }
 0x93a   : > { %v2816_v16 = vadd.f32 1e-06, %v2815_v15 }
 0x93b   : > { %v3341_v30 = vpop.permute.xlu0 %3340 }
 0x93c   : > { %5874 = vrsqrt.f32 %v2816_v16  ;;  %v3386_v34 = vrot.slane %v3341_v30, %v6884_v3 }
 0x93e   : > { %v3395_v39 = vcombine.low %v3386_v34, %v3394_v37  ;;  %v3396_v41 = vcombine.high %v3386_v34, %v3394_v37 }
 0x940   : > { %v3403_v44 = vrot.slane %v3395_v39, %v6888_v8  ;;  %v3410_v45 = vrot.slane %v3396_v41, %v6888_v8 }
 0x942   : > { %v3411_v49 = vcombine.high %v3403_v44, %v6384_v17  ;;  %v3412_v50 = vcombine.high %v3410_v45, %v6384_v17  ;;  %v3418_v51 = vshrl.u32 %v3403_v44, 16  ;;  %v3415_v53 = vpack.i.b16 %v3403_v44, %v3369_v35 }
 0x943   : > { %v3431_v54 = vpack.i.b16 %v3410_v45, %v3376_v36  ;;  %v3434_v59 = vshrl.u32 %v3410_v45, 16 }
 0x944   : > { %v3419_v60 = vpack.i.b16 %v3418_v51, %v3417_v43  ;;  %v3423_v62 = vpack.i.b16 %v3411_v49, %v3377_v38  ;;  %v3439_v0 = vpack.i.b16 %v3412_v50, %v3378_v42  ;;  %v3442_v2 = vshrl.u32 %v3412_v50, 16 }
 0x945   : > { %v3435_v63 = vpack.i.b16 %v3434_v59, %v3433_v47  ;;  %v3445_v46 = vcombine.low %v3415_v53, %v3431_v54 }
 0x946   : > { %v3443_v6 = vpack.i.b16 %v3442_v2, %v3441_v52  ;;  %v3453_v9 = vcombine.low %v3423_v62, %v3439_v0 }
 0x947   : > { %v3470_v10 = vcombine.low %v3419_v60, %v3435_v63  ;;  %v3452_v13 = vrot.slane %v3445_v46, %v6884_v3 }
 0x948   : > { %v3460_v14 = vrot.slane %v3453_v9, %v6884_v3 }
 0x949   : > { %v5875_v18 = vpop.eup %5874  ;;  %v3477_v15 = vrot.slane %v3470_v10, %v6884_v3 }
 0x94a   : > { %v2818_v20 = vmul.f32 %v5875_v18, %v2811_v61  ;;  %v3426_v61 = vshrl.u32 %v3411_v49, 16  ;;  %v3461_v18 = vcombine.low %v3452_v13, %v3460_v14 }
 0x94c   : > { %v2825_v22 = vmul.f32 %v5083_v19, %v2818_v20  ;;  %v3427_v5 = vpack.i.b16 %v3426_v61, %v3425_v48  ;;  %v5807_v20 = vld [vmem:[#allocation17] sm:$0xff]  }
 0x94e   : > { %v2832_v23 = vadd.f32 %v5084_v21, %v2825_v22  ;;  %v3478_v11 = vcombine.low %v3427_v5, %v3443_v6  ;;  %v3468_v21 = vrot.slane %v3461_v18, %v6888_v8 }
 0x950   : > { %v2833_v25 = vpack.c.bf16 %v2832_v23, %v2832_v23  ;;  %v3485_v16 = vrot.slane %v3478_v11, %v6884_v3 }
 0x952   : > { %5441 = vmatmul.mubr.bf16.vlgmr.msra.gmra.mxu1 %v2833_v25  ;;  %v3486_v19 = vcombine.low %v3477_v15, %v3485_v16 }
 0x953   : > { %5465 = vmatpush3.bf16.msra.mxu1 %v5800_v24  ;;  %5480 = vmatprep.mubr.msk.bf16.mxu1 %vm6378_vm0, %v6377_v4  ;;  %v3498_v24 = vshrl.u32 %v3468_v21, 16 }
 0x954   : > { %5466 = vmatprep.subr.bf16.mxu1 %v6377_v4  ;;  %v3493_v22 = vrot.slane %v3486_v19, %v6888_v8 }
 0x956   : > { %v3497_v23 = vpack.i.b16 %v3493_v22, %v3468_v21  ;;  %v3499_v25 = vshrl.u32 %v3493_v22, 16 }
 0x957   : > { %5467 = vmatpush3.bf16.msra.mxu1 %v5801_v26  ;;  %v7147_v26 = vcombine.high %v3468_v21, %v6384_v17 }
 0x958   : > { %5468 = vmatprep.subr.bf16.mxu1 %v6377_v4  ;;  %v3500_v58 = vpack.i.b16 %v3499_v25, %v3498_v24 }
 0x959   : > { %v3504_v29 = vshrl.u32 %v7147_v26, 16 }
 0x95a   : > { %v3725_v31 = vsel %vm2103_vm1, %v3500_v58, 0 }
 0x95b   : > { %5469 = vmatpush3.bf16.msra.mxu1 %v5802_v56  ;;  %v7150_v56 = vcombine.high %v3493_v22, %v6384_v17 }
 0x95c   : > { %5470 = vmatprep.subr.bf16.mxu1 %v6377_v4 }
 0x95d   : > { %v3503_v28 = vpack.i.b16 %v7150_v56, %v7147_v26  ;;  %v3505_v30 = vshrl.u32 %v7150_v56, 16 }
 0x95f   : > { %5471 = vmatpush3.bf16.msra.mxu1 %v5803_v27  ;;  %v3679_v27 = vsel %vm2103_vm1, %v3497_v23, 0  ;;  %v7161_v32 = vpack.i.b16 %v3505_v30, %v3504_v29 }
 0x960   : > { %5472 = vmatprep.subr.bf16.mxu1 %v6377_v4  ;;  %5485 = vmatpush3.bf16.xpose.msra.mxu0 %v3679_v27 }
 0x961   : > { %5496 = vmatprep.subr.bf16.mxu0 %v6377_v4 }
 0x963   : > { %5473 = vmatpush3.bf16.msra.mxu1 %v5804_v7 }
 0x964   : > { %5474 = vmatprep.subr.bf16.mxu1 %v6377_v4 }
 0x967   : > { %5475 = vmatpush3.bf16.msra.mxu1 %v5805_v12 }
 0x968   : > { %5476 = vmatprep.subr.bf16.mxu1 %v6377_v4 }
 0x96b   : > { %5477 = vmatpush3.bf16.msra.mxu1 %v5806_v55 }
 0x96c   : > { %5478 = vmatprep.subr.bf16.mxu1 %v6377_v4 }
 0x96f   : > { %5479 = vmatpush3.bf16.msra.mxu1 %v5807_v20 }
 0x970   : > { %5490 = vmatprep.subr.bf16.mxu1 %v6377_v4 }
 0x972   : > { %5481 = vmatmul.mubr.bf16.vlgmr.msra.gmra.mxu1 %v7100_v57 }
 0x973   : > { %5491 = vmatpush3.bf16.xpose.msra.mxu1 %v3725_v31  ;;  %5492 = vmatprep.mubr.msk.bf16.mxu1 %vm6378_vm0, %v6377_v4 }
 0x974   : > { %5502 = vmatprep.subr.bf16.mxu1 %v6377_v4 }
 0xa12   : > { %v2939_v34 = vpop.f32.mrf.mxu1 }
 0xa13   : > { %v2940_v35 = vadd.f32 %v5085_v33, %v2939_v34 }
 0xa14   : > { %v5442_v36 = vpop.f32.mrf.mxu1 }
 0xa15   : > { %v2945_v37 = vmul.f32 0.17677669, %v2940_v35 }
 0xa16   : > { %v2942_v38 = vpop.f32.mrf.mxu1 }
 0xa17   : > { %v2946_v39 = vpack.c.bf16 %v2945_v37, %v2945_v37 }
 0xa18   : > { %v5443_v41 = vpop.f32.mrf.mxu1 }
 0xa19   : > { %3174 = vrot.lane.b32.xlu1 %v2946_v39, %s6381_s24  ;;  %3172 = vrot.lane.b32.xlu0 %v2946_v39, %s6380_s15  ;;  %v3184_v48 = vrot.slane %v2946_v39, %v6884_v3 }
 0xa1d   : > { %3176 = vrot.lane.b32.xlu0 %v2946_v39, %s6379_s10 }
 0xa32   : > { %v7170_v57 = vpop.f32.mrf.mxu1 }
 0xa34   : > { %v5482_v42 = vpop.f32.mrf.mxu1 }
 0xa35   : > { %v3771_v42 = vsel %vm2103_vm1, %v3503_v28, 0 }
 0xa36   : > { %v3167_v43 = vpop.f32.mrf.mxu1 }
 0xa38   : > { %v5483_v44 = vpop.f32.mrf.mxu1 }
 0xa8b   : > { %v3175_v45 = vpop.permute.xlu1 %3174  ;;  %v3173_v47 = vpop.permute.xlu0 %3172 }
 0xa8c   : > { %v3192_v49 = vrot.slane %v3175_v45, %v6884_v3  ;;  %v3218_v59 = vrot.slane %v3173_v47, %v6884_v3  ;;  %v3817_v45 = vsel %vm2103_vm1, %v7161_v32, 0  ;;  %v1229_v32 = vld [vmem:[%s1216_s9] sm:$0x1]  ;;  %s6243_s9 = sshll.u32 %s6385_s19, 4  ;;  %s6244_s9 = int_to_ptr.vmem [resolvable:$false] %s6243_s9 }
 0xa8d   : > { %vm1230_vm10 = vcmp.gt.bf16.partialorder %v1229_v32, 0  ;;  %p6246_p4 = scmp.lt.s32.totalorder %s4741_s1, %s6244_s9 }
 0xa8e   : > { %v3193_v50 = vcombine.low %v3184_v48, %v3192_v49  ;;  %v3194_v51 = vcombine.high %v3184_v48, %v3192_v49  ;;  %v3859_v49 = vsel %vm1230_vm10, 65537, %v6384_v17 }
 0xa8f   : > { %v3177_v52 = vpop.permute.xlu0 %3176 }
 0xa90   : > { %v3201_v53 = vrot.slane %v3193_v50, %v6888_v8  ;;  %v3226_v54 = vrot.slane %v3177_v52, %v6884_v3  ;;  %v3208_v60 = vrot.slane %v3194_v51, %v6888_v8  ;;  %v3860_v50 = vunpack.c.l.b16 %v3859_v49 }
 0xa91   : > { %v3865_v51 = vsub.s32 0, %v6881_v1 }
 0xa92   : > { %v3227_v61 = vcombine.low %v3218_v59, %v3226_v54  ;;  %v3228_v62 = vcombine.high %v3218_v59, %v3226_v54  ;;  %v3209_v63 = vcombine.high %v3201_v53, %v6384_v17  ;;  %v3210_v5 = vcombine.high %v3208_v60, %v6384_v17 }
 0xa93   : > { %v3249_v6 = vshrl.u32 %v3201_v53, 16  ;;  %v3265_v12 = vshrl.u32 %v3208_v60, 16  ;;  %vm3861_vm11 = vcmp.ne.s32.totalorder %v3860_v50, 0 }
 0xa94   : > { %v3235_v0 = vrot.slane %v3227_v61, %v6888_v8  ;;  %v3242_v2 = vrot.slane %v3228_v62, %v6888_v8  ;;  %v3257_v11 = vshrl.u32 %v3209_v63, 16  ;;  %v3273_v19 = vshrl.u32 %v3210_v5, 16 }
 0xa95   : > { %v3862_v52 = vsel %vm3861_vm11, 1, %v6384_v17 }
 0xa96   : > { %v3243_v46 = vcombine.high %v3235_v0, %v6384_v17  ;;  %v3244_v7 = vcombine.high %v3242_v2, %v6384_v17  ;;  %v3247_v9 = vpack.i.b16 %v3235_v0, %v3201_v53  ;;  %v3250_v10 = vshrl.u32 %v3235_v0, 16 }
 0xa97   : > { %v3263_v13 = vpack.i.b16 %v3242_v2, %v3208_v60  ;;  %v3266_v55 = vshrl.u32 %v3242_v2, 16  ;;  %v3866_v53 = vrot.slane %v3862_v52, %v3865_v51 }
 0xa98   : > { %v3251_v14 = vpack.i.b16 %v3250_v10, %v3249_v6  ;;  %v3255_v15 = vpack.i.b16 %v3243_v46, %v3209_v63  ;;  %v3258_v16 = vshrl.u32 %v3243_v46, 16  ;;  %v3271_v18 = vpack.i.b16 %v3244_v7, %v3210_v5 }
 0xa99   : > { %v3267_v20 = vpack.i.b16 %v3266_v55, %v3265_v12  ;;  %v3274_v21 = vshrl.u32 %v3244_v7, 16  ;;  %v3277_v22 = vcombine.low %v3247_v9, %v3263_v13  ;;  %vm3867_vm12 = vcmp.eq.s32.totalorder %v3866_v53, 1 }
 0xa9a   : > { %v3259_v23 = vpack.i.b16 %v3258_v16, %v3257_v11  ;;  %v3285_v24 = vcombine.low %v3255_v15, %v3271_v18 }
 0xa9b   : > { %v3275_v25 = vpack.i.b16 %v3274_v21, %v3273_v19  ;;  %v3302_v27 = vcombine.low %v3251_v14, %v3267_v20  ;;  %v3284_v58 = vrot.slane %v3277_v22, %v6884_v3  ;;  %v5103_v21 = vld [vmem:[%s7466_s3] ss:$0 sm:$0xff]  ;;  %s6245_s3 = scalar_lea.vmem %s6244_s9, 256 }
 0xa9c   : > { %v3292_v29 = vrot.slane %v3285_v24, %v6884_v3  ;;  %v3165_v22 = vadd.f32 %v5103_v21, %v7170_v57  ;;  %p6247_p7 = scmp.lt.s32.totalorder %s6245_s3, %s6239_s7 }
 0xa9d   : > { %v3310_v30 = vcombine.low %v3259_v23, %v3275_v25  ;;  %v3309_v33 = vrot.slane %v3302_v27, %v6884_v3 }
 0xa9e   : > { %v3293_v31 = vcombine.low %v3284_v58, %v3292_v29  ;;  %v3170_v23 = vpack.c.bf16 %v3165_v22, %v3165_v22  ;;  %p6248_p10 = por %p6247_p7, %p6246_p4 }
 0xa9f   : > { %v3317_v34 = vrot.slane %v3310_v30, %v6884_v3 }
 0xaa0   : > { %v3300_v36 = vrot.slane %v3293_v31, %v6888_v8  ;;  %p6249_p0 = pnand %p6248_p10, %p6242_p9 }
 0xaa1   : > { %v3318_v35 = vcombine.low %v3309_v33, %v3317_v34 }
 0xaa2   : > { %v3330_v39 = vshrl.u32 %v3300_v36, 16  ;;  %v3301_v47 = vcombine.high %v3300_v36, %v6384_v17 }
 0xaa3   : > { %v3325_v37 = vrot.slane %v3318_v35, %v6888_v8 }
 0xaa4   : > { %v3336_v28 = vshrl.u32 %v3301_v47, 16 }
 0xaa5   : > { %v3329_v38 = vpack.i.b16 %v3325_v37, %v3300_v36  ;;  %v3331_v41 = vshrl.u32 %v3325_v37, 16  ;;  %v3326_v44 = vcombine.high %v3325_v37, %v6384_v17 }
 0xaa7   : > { %5487 = vmatmul.mubr.msk.bf16.vlgmr.msra.gmra.mxu0 %vm2103_vm1, %v3329_v38  ;;  %v3332_v43 = vpack.i.b16 %v3331_v41, %v3330_v39  ;;  %v3337_v26 = vshrl.u32 %v3326_v44, 16  ;;  %v3335_v56 = vpack.i.b16 %v3326_v44, %v3301_v47 }
 0xaa8   : > { %5497 = vmatpush3.bf16.xpose.msra.mxu0 %v3771_v42  ;;  %5498 = vmatprep.mubr.msk.bf16.mxu0 %vm6378_vm0, %v6377_v4 }
 0xaa9   : > { %5493 = vmatmul.mubr.msk.bf16.vlgmr.msra.gmra.mxu1 %vm2103_vm1, %v3332_v43  ;;  %5508 = vmatprep.subr.bf16.mxu0 %v6377_v4  ;;  %v3338_v48 = vpack.i.b16 %v3337_v26, %v3336_v28  ;;  %v3520_v28 = vrot.slane %v3170_v23, %v6884_v3 }
 0xaaa   : > { %5503 = vmatpush3.bf16.xpose.msra.mxu1 %v3817_v45  ;;  %5504 = vmatprep.mubr.msk.bf16.mxu1 %vm6378_vm0, %v6377_v4 }
 0xaab   : > { %5514 = vmatprep.subr.bf16.mxu1 %v6377_v4 }
 0xaaf   : > { %5499 = vmatmul.mubr.msk.bf16.vlgmr.msra.gmra.mxu0 %vm2103_vm1, %v3335_v56 }
 0xab0   : > { %5510 = vmatprep.mubr.msk.bf16.mxu0 %vm6378_vm0, %v6377_v4 }
 0xab1   : > { %5505 = vmatmul.mubr.msk.bf16.vlgmr.msra.gmra.mxu1 %vm2103_vm1, %v3338_v48 }
 0xab2   : > { %5516 = vmatprep.mubr.msk.bf16.mxu1 %vm6378_vm0, %v6377_v4 }
 0xb67   : > { %v3715_v54 = vpop.f32.mrf.mxu0 }
 0xb68   : > { %v3868_v59 = vsel %vm3867_vm12, %v3715_v54, -1e+30 }
 0xb69   : > { %v5488_v60 = vpop.f32.mrf.mxu0  ;;  %v3761_v61 = vpop.f32.mrf.mxu1  ;;  %v3872_v62 = vsel %vm2297_vm4, %v3868_v59, -inf }
 0xb6a   : > { %v3869_v63 = vsel %vm3867_vm12, %v3761_v61, -1e+30  ;;  %3873 = vmax.xlane.f32.xlu1 %v3872_v62 }
 0xb6b   : > { %v3718_v0 = vpop.f32.mrf.mxu0  ;;  %v5494_v2 = vpop.f32.mrf.mxu1  ;;  %v3875_v5 = vsel %vm2297_vm4, %v3869_v63, -inf }
 0xb6c   : > { %3876 = vmax.xlane.f32.xlu0 %v3875_v5 }
 0xb6d   : > { %v5489_v6 = vpop.f32.mrf.mxu0  ;;  %v3764_v46 = vpop.f32.mrf.mxu1 }
 0xb6f   : > { %v5495_v7 = vpop.f32.mrf.mxu1  ;;  %v3807_v9 = vpop.f32.mrf.mxu0 }
 0xb70   : > { %v3870_v10 = vsel %vm3867_vm12, %v3807_v9, -1e+30 }
 0xb71   : > { %v5500_v11 = vpop.f32.mrf.mxu0  ;;  %v3853_v12 = vpop.f32.mrf.mxu1  ;;  %v3878_v13 = vsel %vm2297_vm4, %v3870_v10, -inf }
 0xb72   : > { %v3871_v55 = vsel %vm3867_vm12, %v3853_v12, -1e+30  ;;  %3879 = vmax.xlane.f32.xlu0 %v3878_v13 }
 0xb73   : > { %v3810_v14 = vpop.f32.mrf.mxu0  ;;  %v5506_v15 = vpop.f32.mrf.mxu1  ;;  %v3881_v16 = vsel %vm2297_vm4, %v3871_v55, -inf }
 0xb74   : > { %3882 = vmax.xlane.f32.xlu1 %v3881_v16 }
 0xb75   : > { %v5501_v18 = vpop.f32.mrf.mxu0  ;;  %v3856_v19 = vpop.f32.mrf.mxu1 }
 0xb77   : > { %v5507_v20 = vpop.f32.mrf.mxu1 }
 0xb85   : > { %3510 = vrot.lane.b32.xlu1 %v3170_v23, %s6381_s24 }
 0xbf3   : > { %v3874_v24 = vpop.xlane.xlu1 %3873 }
 0xbf4   : > { %v3884_v25 = vsub.f32 %v3868_v59, %v3874_v24 }
 0xbf5   : > { %v3877_v27 = vpop.xlane.xlu0 %3876 }
 0xbf6   : > { %v3888_v58 = vmul.f32 1.442695, %v3884_v25  ;;  %v3885_v29 = vsub.f32 %v3869_v63, %v3877_v27 }
 0xbf8   : > { %5876 = vpow2.f32 %v3888_v58  ;;  %v3890_v30 = vmul.f32 1.442695, %v3885_v29 }
 0xbfa   : > { %5878 = vpow2.f32 %v3890_v30 }
 0xbfb   : > { %v3880_v35 = vpop.xlane.xlu0 %3879 }
 0xbfc   : > { %v3886_v36 = vsub.f32 %v3870_v10, %v3880_v35 }
 0xbfd   : > { %v3883_v37 = vpop.xlane.xlu1 %3882 }
 0xbfe   : > { %v3887_v38 = vsub.f32 %v3871_v55, %v3883_v37  ;;  %v3892_v39 = vmul.f32 1.442695, %v3886_v36 }
 0xc00   : > { %v3894_v41 = vmul.f32 1.442695, %v3887_v38  ;;  %5880 = vpow2.f32 %v3892_v39 }
 0xc01   : > { %v3511_v47 = vpop.permute.xlu1 %3510 }
 0xc02   : > { %5882 = vpow2.f32 %v3894_v41  ;;  %v3528_v26 = vrot.slane %v3511_v47, %v6884_v3 }
 0xc04   : > { %v3529_v48 = vcombine.low %v3520_v28, %v3528_v26  ;;  %v3530_v49 = vcombine.high %v3520_v28, %v3528_v26 }
 0xc05   : > { %v7230_v31 = vpop.eup %5876 }
 0xc06   : > { %v3896_v33 = vsel %vm2297_vm4, %v7230_v31, 0.0  ;;  %v3537_v52 = vrot.slane %v3529_v48, %v6888_v8  ;;  %v3544_v60 = vrot.slane %v3530_v49, %v6888_v8 }
 0xc07   : > { %v7234_v34 = vpop.eup %5878  ;;  %3897 = vadd.xlane.f32.xlu0 %v3896_v33 }
 0xc08   : > { %v3899_v57 = vsel %vm2297_vm4, %v7234_v34, 0.0  ;;  %v3545_v63 = vcombine.high %v3537_v52, %v6384_v17  ;;  %v3546_v5 = vcombine.high %v3544_v60, %v6384_v17  ;;  %v3585_v6 = vshrl.u32 %v3537_v52, 16 }
 0xc09   : > { %3900 = vadd.xlane.f32.xlu1 %v3899_v57  ;;  %v3601_v12 = vshrl.u32 %v3544_v60, 16 }
 0xc0a   : > { %v3593_v11 = vshrl.u32 %v3545_v63, 16  ;;  %v3609_v19 = vshrl.u32 %v3546_v5, 16 }
 0xc0d   : > { %v7240_v42 = vpop.eup %5880 }
 0xc0e   : > { %v3902_v44 = vsel %vm2297_vm4, %v7240_v42, 0.0 }
 0xc0f   : > { %v7242_v43 = vpop.eup %5882 }
 0xc10   : > { %v3905_v45 = vsel %vm2297_vm4, %v7242_v43, 0.0 }
 0xc1a   : > { %3512 = vrot.lane.b32.xlu1 %v3170_v23, %s6379_s10 }
 0xc1d   : > { %3508 = vrot.lane.b32.xlu0 %v3170_v23, %s6380_s15 }
 0xc3c   : > { %3903 = vadd.xlane.f32.xlu0 %v3902_v44 }
 0xc3e   : > { %3906 = vadd.xlane.f32.xlu1 %v3905_v45 }
 0xc90   : > { %v3898_v56 = vpop.xlane.xlu0 %3897 }
 0xc91   : > { %5884 = vrcp.f32 %v3898_v56 }
 0xc92   : > { %v3901_v32 = vpop.xlane.xlu1 %3900 }
 0xc93   : > { %5886 = vrcp.f32 %v3901_v32 }
 0xc94   : > { %v3509_v50 = vpop.permute.xlu0 %3508 }
 0xc95   : > { %v3554_v54 = vrot.slane %v3509_v50, %v6884_v3 }
 0xc96   : > { %v3513_v53 = vpop.permute.xlu1 %3512 }
 0xc97   : > { %v3562_v59 = vrot.slane %v3513_v53, %v6884_v3 }
 0xc99   : > { %v3563_v61 = vcombine.low %v3554_v54, %v3562_v59  ;;  %v3564_v62 = vcombine.high %v3554_v54, %v3562_v59 }
 0xc9b   : > { %v3571_v0 = vrot.slane %v3563_v61, %v6888_v8  ;;  %v3578_v2 = vrot.slane %v3564_v62, %v6888_v8 }
 0xc9d   : > { %v3579_v46 = vcombine.high %v3571_v0, %v6384_v17  ;;  %v3580_v7 = vcombine.high %v3578_v2, %v6384_v17  ;;  %v3583_v9 = vpack.i.b16 %v3571_v0, %v3537_v52  ;;  %v3586_v10 = vshrl.u32 %v3571_v0, 16 }
 0xc9e   : > { %v3599_v13 = vpack.i.b16 %v3578_v2, %v3544_v60  ;;  %v3602_v55 = vshrl.u32 %v3578_v2, 16  ;;  %v5885_v37 = vpop.eup %5884 }
 0xc9f   : > { %v3587_v14 = vpack.i.b16 %v3586_v10, %v3585_v6  ;;  %v3591_v15 = vpack.i.b16 %v3579_v46, %v3545_v63  ;;  %v3594_v16 = vshrl.u32 %v3579_v46, 16  ;;  %v3607_v18 = vpack.i.b16 %v3580_v7, %v3546_v5  ;;  %v5809_v10 = vld [vmem:[#allocation19 + $0x30] sm:$0xff]  }
 0xca0   : > { %v3603_v20 = vpack.i.b16 %v3602_v55, %v3601_v12  ;;  %v3610_v21 = vshrl.u32 %v3580_v7, 16  ;;  %v3613_v22 = vcombine.low %v3583_v9, %v3599_v13  ;;  %v5887_v39 = vpop.eup %5886  ;;  %v3912_v45 = vmul.f32 %v5885_v37, %v7230_v31  ;;  %v5808_v9 = vld [vmem:[#allocation19 + $0x38] sm:$0xff]   ;;  %v5813_v12 = vld [vmem:[#allocation19 + $0x10] sm:$0xff]  }
 0xca1   : > { %v3595_v23 = vpack.i.b16 %v3594_v16, %v3593_v11  ;;  %v3621_v24 = vcombine.low %v3591_v15, %v3607_v18  ;;  %v3913_v48 = vmul.f32 %v5887_v39, %v7234_v34  ;;  %v5812_v11 = vld [vmem:[#allocation19 + $0x18] sm:$0xff]  }
 0xca2   : > { %v3611_v25 = vpack.i.b16 %v3610_v21, %v3609_v19  ;;  %v3638_v27 = vcombine.low %v3587_v14, %v3603_v20  ;;  %v3620_v58 = vrot.slane %v3613_v22, %v6884_v3  ;;  %v3916_v59 = vpack.c.bf16 %v3912_v45, %v3912_v45  ;;  %v5814_v45 = vld [vmem:[#allocation19 + $0x8] sm:$0xff]  }
 0xca3   : > { %v3628_v29 = vrot.slane %v3621_v24, %v6884_v3  ;;  %v3917_v61 = vpack.c.bf16 %v3913_v48, %v3913_v48 }
 0xca4   : > { %v3646_v30 = vcombine.low %v3595_v23, %v3611_v25  ;;  %v3645_v57 = vrot.slane %v3638_v27, %v6884_v3 }
 0xca5   : > { %v3629_v33 = vcombine.low %v3620_v58, %v3628_v29 }
 0xca6   : > { %v3653_v35 = vrot.slane %v3646_v30, %v6884_v3 }
 0xca7   : > { %v3636_v36 = vrot.slane %v3629_v33, %v6888_v8 }
 0xca8   : > { %v3654_v38 = vcombine.low %v3645_v57, %v3653_v35 }
 0xca9   : > { %v3637_v41 = vcombine.high %v3636_v36, %v6384_v17  ;;  %v3666_v26 = vshrl.u32 %v3636_v36, 16 }
 0xcaa   : > { %v3661_v44 = vrot.slane %v3654_v38, %v6888_v8 }
 0xcab   : > { %v3672_v32 = vshrl.u32 %v3637_v41, 16 }
 0xcac   : > { %v3665_v47 = vpack.i.b16 %v3661_v44, %v3636_v36  ;;  %v3667_v56 = vshrl.u32 %v3661_v44, 16  ;;  %v3662_v28 = vcombine.high %v3661_v44, %v6384_v17 }
 0xcae   : > { %v3924_v49 = vsel %vm2358_vm7, %v3665_v47, 0  ;;  %v3668_v50 = vpack.i.b16 %v3667_v56, %v3666_v26  ;;  %v3671_v52 = vpack.i.b16 %v3662_v28, %v3637_v41  ;;  %v3673_v53 = vshrl.u32 %v3662_v28, 16 }
 0xcaf   : > { %5509 = vmatpush3.bf16.msra.mxu0 %v3924_v49 }
 0xcb0   : > { %v3970_v54 = vsel %vm2358_vm7, %v3668_v50, 0  ;;  %5520 = vmatprep.subr.bf16.mxu0 %v6377_v4  ;;  %v3674_v31 = vpack.i.b16 %v3673_v53, %v3672_v32  ;;  %v4016_v60 = vsel %vm2358_vm7, %v3671_v52, 0  ;;  %v5815_v53 = vld [vmem:[#allocation19] sm:$0xff]  }
 0xcb1   : > { %5515 = vmatpush3.bf16.msra.mxu1 %v3970_v54 }
 0xcb2   : > { %5511 = vmatmul.mubr.msk.bf16.vlgmr.msra.gmra.mxu0 %vm2297_vm4, %v3916_v59  ;;  %5526 = vmatprep.subr.bf16.mxu1 %v6377_v4  ;;  %v4062_v34 = vsel %vm2358_vm7, %v3674_v31, 0 }
 0xcb3   : > { %5521 = vmatpush3.bf16.msra.mxu0 %v4016_v60  ;;  %5522 = vmatprep.mubr.msk.bf16.mxu0 %vm6378_vm0, %v6377_v4 }
 0xcb4   : > { %5517 = vmatmul.mubr.msk.bf16.vlgmr.msra.gmra.mxu1 %vm2297_vm4, %v3917_v61  ;;  %5532 = vmatprep.subr.bf16.mxu0 %v6377_v4 }
 0xcb5   : > { %5527 = vmatpush3.bf16.msra.mxu1 %v4062_v34  ;;  %5528 = vmatprep.mubr.msk.bf16.mxu1 %vm6378_vm0, %v6377_v4 }
 0xcc5   : > { %v3904_v62 = vpop.xlane.xlu0 %3903 }
 0xcc6   : > { %5888 = vrcp.f32 %v3904_v62 }
 0xcc7   : > { %v3907_v63 = vpop.xlane.xlu1 %3906 }
 0xcc8   : > { %5890 = vrcp.f32 %v3907_v63 }
 0xcd3   : > { %v5889_v0 = vpop.eup %5888 }
 0xcd4   : > { %v3914_v2 = vmul.f32 %v5889_v0, %v7240_v42  ;;  %v5810_v42 = vld [vmem:[#allocation19 + $0x28] sm:$0xff]  }
 0xcd5   : > { %v5891_v5 = vpop.eup %5890 }
 0xcd6   : > { %v3918_v6 = vpack.c.bf16 %v3914_v2, %v3914_v2  ;;  %v3915_v46 = vmul.f32 %v5891_v5, %v7242_v43  ;;  %v5811_v43 = vld [vmem:[#allocation19 + $0x20] sm:$0xff]  }
 0xcd8   : > { %5523 = vmatmul.mubr.msk.bf16.vlgmr.msra.gmra.mxu0 %vm2297_vm4, %v3918_v6  ;;  %v3919_v7 = vpack.c.bf16 %v3915_v46, %v3915_v46 }
 0xcd9   : > { %5548 = vmatprep.mubr.msk.bf16.mxu0 %vm6378_vm0, %v6377_v4  ;;  %5533 = vmatpush3.bf16.msra.mxu0 %v5808_v9 }
 0xcda   : > { %5529 = vmatmul.mubr.msk.bf16.vlgmr.msra.gmra.mxu1 %vm2297_vm4, %v3919_v7  ;;  %5534 = vmatprep.subr.bf16.mxu0 %v6377_v4 }
 0xcdb   : > { %4536 = vmatprep.mubr.bf16.mxu1 %v6384_v17 }
 0xcdd   : > { %5535 = vmatpush3.bf16.msra.mxu0 %v5809_v10 }
 0xcde   : > { %5536 = vmatprep.subr.bf16.mxu0 %v6377_v4 }
 0xce1   : > { %5537 = vmatpush3.bf16.msra.mxu0 %v5810_v42 }
 0xce2   : > { %5538 = vmatprep.subr.bf16.mxu0 %v6377_v4 }
 0xce5   : > { %5539 = vmatpush3.bf16.msra.mxu0 %v5811_v43 }
 0xce6   : > { %5540 = vmatprep.subr.bf16.mxu0 %v6377_v4 }
 0xce9   : > { %5541 = vmatpush3.bf16.msra.mxu0 %v5812_v11 }
 0xcea   : > { %5542 = vmatprep.subr.bf16.mxu0 %v6377_v4 }
 0xced   : > { %5543 = vmatpush3.bf16.msra.mxu0 %v5813_v12 }
 0xcee   : > { %5544 = vmatprep.subr.bf16.mxu0 %v6377_v4 }
 0xcf1   : > { %5545 = vmatpush3.bf16.msra.mxu0 %v5814_v45  ;;  %v5841_v45 = vld [vmem:[#allocation22 + $0x38] sm:$0xff]  }
 0xcf2   : > { %5546 = vmatprep.subr.bf16.mxu0 %v6377_v4 }
 0xcf5   : > { %5547 = vmatpush3.bf16.msra.mxu0 %v5815_v53  ;;  %v5851_v53 = vld [vmem:[#allocation22 + $0x10] sm:$0xff]  }
 0xd72   : > { %v3960_v17 = vpop.f32.mrf.mxu0 }
 0xd74   : > { %v5512_v13 = vpop.f32.mrf.mxu0  ;;  %v4006_v55 = vpop.f32.mrf.mxu1 }
 0xd76   : > { %v3963_v14 = vpop.f32.mrf.mxu0  ;;  %v5518_v15 = vpop.f32.mrf.mxu1 }
 0xd78   : > { %v5513_v16 = vpop.f32.mrf.mxu0  ;;  %v4009_v18 = vpop.f32.mrf.mxu1 }
 0xd7a   : > { %v5519_v19 = vpop.f32.mrf.mxu1 }
 0xd7b   : > { %v5816_v19 = vld [vmem:[#allocation20 + $0x70] ss:$8 sps:$4 sm:$0xff]  }
 0xd98   : > { %v4052_v20 = vpop.f32.mrf.mxu0 }
 0xd99   : > { %v4104_v21 = vcombine.low %v3960_v17, %v4052_v20  ;;  %v4105_v22 = vcombine.high %v3960_v17, %v4052_v20  ;;  %v5122_v17 = vld [vmem:[%s7467_s0] ss:$0 sm:$0xff]  ;;  %v5818_v20 = vld [vmem:[#allocation20 + $0x74] ss:$8 sps:$4 sm:$0xff]  }
 0xd9a   : > { %v5524_v23 = vpop.f32.mrf.mxu0  ;;  %v4098_v24 = vpop.f32.mrf.mxu1  ;;  %4504 = vmatprep.subr.bf16.mxu1 %v5818_v20 }
 0xd9b   : > { %v4120_v25 = vcombine.low %v4006_v55, %v4098_v24  ;;  %v4121_v27 = vcombine.high %v4006_v55, %v4098_v24  ;;  %v4112_v30 = vrot.slane %v4104_v21, %v6884_v3  ;;  %v4119_v33 = vrot.slane %v4105_v22, %v6884_v3  ;;  %v5821_v21 = vld [vmem:[#allocation20 + $0x64] ss:$8 sps:$4 sm:$0xff]   ;;  %4505 = vmatpush1.bf16.msra.mxu1 %v5816_v19  ;;  %v5819_v22 = vld [vmem:[#allocation20 + $0x60] ss:$8 sps:$4 sm:$0xff]  }
 0xd9c   : > { %v4055_v58 = vpop.f32.mrf.mxu0  ;;  %v5530_v29 = vpop.f32.mrf.mxu1  ;;  %4506 = vmatprep.subr.bf16.mxu1 %v5821_v21 }
 0xd9d   : > { %v4128_v57 = vrot.slane %v4120_v25, %v6884_v3  ;;  %v4135_v35 = vrot.slane %v4121_v27, %v6884_v3  ;;  %v5822_v58 = vld [vmem:[#allocation20 + $0x50] ss:$8 sps:$4 sm:$0xff]   ;;  %v5825_v29 = vld [vmem:[#allocation20 + $0x40] ss:$8 sps:$4 sm:$0xff]  }
 0xd9e   : > { %v5525_v36 = vpop.f32.mrf.mxu0  ;;  %v4101_v37 = vpop.f32.mrf.mxu1 }
 0xd9f   : > { %v4136_v38 = vcombine.low %v4112_v30, %v4128_v57  ;;  %v4137_v39 = vcombine.high %v4112_v30, %v4128_v57  ;;  %v4152_v41 = vcombine.low %v4119_v33, %v4135_v35  ;;  %v4153_v44 = vcombine.high %v4119_v33, %v4135_v35  ;;  %4507 = vmatpush1.bf16.msra.mxu1 %v5819_v22  ;;  %v5827_v30 = vld [vmem:[#allocation20 + $0x44] ss:$8 sps:$4 sm:$0xff]   ;;  %v5830_v33 = vld [vmem:[#allocation20 + $0x34] ss:$8 sps:$4 sm:$0xff]   ;;  %v5828_v57 = vld [vmem:[#allocation20 + $0x30] ss:$8 sps:$4 sm:$0xff]  }
 0xda0   : > { %v5531_v47 = vpop.f32.mrf.mxu1  ;;  %v5833_v35 = vld [vmem:[#allocation20 + $0x24] ss:$8 sps:$4 sm:$0xff]   ;;  %v5831_v36 = vld [vmem:[#allocation20 + $0x20] ss:$8 sps:$4 sm:$0xff]   ;;  %v5836_v37 = vld [vmem:[#allocation20 + $0x14] ss:$8 sps:$4 sm:$0xff]  }
 0xda1   : > { %v4144_v26 = vrot.slane %v4136_v38, %v6888_v8  ;;  %v4151_v56 = vrot.slane %v4137_v39, %v6888_v8  ;;  %v4160_v28 = vrot.slane %v4152_v41, %v6888_v8  ;;  %v4167_v48 = vrot.slane %v4153_v44, %v6888_v8  ;;  %v5834_v38 = vld [vmem:[#allocation20 + $0x10] ss:$8 sps:$4 sm:$0xff]   ;;  %v5839_v39 = vld [vmem:[#allocation20 + $0x4] ss:$8 sps:$4 sm:$0xff]   ;;  %v5837_v41 = vld [vmem:[#allocation20] ss:$8 sps:$4 sm:$0xff]  }
 0xda2   : > { %v5840_v44 = vld [vmem:[#allocation22 + $0x78] sm:$0xff]   ;;  %v5842_v47 = vld [vmem:[#allocation22 + $0x70] sm:$0xff]  }
 0xda3   : > { %v4172_v32 = vcombine.low %v4144_v26, %v4151_v56  ;;  %v5120_v49 = vcombine.high %v4144_v26, %v4151_v56  ;;  %v4188_v50 = vcombine.low %v4160_v28, %v4167_v48  ;;  %v5121_v52 = vcombine.high %v4160_v28, %v4167_v48  ;;  %5274 = vmatprep.subr.bf16.mxu0 %v5840_v44  ;;  %v5843_v26 = vld [vmem:[#allocation22 + $0x30] sm:$0xff]   ;;  %v5844_v56 = vld [vmem:[#allocation22 + $0x68] sm:$0xff]   ;;  %v5846_v48 = vld [vmem:[#allocation22 + $0x60] sm:$0xff]  }
 0xda4   : > { %v5845_v28 = vld [vmem:[#allocation22 + $0x28] sm:$0xff]  }
 0xda5   : > { %v4179_v54 = vrot.slane %v4172_v32, %v6884_v3  ;;  %v4187_v59 = vrot.slane %v5120_v49, %v6884_v3  ;;  %v4195_v31 = vrot.slane %v4188_v50, %v6884_v3  ;;  %v4203_v60 = vrot.slane %v5121_v52, %v6884_v3  ;;  %v5847_v32 = vld [vmem:[#allocation22 + $0x20] sm:$0xff]   ;;  %v5848_v49 = vld [vmem:[#allocation22 + $0x58] sm:$0xff]   ;;  %v5850_v52 = vld [vmem:[#allocation22 + $0x50] sm:$0xff]  }
 0xda6   : > { %v5849_v50 = vld [vmem:[#allocation22 + $0x18] sm:$0xff]  }
 0xda7   : > { %v4205_v61 = vcombine.high %v4179_v54, %v4187_v59  ;;  %v4221_v34 = vcombine.high %v4195_v31, %v4203_v60  ;;  %v4204_v62 = vcombine.low %v4179_v54, %v4187_v59  ;;  %v4220_v63 = vcombine.low %v4195_v31, %v4203_v60 }
 0xda9   : > { %v4219_v4 = vrot.slane %v4205_v61, %v6888_v8  ;;  %v4235_v0 = vrot.slane %v4221_v34, %v6888_v8  ;;  %v4212_v2 = vrot.slane %v4204_v62, %v6888_v8  ;;  %v4228_v5 = vrot.slane %v4220_v63, %v6888_v8 }
 0xdab   : > { %v4238_v6 = vcombine.low %v4219_v4, %v4235_v0  ;;  %v4237_v46 = vcombine.high %v4212_v2, %v4228_v5  ;;  %v4236_v7 = vcombine.low %v4212_v2, %v4228_v5  ;;  %v4239_v3 = vcombine.high %v4219_v4, %v4235_v0  ;;  %v5852_v2 = vld [vmem:[#allocation22 + $0x48] sm:$0xff]  }
 0xdac   : > { %v5853_v5 = vld [vmem:[#allocation22 + $0x8] sm:$0xff]  }
 0xdad   : > { %4245 = vrot.lane.b32.xlu1 %v4238_v6, %s6381_s24  ;;  %4241 = vrot.lane.b32.xlu0 %v4237_v46, %s6379_s10  ;;  %s7468_s10 = sld [smem:[#allocation49_spill]]  ;;  %v5854_v6 = vld [vmem:[#allocation22 + $0x40] sm:$0xff]  }
 0xdae   : > { %s7470_s24 = sld [smem:[#allocation52_spill]]  ;;  %v5855_v46 = vld [vmem:[#allocation22] sm:$0xff]  }
 0xdb1   : > { %4249 = vrot.lane.b32.xlu0 %v4239_v3, %s6380_s15  ;;  %s7469_s15 = sld [smem:[#allocation50_spill]]  ;;  %v4420_v3 = vsub.s32 1, %v6881_v1 }
 0xdb3   : > { %v5131_v61 = vld [vmem:[%s7468_s10] ss:$0 sm:$0xff] }
 0xdb7   : > { %v5132_v62 = vld [vmem:[%s7469_s15] ss:$0 sm:$0xff] }
 0xe1f   : > { %v4242_v9 = vpop.permute.xlu0 %4241  ;;  %v4246_v10 = vpop.permute.xlu1 %4245 }
 0xe20   : > { %v4252_v42 = vsel %vm2103_vm1, %v4236_v7, %v4242_v9  ;;  %v4412_v7 = vld [vmem:[%s7470_s24] sm:$0x3] }
 0xe21   : > { %v4253_v11 = vsel %vm2689_vm8, %v4252_v42, %v4246_v10  ;;  %v4417_v9 = vrot.slane %v4412_v7, %v3865_v51  ;;  %v4421_v10 = vrot.slane %v4412_v7, %v4420_v3 }
 0xe23   : > { %v4250_v43 = vpop.permute.xlu0 %4249 }
 0xe24   : > { %v4254_v8 = vsel %vm2691_vm9, %v4253_v11, %v4250_v43 }
 0xe25   : > { %v4255_v12 = vpack.c.bf16 %v4254_v8, %v4254_v8 }
 0xe27   : > { %5549 = vmatmul.mubr.bf16.vlgmr.msra.gmra.mxu0 %v4255_v12 }
 0xe28   : > { %5275 = vmatpush3.bf16.msra.mxu0 %v5841_v45 }
 0xe29   : > { %5276 = vmatprep.subr.bf16.mxu0 %v5842_v47 }
 0xe2c   : > { %5277 = vmatpush3.bf16.msra.mxu0 %v5843_v26 }
 0xe2d   : > { %5278 = vmatprep.subr.bf16.mxu0 %v5844_v56 }
 0xe30   : > { %5279 = vmatpush3.bf16.msra.mxu0 %v5845_v28 }
 0xe31   : > { %5280 = vmatprep.subr.bf16.mxu0 %v5846_v48 }
 0xe34   : > { %5281 = vmatpush3.bf16.msra.mxu0 %v5847_v32 }
 0xe35   : > { %5282 = vmatprep.subr.bf16.mxu0 %v5848_v49 }
 0xe38   : > { %5283 = vmatpush3.bf16.msra.mxu0 %v5849_v50 }
 0xe39   : > { %5284 = vmatprep.subr.bf16.mxu0 %v5850_v52 }
 0xe3c   : > { %5285 = vmatpush3.bf16.msra.mxu0 %v5851_v53 }
 0xe3d   : > { %5286 = vmatprep.subr.bf16.mxu0 %v5852_v2 }
 0xe40   : > { %5287 = vmatpush3.bf16.msra.mxu0 %v5853_v5 }
 0xe41   : > { %5288 = vmatprep.subr.bf16.mxu0 %v5854_v6 }
 0xe44   : > { %5289 = vmatpush3.bf16.msra.mxu0 %v5855_v46 }
 0xee7   : > { %v4361_v13 = vpop.f32.mrf.mxu0 }
 0xee8   : > { %v4362_v55 = vadd.f32 %v5122_v17, %v4361_v13 }
 0xee9   : > { %v5550_v14 = vpop.f32.mrf.mxu0 }
 0xeea   : > { %v7321_v15 = vadd.f32 %v4362_v55, %v7086_v40  ;;  %v5824_v40 = vld [vmem:[#allocation20 + $0x54] ss:$8 sps:$4 sm:$0xff]  }
 0xeeb   : > { %v4364_v16 = vpop.f32.mrf.mxu0  ;;  %4508 = vmatprep.subr.bf16.mxu1 %v5824_v40 }
 0xeec   : > { %4370 = vadd.xlane.f32.xlu1 %v7321_v15  ;;  %4509 = vmatpush1.bf16.msra.mxu1 %v5822_v58 }
 0xeed   : > { %v5551_v18 = vpop.f32.mrf.mxu0  ;;  %4510 = vmatprep.subr.bf16.mxu1 %v5827_v30 }
 0xeee   : > { %v5149_v18 = vld [vmem:[%s7471_s16] ss:$0 sm:$0xff] }
 0xef0   : > { %4511 = vmatpush1.bf16.msra.mxu1 %v5825_v29 }
 0xef1   : > { %4512 = vmatprep.subr.bf16.mxu1 %v5830_v33 }
 0xef4   : > { %4513 = vmatpush1.bf16.msra.mxu1 %v5828_v57 }
 0xef5   : > { %4514 = vmatprep.subr.bf16.mxu1 %v5833_v35 }
 0xef8   : > { %4515 = vmatpush1.bf16.msra.mxu1 %v5831_v36 }
 0xef9   : > { %4516 = vmatprep.subr.bf16.mxu1 %v5836_v37 }
 0xefc   : > { %4517 = vmatpush1.bf16.msra.mxu1 %v5834_v38 }
 0xefd   : > { %4518 = vmatprep.subr.bf16.mxu1 %v5839_v39 }
 0xf00   : > { %4519 = vmatpush1.bf16.msra.mxu1 %v5837_v41 }
 0xf75   : > { %v4371_v23 = vpop.xlane.xlu1 %4370 }
 0xf76   : > { %v4372_v24 = vmul.f32 0.0078125, %v4371_v23 }
 0xf78   : > { %v4373_v25 = vsub.f32 %v7321_v15, %v4372_v24 }
 0xf7a   : > { %v4374_v27 = vmul.f32 %v4373_v25, %v4373_v25 }
 0xf7c   : > { %4375 = vadd.xlane.f32.xlu0 %v4374_v27 }
0x1005   : > { %v4376_v54 = vpop.xlane.xlu0 %4375 }
0x1006   : > { %v4377_v59 = vmul.f32 0.0078125, %v4376_v54 }
0x1008   : > { %v4378_v31 = vadd.f32 1e-06, %v4377_v59 }
0x100a   : > { %5892 = vrsqrt.f32 %v4378_v31 }
0x1017   : > { %v5893_v60 = vpop.eup %5892 }
0x1018   : > { %v4380_v34 = vmul.f32 %v5893_v60, %v4373_v25 }
0x101a   : > { %v4387_v63 = vmul.f32 %v5131_v61, %v4380_v34 }
0x101c   : > { %v4394_v4 = vadd.f32 %v5132_v62, %v4387_v63 }
0x101e   : > { %v4395_v0 = vpack.c.bf16 %v4394_v4, %v4394_v4 }
0x1020   : > { %4537 = vmatmul.mubr.bf16.vlgmr.msra.gmra.mxu1 %v4395_v0 }
0x10e0   : > { %v4538_v42 = vpop.f32.mrf.mxu1 }
0x10e1   : > { %v4539_v43 = vadd.f32 %v4538_v42, %v4417_v9 }
0x10e2   : > { %v4540_v11 = vpop.f32.mrf.mxu1 }
0x10e3   : > { %v4541_v8 = vadd.f32 %v4540_v11, %v4421_v10  ;;  %v4545_v12 = vmax.f32 %v4539_v43, 0.0 }
0x10e4   : > { %v4542_v17 = vpop.f32.mrf.mxu1 }
0x10e5   : > { %v4546_v13 = vmax.f32 %v4541_v8, 0.0  ;;  %v4547_v16 = vpack.c.bf16 %v4545_v12, %v4545_v12 }
0x10e6   : > { %v4543_v55 = vpop.f32.mrf.mxu1 }
0x10e7   : > { %v4548_v14 = vpack.c.bf16 %v4546_v13, %v4546_v13 }
0x10e9   : > { %4716 = vmatprep.mubr.bf16.mxu0 %v4548_v14 }
0x10ea   : > { %4717 = vmatmul.mubr.bf16.vlgmr.msra.gmra.mxu0 %v4547_v16 }
0x11aa   : > { %v5290_v1 = vpop.f32.mrf.mxu0 }
0x11ac   : > { %v5291_v51 = vpop.f32.mrf.mxu0 }
0x11ad   : > { %v5292_v19 = vadd.f32 %v5291_v51, %v5290_v1 }
0x11ae   : > { %v5293_v20 = vpop.f32.mrf.mxu0 }
0x11af   : > { %v4719_v21 = vadd.f32 %v5292_v19, %v5149_v18 }
0x11b0   : > { %v5294_v22 = vpop.f32.mrf.mxu0 }
0x11b1   : > { %v4724_v23 = vadd.f32 %v4719_v21, %v7321_v15 }
0x11b3   : > { %4725 = vst [vmem:[%s1213_s18] sm:$0xff] %v4724_v23 }
0x11b4   : > { %6252 = shalt.err (!%p6249_p0)
}
0x11b5   : > { %s6253_s2 = scalar_lea.hbm %s4738_s4, 128  ;;  %s6257_s11 = scalar_lea.hbm %s7473_s27, 256 }
0x11b6   : > { %p6254_p1 = scmp.ne.s32.totalorder %s4738_s4, %s6253_s2  ;;  %p6258_p5 = scmp.lt.s32.totalorder %s4738_s4, %s7473_s27 }
0x11b7   : > { %p6259_p11 = scmp.lt.s32.totalorder %s6257_s11, %s6253_s2 }
0x11b8   : > { %p6255_p2 = pnand %p6254_p1, %p7475_p12 }
0x11b9   : > { %p6260_p8 = por %p6259_p11, %p6258_p5 }
0x11ba   : > { %p6256_p3 = pneg %p6255_p2 }
0x11bc   : > { %p6261_p6 = pnand %p6260_p8, %p6256_p3 }
0x11be   : > { %6264 = shalt.err (!%p6261_p6)
}
0x11bf   : > { %5598 = dma.vmem_to_hbm [thread:$0]  (%p7475_p12), %s4741_s1, 128, %s4738_s4, %s4727_s26  }
0x11c0 PF: > { %s7476_s8 = sld [smem:[#allocation55_spill]]  ;;  %p7479_p9 = scmp.ge.s32.totalorder %s6327_s28, 2 }
0x11c1   : > { %s7477_s0 = sld [smem:[#allocation60_spill]] }
0x11c6   : > { %s4752_s10 = sand.u32 1, %s7476_s8  }
0x11c7   : > { %p7478_p13 = scmp.ne.s32.totalorder %s7477_s0, 0  ;;  %s4753_s15 = scalar_lea.sflag [#allocation4], %s4752_s10 }
0x11c9   : > { %p5642_p4 = pnand %p7479_p9, %p7478_p13 }
0x11cb   : > { %p5643_p7 = pneg %p5642_p4 }
0x11cd   : > { %6310 = dma.done.wait (%p5643_p7), %s4753_s15, 128  }
0x11ce   : > { %6312 = vsyncadd (%p5643_p7), %s4753_s15, 4294967168  ;;  %s7480_s28 = sld [smem:[#allocation57_spill]]  ;;  %s7483_s22 = smov %s6319_s23 }
0x11cf   : > { %s7481_s24 = sld [smem:[#allocation56_spill]] }
0x11d0   : > { %s7482_s26 = sld [smem:[#allocation58_spill]] }
0x11d4   : > { %p84_p10 = scmp.ge.s32.totalorder %s7480_s28, 4  }
0x11d5   : > { %s7484_s23 = smov %s7481_s24 }
0x11d6   :  { %86 = sbr.rel (!%p84_p10) target bundleno = 71 (0x47), region = 290 }
0x11db   :  { %4758 = vsyncpa [#allocation3], 1 }
0x11dc   :  { %4760 = vsyncpa [#allocation3 + $0x1], 1 }
0x11dd   :  { %4761 = vsyncpa [#allocation6], 1 }
0x11de   :  { %4763 = vsyncpa [#allocation6 + $0x1], 1 }
0x11df   :  { %4764 = vsyncpa [#allocation9], 1 }
0x11e0   :  { %4765 = vsyncpa [#allocation12], 1 }
0x11e1   :  { %4766 = vsyncpa [#allocation15], 1 }
0x11e2   :  { %4767 = vsyncpa [#allocation18], 1 }
0x11e3   :  { %4768 = vsyncpa [#allocation21], 1 }
0x11e4   :  { %4769 = vsyncpa [#allocation4], 1 }
0x11e5   :  { %4771 = vsyncpa [#allocation4 + $0x1], 1 }

</bundles_post_ra>
